<compile_context>
chip_gen: v7x
topology: tpu7x:2x2x1
jax: 0.10.0
libtpu: 0.0.40
codegen_flags: <defaults>
</compile_context>

<pallas_src>
import functools

import jax
import jax.numpy as jnp
from jax.experimental import pallas as pl
from jax.experimental.pallas import tpu as pltpu

KSIZE = 7
PAD = (KSIZE - 1) // 2  # 3
BN_EPS = 1e-5


def _spatial_gate_kernel(x_ref, w_ref, bn_ref, o_ref, mx_pad, mean_pad, *, NB, C, H, W):
    """One grid step processes NB images.

    x_ref : (NB, C, H, W)   VMEM block, source dtype
    w_ref : (98,)  f32 SMEM conv weight, [c, kh, kw] row-major
    bn_ref: (4,)   f32 SMEM (gamma, beta, running_mean, running_var)
    o_ref : (NB, 1, H, W)   VMEM output block
    mx_pad, mean_pad : (H+6, W+6) f32 VMEM scratch (zero-padded pooled planes)
    """
    # Zero the padded pooled planes once per grid step: the 3-wide border stays zero,
    # the (H, W) interior is overwritten for every image below.
    mx_pad[...] = jnp.zeros_like(mx_pad)
    mean_pad[...] = jnp.zeros_like(mean_pad)

    # BatchNorm2d(1), eval form: y = x * scale + shift  (scalars, computed once).
    gamma, beta = bn_ref[0], bn_ref[1]
    rmean, rvar = bn_ref[2], bn_ref[3]
    scale = gamma * jax.lax.rsqrt(rvar + BN_EPS)
    shift = beta - rmean * scale
    inv_c = jnp.float32(1.0 / C)

    def per_image(b, carry):
        # --- ChannelPool: single pass over C (running max + running sum). ---
        p0 = x_ref[b, 0].astype(jnp.float32)
        run_max = p0
        run_sum = p0
        for c in range(1, C):                     # static unroll; one plane live at a time
            p = x_ref[b, c].astype(jnp.float32)
            run_max = jnp.maximum(run_max, p)
            run_sum = run_sum + p
        mx_pad[pl.ds(PAD, H), pl.ds(PAD, W)] = run_max
        mean_pad[pl.ds(PAD, H), pl.ds(PAD, W)] = run_sum * inv_c

        # --- 7x7 conv, 2 in-channels -> 1 out-channel, no bias. ---
        # Each tap is a static-offset (H, W) window load of a padded VMEM scratch
        # plane; 4 independent accumulators give the VALU ILP instead of one
        # 98-add serial dependency chain.
        accs = [jnp.zeros((H, W), jnp.float32) for _ in range(4)]
        for ci, plane in enumerate((mx_pad, mean_pad)):
            for kh in range(KSIZE):
                for kw in range(KSIZE):
                    t = ci * KSIZE * KSIZE + kh * KSIZE + kw
                    tap = plane[pl.ds(kh, H), pl.ds(kw, W)]
                    accs[t % 4] = accs[t % 4] + w_ref[t] * tap
        acc = (accs[0] + accs[1]) + (accs[2] + accs[3])

        # --- BatchNorm2d(1) + writeback. ---
        o_ref[b, 0] = (acc * scale + shift).astype(o_ref.dtype)
        return carry

    if NB <= 8:
        for b in range(NB):                       # small NB: static unroll
            per_image(b, 0)
    else:
        jax.lax.fori_loop(0, NB, per_image, 0)    # large NB: keep code size bounded


def spatial_gate(x, conv_w, bn_params, *, target_tile_bytes=1 << 20):
    """x: (N, C, H, W). conv_w: (1, 2, 7, 7). bn_params: (4,) = (gamma, beta, mean, var)."""
    N, C, H, W = x.shape
    Hp, Wp = H + 2 * PAD, W + 2 * PAD
    itemsize = jnp.dtype(x.dtype).itemsize

    # Images per grid step: largest divisor of N whose input tile is <= ~1 MiB
    # (the pipeline double-buffers it, so this stays far inside even v7x's 64 MiB VMEM).
    per_image_bytes = C * H * W * itemsize
    nb_cap = int(max(1, min(N, target_tile_bytes // max(per_image_bytes, 1))))
    NB = 1
    for d in range(1, N + 1):
        if N % d == 0 and d <= nb_cap:
            NB = d
    grid = (N // NB,)

    w_flat = conv_w.reshape(-1).astype(jnp.float32)   # (98,)
    bn_flat = bn_params.astype(jnp.float32)           # (4,)

    kernel = functools.partial(_spatial_gate_kernel, NB=NB, C=C, H=H, W=W)

    cost = pl.CostEstimate(
        flops=int(N * H * W * (2 * C + 2 * 2 * KSIZE * KSIZE)),
        transcendentals=0,
        bytes_accessed=int(N * C * H * W * itemsize + N * H * W * itemsize),
    )

    # Double-buffered in/out tiles + two padded f32 scratch planes + headroom.
    vmem_bytes = 2 * (NB * C * H * W + NB * H * W) * itemsize + 2 * Hp * Wp * 4
    vmem_bytes = int(min(max(vmem_bytes + (2 << 20), 4 << 20), 64 << 20))

    # NOTE: for very large per-image C*H*W (e.g. C=512 at 256x256) a C-tiling grid axis
    # marked "arbitrary" with running max/sum accumulators in VMEM scratch would be
    # needed to bound the tile; unnecessary at these sizes.
    return pl.pallas_call(
        kernel,
        out_shape=jax.ShapeDtypeStruct((N, 1, H, W), x.dtype),
        grid=grid,
        in_specs=[
            pl.BlockSpec((NB, C, H, W), lambda n: (n, 0, 0, 0)),
            pl.BlockSpec(memory_space=pltpu.MemorySpace.SMEM),
            pl.BlockSpec(memory_space=pltpu.MemorySpace.SMEM),
        ],
        out_specs=pl.BlockSpec((NB, 1, H, W), lambda n: (n, 0, 0, 0)),
        scratch_shapes=[
            pltpu.VMEM((Hp, Wp), jnp.float32),
            pltpu.VMEM((Hp, Wp), jnp.float32),
        ],
        compiler_params=pltpu.CompilerParams(
            dimension_semantics=("parallel",),
            vmem_limit_bytes=vmem_bytes),
        cost_estimate=cost,
    )(x, w_flat, bn_flat)


def spatial_gate_reference(x, conv_w, bn_params):
    """Plain-JAX reference mirroring the PyTorch forward (BN in eval mode)."""
    mx = jnp.max(x, axis=1, keepdims=True)
    mean = jnp.mean(x, axis=1, keepdims=True)
    pooled = jnp.concatenate([mx, mean], axis=1)               # (N, 2, H, W)
    y = jax.lax.conv_general_dilated(
        pooled.astype(jnp.float32), conv_w.astype(jnp.float32),
        window_strides=(1, 1), padding=((PAD, PAD), (PAD, PAD)),
        dimension_numbers=("NCHW", "OIHW", "NCHW"))
    gamma, beta, rmean, rvar = bn_params
    y = (y - rmean) * gamma * jax.lax.rsqrt(rvar + BN_EPS) + beta
    return y.astype(x.dtype)


if __name__ == "__main__":
    key = jax.random.PRNGKey(0)
    kx, kw = jax.random.split(key)

    N, C, H, W = 2, 4, 16, 16
    x = jax.random.normal(kx, (N, C, H, W), dtype=jnp.float32)

    # Deterministic synthetic parameters (not a checkpoint).
    conv_w = jax.random.normal(kw, (1, 2, KSIZE, KSIZE), dtype=jnp.float32) * 0.1
    # BatchNorm2d(1) defaults: gamma=1, beta=0, running_mean=0, running_var=1.
    bn_params = jnp.array([1.0, 0.0, 0.0, 1.0], dtype=jnp.float32)

    out = spatial_gate(x, conv_w, bn_params)
    out = jax.block_until_ready(out)

    ref = spatial_gate_reference(x, conv_w, bn_params)
    assert out.shape == (N, 1, H, W), out.shape
    max_err = float(jnp.max(jnp.abs(out - ref)))
    assert jnp.allclose(out, ref, atol=1e-4, rtol=1e-4), max_err

    print("KERNEL_OK")
</pallas_src>

<mosaic_0001>
module attributes {stable_mosaic.version = 11 : i64} {
  func.func @_spatial_gate_kernel(%arg0: i32, %arg1: memref<2x4x16x16xf32, #tpu.memory_space<vmem>>, %arg2: memref<98xf32, #tpu.memory_space<smem>>, %arg3: memref<4xf32, #tpu.memory_space<smem>>, %arg4: memref<2x1x16x16xf32, #tpu.memory_space<vmem>>, %arg5: memref<22x22xf32, #tpu.memory_space<vmem>>, %arg6: memref<22x22xf32, #tpu.memory_space<vmem>>) attributes {dimension_semantics = [#tpu.dimension_semantics<parallel>], iteration_bounds = array<i64: 1>, scalar_prefetch = 0 : i64, scratch_operands = 2 : i64, tpu.core_type = #tpu.core_type<tc>, window_params = [{transform_indices = @transform_0, window_bounds = array<i64: 2, 4, 16, 16>}, {transform_indices = @transform_1, window_bounds = array<i64: 98>}, {transform_indices = @transform_2, window_bounds = array<i64: 4>}, {transform_indices = @transform_3, window_bounds = array<i64: 2, 1, 16, 16>}]} {
    %cst = arith.constant 0.000000e+00 : f32
    %0 = vector.broadcast %cst : f32 to vector<22x22xf32>
    %c0 = arith.constant 0 : index
    %c0_0 = arith.constant 0 : index
    %1 = vector.load %arg5[%c0, %c0_0] : memref<22x22xf32, #tpu.memory_space<vmem>>, vector<22x22xf32>
    tpu.vector_store %arg5[%c0, %c0_0], %0 {strides = array<i32>} : memref<22x22xf32, #tpu.memory_space<vmem>>, vector<22x22xf32>,
    %cst_1 = arith.constant 0.000000e+00 : f32
    %2 = vector.broadcast %cst_1 : f32 to vector<22x22xf32>
    %c0_2 = arith.constant 0 : index
    %c0_3 = arith.constant 0 : index
    %3 = vector.load %arg6[%c0_2, %c0_3] : memref<22x22xf32, #tpu.memory_space<vmem>>, vector<22x22xf32>
    tpu.vector_store %arg6[%c0_2, %c0_3], %2 {strides = array<i32>} : memref<22x22xf32, #tpu.memory_space<vmem>>, vector<22x22xf32>,
    %c0_4 = arith.constant 0 : index
    %4 = memref.load %arg3[%c0_4] : memref<4xf32, #tpu.memory_space<smem>>
    %c1 = arith.constant 1 : index
    %5 = memref.load %arg3[%c1] : memref<4xf32, #tpu.memory_space<smem>>
    %c2 = arith.constant 2 : index
    %6 = memref.load %arg3[%c2] : memref<4xf32, #tpu.memory_space<smem>>
    %c3 = arith.constant 3 : index
    %7 = memref.load %arg3[%c3] : memref<4xf32, #tpu.memory_space<smem>>
    %cst_5 = arith.constant 9.99999974E-6 : f32
    %8 = arith.addf %7, %cst_5 : f32
    %9 = math.rsqrt %8 : f32
    %10 = arith.mulf %4, %9 : f32
    %11 = arith.mulf %6, %10 : f32
    %12 = arith.subf %5, %11 : f32
    %c0_6 = arith.constant 0 : index
    %c0_7 = arith.constant 0 : index
    %c0_8 = arith.constant 0 : index
    %c0_9 = arith.constant 0 : index
    %13 = vector.load %arg1[%c0_6, %c0_7, %c0_8, %c0_9] : memref<2x4x16x16xf32, #tpu.memory_space<vmem>>, vector<1x1x16x16xf32>
    %14 = vector.shape_cast %13 : vector<1x1x16x16xf32> to vector<16x16xf32>
    %c0_10 = arith.constant 0 : index
    %c1_11 = arith.constant 1 : index
    %c0_12 = arith.constant 0 : index
    %c0_13 = arith.constant 0 : index
    %15 = vector.load %arg1[%c0_10, %c1_11, %c0_12, %c0_13] : memref<2x4x16x16xf32, #tpu.memory_space<vmem>>, vector<1x1x16x16xf32>
    %16 = vector.shape_cast %15 : vector<1x1x16x16xf32> to vector<16x16xf32>
    %17 = arith.maximumf %14, %16 : vector<16x16xf32>
    %18 = arith.addf %14, %16 : vector<16x16xf32>
    %c0_14 = arith.constant 0 : index
    %c2_15 = arith.constant 2 : index
    %c0_16 = arith.constant 0 : index
    %c0_17 = arith.constant 0 : index
    %19 = vector.load %arg1[%c0_14, %c2_15, %c0_16, %c0_17] : memref<2x4x16x16xf32, #tpu.memory_space<vmem>>, vector<1x1x16x16xf32>
    %20 = vector.shape_cast %19 : vector<1x1x16x16xf32> to vector<16x16xf32>
    %21 = arith.maximumf %17, %20 : vector<16x16xf32>
    %22 = arith.addf %18, %20 : vector<16x16xf32>
    %c0_18 = arith.constant 0 : index
    %c3_19 = arith.constant 3 : index
    %c0_20 = arith.constant 0 : index
    %c0_21 = arith.constant 0 : index
    %23 = vector.load %arg1[%c0_18, %c3_19, %c0_20, %c0_21] : memref<2x4x16x16xf32, #tpu.memory_space<vmem>>, vector<1x1x16x16xf32>
    %24 = vector.shape_cast %23 : vector<1x1x16x16xf32> to vector<16x16xf32>
    %25 = arith.maximumf %21, %24 : vector<16x16xf32>
    %26 = arith.addf %22, %24 : vector<16x16xf32>
    %c3_22 = arith.constant 3 : index
    %c3_23 = arith.constant 3 : index
    %27 = vector.load %arg5[%c3_22, %c3_23] : memref<22x22xf32, #tpu.memory_space<vmem>>, vector<16x16xf32>
    tpu.vector_store %arg5[%c3_22, %c3_23], %25 {strides = array<i32>} : memref<22x22xf32, #tpu.memory_space<vmem>>, vector<16x16xf32>,
    %cst_24 = arith.constant 2.500000e-01 : f32
    %28 = vector.broadcast %cst_24 : f32 to vector<16x16xf32>
    %29 = arith.mulf %26, %28 : vector<16x16xf32>
    %c3_25 = arith.constant 3 : index
    %c3_26 = arith.constant 3 : index
    %30 = vector.load %arg6[%c3_25, %c3_26] : memref<22x22xf32, #tpu.memory_space<vmem>>, vector<16x16xf32>
    tpu.vector_store %arg6[%c3_25, %c3_26], %29 {strides = array<i32>} : memref<22x22xf32, #tpu.memory_space<vmem>>, vector<16x16xf32>,
    %cst_27 = arith.constant 0.000000e+00 : f32
    %31 = vector.broadcast %cst_27 : f32 to vector<16x16xf32>
    %cst_28 = arith.constant 0.000000e+00 : f32
    %32 = vector.broadcast %cst_28 : f32 to vector<16x16xf32>
    %cst_29 = arith.constant 0.000000e+00 : f32
    %33 = vector.broadcast %cst_29 : f32 to vector<16x16xf32>
    %cst_30 = arith.constant 0.000000e+00 : f32
    %34 = vector.broadcast %cst_30 : f32 to vector<16x16xf32>
    %c0_31 = arith.constant 0 : index
    %c0_32 = arith.constant 0 : index
    %35 = vector.load %arg5[%c0_31, %c0_32] : memref<22x22xf32, #tpu.memory_space<vmem>>, vector<16x16xf32>
    %c0_33 = arith.constant 0 : index
    %36 = memref.load %arg2[%c0_33] : memref<98xf32, #tpu.memory_space<smem>>
    %37 = vector.broadcast %36 : f32 to vector<16x16xf32>
    %38 = arith.mulf %37, %35 : vector<16x16xf32>
    %39 = arith.addf %31, %38 : vector<16x16xf32>
    %c0_34 = arith.constant 0 : index
    %c1_35 = arith.constant 1 : index
    %40 = vector.load %arg5[%c0_34, %c1_35] : memref<22x22xf32, #tpu.memory_space<vmem>>, vector<16x16xf32>
    %c1_36 = arith.constant 1 : index
    %41 = memref.load %arg2[%c1_36] : memref<98xf32, #tpu.memory_space<smem>>
    %42 = vector.broadcast %41 : f32 to vector<16x16xf32>
    %43 = arith.mulf %42, %40 : vector<16x16xf32>
    %44 = arith.addf %32, %43 : vector<16x16xf32>
    %c0_37 = arith.constant 0 : index
    %c2_38 = arith.constant 2 : index
    %45 = vector.load %arg5[%c0_37, %c2_38] : memref<22x22xf32, #tpu.memory_space<vmem>>, vector<16x16xf32>
    %c2_39 = arith.constant 2 : index
    %46 = memref.load %arg2[%c2_39] : memref<98xf32, #tpu.memory_space<smem>>
    %47 = vector.broadcast %46 : f32 to vector<16x16xf32>
    %48 = arith.mulf %47, %45 : vector<16x16xf32>
    %49 = arith.addf %33, %48 : vector<16x16xf32>
    %c0_40 = arith.constant 0 : index
    %c3_41 = arith.constant 3 : index
    %50 = vector.load %arg5[%c0_40, %c3_41] : memref<22x22xf32, #tpu.memory_space<vmem>>, vector<16x16xf32>
    %c3_42 = arith.constant 3 : index
    %51 = memref.load %arg2[%c3_42] : memref<98xf32, #tpu.memory_space<smem>>
    %52 = vector.broadcast %51 : f32 to vector<16x16xf32>
    %53 = arith.mulf %52, %50 : vector<16x16xf32>
    %54 = arith.addf %34, %53 : vector<16x16xf32>
    %c0_43 = arith.constant 0 : index
    %c4 = arith.constant 4 : index
    %55 = vector.load %arg5[%c0_43, %c4] : memref<22x22xf32, #tpu.memory_space<vmem>>, vector<16x16xf32>
    %c4_44 = arith.constant 4 : index
    %56 = memref.load %arg2[%c4_44] : memref<98xf32, #tpu.memory_space<smem>>
    %57 = vector.broadcast %56 : f32 to vector<16x16xf32>
    %58 = arith.mulf %57, %55 : vector<16x16xf32>
    %59 = arith.addf %39, %58 : vector<16x16xf32>
    %c0_45 = arith.constant 0 : index
    %c5 = arith.constant 5 : index
    %60 = vector.load %arg5[%c0_45, %c5] : memref<22x22xf32, #tpu.memory_space<vmem>>, vector<16x16xf32>
    %c5_46 = arith.constant 5 : index
    %61 = memref.load %arg2[%c5_46] : memref<98xf32, #tpu.memory_space<smem>>
    %62 = vector.broadcast %61 : f32 to vector<16x16xf32>
    %63 = arith.mulf %62, %60 : vector<16x16xf32>
    %64 = arith.addf %44, %63 : vector<16x16xf32>
    %c0_47 = arith.constant 0 : index
    %c6 = arith.constant 6 : index
    %65 = vector.load %arg5[%c0_47, %c6] : memref<22x22xf32, #tpu.memory_space<vmem>>, vector<16x16xf32>
    %c6_48 = arith.constant 6 : index
    %66 = memref.load %arg2[%c6_48] : memref<98xf32, #tpu.memory_space<smem>>
    %67 = vector.broadcast %66 : f32 to vector<16x16xf32>
    %68 = arith.mulf %67, %65 : vector<16x16xf32>
    %69 = arith.addf %49, %68 : vector<16x16xf32>
    %c1_49 = arith.constant 1 : index
    %c0_50 = arith.constant 0 : index
    %70 = vector.load %arg5[%c1_49, %c0_50] : memref<22x22xf32, #tpu.memory_space<vmem>>, vector<16x16xf32>
    %c7 = arith.constant 7 : index
    %71 = memref.load %arg2[%c7] : memref<98xf32, #tpu.memory_space<smem>>
    %72 = vector.broadcast %71 : f32 to vector<16x16xf32>
    %73 = arith.mulf %72, %70 : vector<16x16xf32>
    %74 = arith.addf %54, %73 : vector<16x16xf32>
    %c1_51 = arith.constant 1 : index
    %c1_52 = arith.constant 1 : index
    %75 = vector.load %arg5[%c1_51, %c1_52] : memref<22x22xf32, #tpu.memory_space<vmem>>, vector<16x16xf32>
    %c8 = arith.constant 8 : index
    %76 = memref.load %arg2[%c8] : memref<98xf32, #tpu.memory_space<smem>>
    %77 = vector.broadcast %76 : f32 to vector<16x16xf32>
    %78 = arith.mulf %77, %75 : vector<16x16xf32>
    %79 = arith.addf %59, %78 : vector<16x16xf32>
    %c1_53 = arith.constant 1 : index
    %c2_54 = arith.constant 2 : index
    %80 = vector.load %arg5[%c1_53, %c2_54] : memref<22x22xf32, #tpu.memory_space<vmem>>, vector<16x16xf32>
    %c9 = arith.constant 9 : index
    %81 = memref.load %arg2[%c9] : memref<98xf32, #tpu.memory_space<smem>>
    %82 = vector.broadcast %81 : f32 to vector<16x16xf32>
    %83 = arith.mulf %82, %80 : vector<16x16xf32>
    %84 = arith.addf %64, %83 : vector<16x16xf32>
    %c1_55 = arith.constant 1 : index
    %c3_56 = arith.constant 3 : index
    %85 = vector.load %arg5[%c1_55, %c3_56] : memref<22x22xf32, #tpu.memory_space<vmem>>, vector<16x16xf32>
    %c10 = arith.constant 10 : index
    %86 = memref.load %arg2[%c10] : memref<98xf32, #tpu.memory_space<smem>>
    %87 = vector.broadcast %86 : f32 to vector<16x16xf32>
    %88 = arith.mulf %87, %85 : vector<16x16xf32>
    %89 = arith.addf %69, %88 : vector<16x16xf32>
    %c1_57 = arith.constant 1 : index
    %c4_58 = arith.constant 4 : index
    %90 = vector.load %arg5[%c1_57, %c4_58] : memref<22x22xf32, #tpu.memory_space<vmem>>, vector<16x16xf32>
    %c11 = arith.constant 11 : index
    %91 = memref.load %arg2[%c11] : memref<98xf32, #tpu.memory_space<smem>>
    %92 = vector.broadcast %91 : f32 to vector<16x16xf32>
    %93 = arith.mulf %92, %90 : vector<16x16xf32>
    %94 = arith.addf %74, %93 : vector<16x16xf32>
    %c1_59 = arith.constant 1 : index
    %c5_60 = arith.constant 5 : index
    %95 = vector.load %arg5[%c1_59, %c5_60] : memref<22x22xf32, #tpu.memory_space<vmem>>, vector<16x16xf32>
    %c12 = arith.constant 12 : index
    %96 = memref.load %arg2[%c12] : memref<98xf32, #tpu.memory_space<smem>>
    %97 = vector.broadcast %96 : f32 to vector<16x16xf32>
    %98 = arith.mulf %97, %95 : vector<16x16xf32>
    %99 = arith.addf %79, %98 : vector<16x16xf32>
    %c1_61 = arith.constant 1 : index
    %c6_62 = arith.constant 6 : index
    %100 = vector.load %arg5[%c1_61, %c6_62] : memref<22x22xf32, #tpu.memory_space<vmem>>, vector<16x16xf32>
    %c13 = arith.constant 13 : index
    %101 = memref.load %arg2[%c13] : memref<98xf32, #tpu.memory_space<smem>>
    %102 = vector.broadcast %101 : f32 to vector<16x16xf32>
    %103 = arith.mulf %102, %100 : vector<16x16xf32>
    %104 = arith.addf %84, %103 : vector<16x16xf32>
    %c2_63 = arith.constant 2 : index
    %c0_64 = arith.constant 0 : index
    %105 = vector.load %arg5[%c2_63, %c0_64] : memref<22x22xf32, #tpu.memory_space<vmem>>, vector<16x16xf32>
    %c14 = arith.constant 14 : index
    %106 = memref.load %arg2[%c14] : memref<98xf32, #tpu.memory_space<smem>>
    %107 = vector.broadcast %106 : f32 to vector<16x16xf32>
    %108 = arith.mulf %107, %105 : vector<16x16xf32>
    %109 = arith.addf %89, %108 : vector<16x16xf32>
    %c2_65 = arith.constant 2 : index
    %c1_66 = arith.constant 1 : index
    %110 = vector.load %arg5[%c2_65, %c1_66] : memref<22x22xf32, #tpu.memory_space<vmem>>, vector<16x16xf32>
    %c15 = arith.constant 15 : index
    %111 = memref.load %arg2[%c15] : memref<98xf32, #tpu.memory_space<smem>>
    %112 = vector.broadcast %111 : f32 to vector<16x16xf32>
    %113 = arith.mulf %112, %110 : vector<16x16xf32>
    %114 = arith.addf %94, %113 : vector<16x16xf32>
    %c2_67 = arith.constant 2 : index
    %c2_68 = arith.constant 2 : index
    %115 = vector.load %arg5[%c2_67, %c2_68] : memref<22x22xf32, #tpu.memory_space<vmem>>, vector<16x16xf32>
    %c16 = arith.constant 16 : index
    %116 = memref.load %arg2[%c16] : memref<98xf32, #tpu.memory_space<smem>>
    %117 = vector.broadcast %116 : f32 to vector<16x16xf32>
    %118 = arith.mulf %117, %115 : vector<16x16xf32>
    %119 = arith.addf %99, %118 : vector<16x16xf32>
    %c2_69 = arith.constant 2 : index
    %c3_70 = arith.constant 3 : index
    %120 = vector.load %arg5[%c2_69, %c3_70] : memref<22x22xf32, #tpu.memory_space<vmem>>, vector<16x16xf32>
    %c17 = arith.constant 17 : index
    %121 = memref.load %arg2[%c17] : memref<98xf32, #tpu.memory_space<smem>>
    %122 = vector.broadcast %121 : f32 to vector<16x16xf32>
    %123 = arith.mulf %122, %120 : vector<16x16xf32>
    %124 = arith.addf %104, %123 : vector<16x16xf32>
    %c2_71 = arith.constant 2 : index
    %c4_72 = arith.constant 4 : index
    %125 = vector.load %arg5[%c2_71, %c4_72] : memref<22x22xf32, #tpu.memory_space<vmem>>, vector<16x16xf32>
    %c18 = arith.constant 18 : index
    %126 = memref.load %arg2[%c18] : memref<98xf32, #tpu.memory_space<smem>>
    %127 = vector.broadcast %126 : f32 to vector<16x16xf32>
    %128 = arith.mulf %127, %125 : vector<16x16xf32>
    %129 = arith.addf %109, %128 : vector<16x16xf32>
    %c2_73 = arith.constant 2 : index
    %c5_74 = arith.constant 5 : index
    %130 = vector.load %arg5[%c2_73, %c5_74] : memref<22x22xf32, #tpu.memory_space<vmem>>, vector<16x16xf32>
    %c19 = arith.constant 19 : index
    %131 = memref.load %arg2[%c19] : memref<98xf32, #tpu.memory_space<smem>>
    %132 = vector.broadcast %131 : f32 to vector<16x16xf32>
    %133 = arith.mulf %132, %130 : vector<16x16xf32>
    %134 = arith.addf %114, %133 : vector<16x16xf32>
    %c2_75 = arith.constant 2 : index
    %c6_76 = arith.constant 6 : index
    %135 = vector.load %arg5[%c2_75, %c6_76] : memref<22x22xf32, #tpu.memory_space<vmem>>, vector<16x16xf32>
    %c20 = arith.constant 20 : index
    %136 = memref.load %arg2[%c20] : memref<98xf32, #tpu.memory_space<smem>>
    %137 = vector.broadcast %136 : f32 to vector<16x16xf32>
    %138 = arith.mulf %137, %135 : vector<16x16xf32>
    %139 = arith.addf %119, %138 : vector<16x16xf32>
    %c3_77 = arith.constant 3 : index
    %c0_78 = arith.constant 0 : index
    %140 = vector.load %arg5[%c3_77, %c0_78] : memref<22x22xf32, #tpu.memory_space<vmem>>, vector<16x16xf32>
    %c21 = arith.constant 21 : index
    %141 = memref.load %arg2[%c21] : memref<98xf32, #tpu.memory_space<smem>>
    %142 = vector.broadcast %141 : f32 to vector<16x16xf32>
    %143 = arith.mulf %142, %140 : vector<16x16xf32>
    %144 = arith.addf %124, %143 : vector<16x16xf32>
    %c3_79 = arith.constant 3 : index
    %c1_80 = arith.constant 1 : index
    %145 = vector.load %arg5[%c3_79, %c1_80] : memref<22x22xf32, #tpu.memory_space<vmem>>, vector<16x16xf32>
    %c22 = arith.constant 22 : index
    %146 = memref.load %arg2[%c22] : memref<98xf32, #tpu.memory_space<smem>>
    %147 = vector.broadcast %146 : f32 to vector<16x16xf32>
    %148 = arith.mulf %147, %145 : vector<16x16xf32>
    %149 = arith.addf %129, %148 : vector<16x16xf32>
    %c3_81 = arith.constant 3 : index
    %c2_82 = arith.constant 2 : index
    %150 = vector.load %arg5[%c3_81, %c2_82] : memref<22x22xf32, #tpu.memory_space<vmem>>, vector<16x16xf32>
    %c23 = arith.constant 23 : index
    %151 = memref.load %arg2[%c23] : memref<98xf32, #tpu.memory_space<smem>>
    %152 = vector.broadcast %151 : f32 to vector<16x16xf32>
    %153 = arith.mulf %152, %150 : vector<16x16xf32>
    %154 = arith.addf %134, %153 : vector<16x16xf32>
    %c3_83 = arith.constant 3 : index
    %c3_84 = arith.constant 3 : index
    %155 = vector.load %arg5[%c3_83, %c3_84] : memref<22x22xf32, #tpu.memory_space<vmem>>, vector<16x16xf32>
    %c24 = arith.constant 24 : index
    %156 = memref.load %arg2[%c24] : memref<98xf32, #tpu.memory_space<smem>>
    %157 = vector.broadcast %156 : f32 to vector<16x16xf32>
    %158 = arith.mulf %157, %155 : vector<16x16xf32>
    %159 = arith.addf %139, %158 : vector<16x16xf32>
    %c3_85 = arith.constant 3 : index
    %c4_86 = arith.constant 4 : index
    %160 = vector.load %arg5[%c3_85, %c4_86] : memref<22x22xf32, #tpu.memory_space<vmem>>, vector<16x16xf32>
    %c25 = arith.constant 25 : index
    %161 = memref.load %arg2[%c25] : memref<98xf32, #tpu.memory_space<smem>>
    %162 = vector.broadcast %161 : f32 to vector<16x16xf32>
    %163 = arith.mulf %162, %160 : vector<16x16xf32>
    %164 = arith.addf %144, %163 : vector<16x16xf32>
    %c3_87 = arith.constant 3 : index
    %c5_88 = arith.constant 5 : index
    %165 = vector.load %arg5[%c3_87, %c5_88] : memref<22x22xf32, #tpu.memory_space<vmem>>, vector<16x16xf32>
    %c26 = arith.constant 26 : index
    %166 = memref.load %arg2[%c26] : memref<98xf32, #tpu.memory_space<smem>>
    %167 = vector.broadcast %166 : f32 to vector<16x16xf32>
    %168 = arith.mulf %167, %165 : vector<16x16xf32>
    %169 = arith.addf %149, %168 : vector<16x16xf32>
    %c3_89 = arith.constant 3 : index
    %c6_90 = arith.constant 6 : index
    %170 = vector.load %arg5[%c3_89, %c6_90] : memref<22x22xf32, #tpu.memory_space<vmem>>, vector<16x16xf32>
    %c27 = arith.constant 27 : index
    %171 = memref.load %arg2[%c27] : memref<98xf32, #tpu.memory_space<smem>>
    %172 = vector.broadcast %171 : f32 to vector<16x16xf32>
    %173 = arith.mulf %172, %170 : vector<16x16xf32>
    %174 = arith.addf %154, %173 : vector<16x16xf32>
    %c4_91 = arith.constant 4 : index
    %c0_92 = arith.constant 0 : index
    %175 = vector.load %arg5[%c4_91, %c0_92] : memref<22x22xf32, #tpu.memory_space<vmem>>, vector<16x16xf32>
    %c28 = arith.constant 28 : index
    %176 = memref.load %arg2[%c28] : memref<98xf32, #tpu.memory_space<smem>>
    %177 = vector.broadcast %176 : f32 to vector<16x16xf32>
    %178 = arith.mulf %177, %175 : vector<16x16xf32>
    %179 = arith.addf %159, %178 : vector<16x16xf32>
    %c4_93 = arith.constant 4 : index
    %c1_94 = arith.constant 1 : index
    %180 = vector.load %arg5[%c4_93, %c1_94] : memref<22x22xf32, #tpu.memory_space<vmem>>, vector<16x16xf32>
    %c29 = arith.constant 29 : index
    %181 = memref.load %arg2[%c29] : memref<98xf32, #tpu.memory_space<smem>>
    %182 = vector.broadcast %181 : f32 to vector<16x16xf32>
    %183 = arith.mulf %182, %180 : vector<16x16xf32>
    %184 = arith.addf %164, %183 : vector<16x16xf32>
    %c4_95 = arith.constant 4 : index
    %c2_96 = arith.constant 2 : index
    %185 = vector.load %arg5[%c4_95, %c2_96] : memref<22x22xf32, #tpu.memory_space<vmem>>, vector<16x16xf32>
    %c30 = arith.constant 30 : index
    %186 = memref.load %arg2[%c30] : memref<98xf32, #tpu.memory_space<smem>>
    %187 = vector.broadcast %186 : f32 to vector<16x16xf32>
    %188 = arith.mulf %187, %185 : vector<16x16xf32>
    %189 = arith.addf %169, %188 : vector<16x16xf32>
    %c4_97 = arith.constant 4 : index
    %c3_98 = arith.constant 3 : index
    %190 = vector.load %arg5[%c4_97, %c3_98] : memref<22x22xf32, #tpu.memory_space<vmem>>, vector<16x16xf32>
    %c31 = arith.constant 31 : index
    %191 = memref.load %arg2[%c31] : memref<98xf32, #tpu.memory_space<smem>>
    %192 = vector.broadcast %191 : f32 to vector<16x16xf32>
    %193 = arith.mulf %192, %190 : vector<16x16xf32>
    %194 = arith.addf %174, %193 : vector<16x16xf32>
    %c4_99 = arith.constant 4 : index
    %c4_100 = arith.constant 4 : index
    %195 = vector.load %arg5[%c4_99, %c4_100] : memref<22x22xf32, #tpu.memory_space<vmem>>, vector<16x16xf32>
    %c32 = arith.constant 32 : index
    %196 = memref.load %arg2[%c32] : memref<98xf32, #tpu.memory_space<smem>>
    %197 = vector.broadcast %196 : f32 to vector<16x16xf32>
    %198 = arith.mulf %197, %195 : vector<16x16xf32>
    %199 = arith.addf %179, %198 : vector<16x16xf32>
    %c4_101 = arith.constant 4 : index
    %c5_102 = arith.constant 5 : index
    %200 = vector.load %arg5[%c4_101, %c5_102] : memref<22x22xf32, #tpu.memory_space<vmem>>, vector<16x16xf32>
    %c33 = arith.constant 33 : index
    %201 = memref.load %arg2[%c33] : memref<98xf32, #tpu.memory_space<smem>>
    %202 = vector.broadcast %201 : f32 to vector<16x16xf32>
    %203 = arith.mulf %202, %200 : vector<16x16xf32>
    %204 = arith.addf %184, %203 : vector<16x16xf32>
    %c4_103 = arith.constant 4 : index
    %c6_104 = arith.constant 6 : index
    %205 = vector.load %arg5[%c4_103, %c6_104] : memref<22x22xf32, #tpu.memory_space<vmem>>, vector<16x16xf32>
    %c34 = arith.constant 34 : index
    %206 = memref.load %arg2[%c34] : memref<98xf32, #tpu.memory_space<smem>>
    %207 = vector.broadcast %206 : f32 to vector<16x16xf32>
    %208 = arith.mulf %207, %205 : vector<16x16xf32>
    %209 = arith.addf %189, %208 : vector<16x16xf32>
    %c5_105 = arith.constant 5 : index
    %c0_106 = arith.constant 0 : index
    %210 = vector.load %arg5[%c5_105, %c0_106] : memref<22x22xf32, #tpu.memory_space<vmem>>, vector<16x16xf32>
    %c35 = arith.constant 35 : index
    %211 = memref.load %arg2[%c35] : memref<98xf32, #tpu.memory_space<smem>>
    %212 = vector.broadcast %211 : f32 to vector<16x16xf32>
    %213 = arith.mulf %212, %210 : vector<16x16xf32>
    %214 = arith.addf %194, %213 : vector<16x16xf32>
    %c5_107 = arith.constant 5 : index
    %c1_108 = arith.constant 1 : index
    %215 = vector.load %arg5[%c5_107, %c1_108] : memref<22x22xf32, #tpu.memory_space<vmem>>, vector<16x16xf32>
    %c36 = arith.constant 36 : index
    %216 = memref.load %arg2[%c36] : memref<98xf32, #tpu.memory_space<smem>>
    %217 = vector.broadcast %216 : f32 to vector<16x16xf32>
    %218 = arith.mulf %217, %215 : vector<16x16xf32>
    %219 = arith.addf %199, %218 : vector<16x16xf32>
    %c5_109 = arith.constant 5 : index
    %c2_110 = arith.constant 2 : index
    %220 = vector.load %arg5[%c5_109, %c2_110] : memref<22x22xf32, #tpu.memory_space<vmem>>, vector<16x16xf32>
    %c37 = arith.constant 37 : index
    %221 = memref.load %arg2[%c37] : memref<98xf32, #tpu.memory_space<smem>>
    %222 = vector.broadcast %221 : f32 to vector<16x16xf32>
    %223 = arith.mulf %222, %220 : vector<16x16xf32>
    %224 = arith.addf %204, %223 : vector<16x16xf32>
    %c5_111 = arith.constant 5 : index
    %c3_112 = arith.constant 3 : index
    %225 = vector.load %arg5[%c5_111, %c3_112] : memref<22x22xf32, #tpu.memory_space<vmem>>, vector<16x16xf32>
    %c38 = arith.constant 38 : index
    %226 = memref.load %arg2[%c38] : memref<98xf32, #tpu.memory_space<smem>>
    %227 = vector.broadcast %226 : f32 to vector<16x16xf32>
    %228 = arith.mulf %227, %225 : vector<16x16xf32>
    %229 = arith.addf %209, %228 : vector<16x16xf32>
    %c5_113 = arith.constant 5 : index
    %c4_114 = arith.constant 4 : index
    %230 = vector.load %arg5[%c5_113, %c4_114] : memref<22x22xf32, #tpu.memory_space<vmem>>, vector<16x16xf32>
    %c39 = arith.constant 39 : index
    %231 = memref.load %arg2[%c39] : memref<98xf32, #tpu.memory_space<smem>>
    %232 = vector.broadcast %231 : f32 to vector<16x16xf32>
    %233 = arith.mulf %232, %230 : vector<16x16xf32>
    %234 = arith.addf %214, %233 : vector<16x16xf32>
    %c5_115 = arith.constant 5 : index
    %c5_116 = arith.constant 5 : index
    %235 = vector.load %arg5[%c5_115, %c5_116] : memref<22x22xf32, #tpu.memory_space<vmem>>, vector<16x16xf32>
    %c40 = arith.constant 40 : index
    %236 = memref.load %arg2[%c40] : memref<98xf32, #tpu.memory_space<smem>>
    %237 = vector.broadcast %236 : f32 to vector<16x16xf32>
    %238 = arith.mulf %237, %235 : vector<16x16xf32>
    %239 = arith.addf %219, %238 : vector<16x16xf32>
    %c5_117 = arith.constant 5 : index
    %c6_118 = arith.constant 6 : index
    %240 = vector.load %arg5[%c5_117, %c6_118] : memref<22x22xf32, #tpu.memory_space<vmem>>, vector<16x16xf32>
    %c41 = arith.constant 41 : index
    %241 = memref.load %arg2[%c41] : memref<98xf32, #tpu.memory_space<smem>>
    %242 = vector.broadcast %241 : f32 to vector<16x16xf32>
    %243 = arith.mulf %242, %240 : vector<16x16xf32>
    %244 = arith.addf %224, %243 : vector<16x16xf32>
    %c6_119 = arith.constant 6 : index
    %c0_120 = arith.constant 0 : index
    %245 = vector.load %arg5[%c6_119, %c0_120] : memref<22x22xf32, #tpu.memory_space<vmem>>, vector<16x16xf32>
    %c42 = arith.constant 42 : index
    %246 = memref.load %arg2[%c42] : memref<98xf32, #tpu.memory_space<smem>>
    %247 = vector.broadcast %246 : f32 to vector<16x16xf32>
    %248 = arith.mulf %247, %245 : vector<16x16xf32>
    %249 = arith.addf %229, %248 : vector<16x16xf32>
    %c6_121 = arith.constant 6 : index
    %c1_122 = arith.constant 1 : index
    %250 = vector.load %arg5[%c6_121, %c1_122] : memref<22x22xf32, #tpu.memory_space<vmem>>, vector<16x16xf32>
    %c43 = arith.constant 43 : index
    %251 = memref.load %arg2[%c43] : memref<98xf32, #tpu.memory_space<smem>>
    %252 = vector.broadcast %251 : f32 to vector<16x16xf32>
    %253 = arith.mulf %252, %250 : vector<16x16xf32>
    %254 = arith.addf %234, %253 : vector<16x16xf32>
    %c6_123 = arith.constant 6 : index
    %c2_124 = arith.constant 2 : index
    %255 = vector.load %arg5[%c6_123, %c2_124] : memref<22x22xf32, #tpu.memory_space<vmem>>, vector<16x16xf32>
    %c44 = arith.constant 44 : index
    %256 = memref.load %arg2[%c44] : memref<98xf32, #tpu.memory_space<smem>>
    %257 = vector.broadcast %256 : f32 to vector<16x16xf32>
    %258 = arith.mulf %257, %255 : vector<16x16xf32>
    %259 = arith.addf %239, %258 : vector<16x16xf32>
    %c6_125 = arith.constant 6 : index
    %c3_126 = arith.constant 3 : index
    %260 = vector.load %arg5[%c6_125, %c3_126] : memref<22x22xf32, #tpu.memory_space<vmem>>, vector<16x16xf32>
    %c45 = arith.constant 45 : index
    %261 = memref.load %arg2[%c45] : memref<98xf32, #tpu.memory_space<smem>>
    %262 = vector.broadcast %261 : f32 to vector<16x16xf32>
    %263 = arith.mulf %262, %260 : vector<16x16xf32>
    %264 = arith.addf %244, %263 : vector<16x16xf32>
    %c6_127 = arith.constant 6 : index
    %c4_128 = arith.constant 4 : index
    %265 = vector.load %arg5[%c6_127, %c4_128] : memref<22x22xf32, #tpu.memory_space<vmem>>, vector<16x16xf32>
    %c46 = arith.constant 46 : index
    %266 = memref.load %arg2[%c46] : memref<98xf32, #tpu.memory_space<smem>>
    %267 = vector.broadcast %266 : f32 to vector<16x16xf32>
    %268 = arith.mulf %267, %265 : vector<16x16xf32>
    %269 = arith.addf %249, %268 : vector<16x16xf32>
    %c6_129 = arith.constant 6 : index
    %c5_130 = arith.constant 5 : index
    %270 = vector.load %arg5[%c6_129, %c5_130] : memref<22x22xf32, #tpu.memory_space<vmem>>, vector<16x16xf32>
    %c47 = arith.constant 47 : index
    %271 = memref.load %arg2[%c47] : memref<98xf32, #tpu.memory_space<smem>>
    %272 = vector.broadcast %271 : f32 to vector<16x16xf32>
    %273 = arith.mulf %272, %270 : vector<16x16xf32>
    %274 = arith.addf %254, %273 : vector<16x16xf32>
    %c6_131 = arith.constant 6 : index
    %c6_132 = arith.constant 6 : index
    %275 = vector.load %arg5[%c6_131, %c6_132] : memref<22x22xf32, #tpu.memory_space<vmem>>, vector<16x16xf32>
    %c48 = arith.constant 48 : index
    %276 = memref.load %arg2[%c48] : memref<98xf32, #tpu.memory_space<smem>>
    %277 = vector.broadcast %276 : f32 to vector<16x16xf32>
    %278 = arith.mulf %277, %275 : vector<16x16xf32>
    %279 = arith.addf %259, %278 : vector<16x16xf32>
    %c0_133 = arith.constant 0 : index
    %c0_134 = arith.constant 0 : index
    %280 = vector.load %arg6[%c0_133, %c0_134] : memref<22x22xf32, #tpu.memory_space<vmem>>, vector<16x16xf32>
    %c49 = arith.constant 49 : index
    %281 = memref.load %arg2[%c49] : memref<98xf32, #tpu.memory_space<smem>>
    %282 = vector.broadcast %281 : f32 to vector<16x16xf32>
    %283 = arith.mulf %282, %280 : vector<16x16xf32>
    %284 = arith.addf %264, %283 : vector<16x16xf32>
    %c0_135 = arith.constant 0 : index
    %c1_136 = arith.constant 1 : index
    %285 = vector.load %arg6[%c0_135, %c1_136] : memref<22x22xf32, #tpu.memory_space<vmem>>, vector<16x16xf32>
    %c50 = arith.constant 50 : index
    %286 = memref.load %arg2[%c50] : memref<98xf32, #tpu.memory_space<smem>>
    %287 = vector.broadcast %286 : f32 to vector<16x16xf32>
    %288 = arith.mulf %287, %285 : vector<16x16xf32>
    %289 = arith.addf %269, %288 : vector<16x16xf32>
    %c0_137 = arith.constant 0 : index
    %c2_138 = arith.constant 2 : index
    %290 = vector.load %arg6[%c0_137, %c2_138] : memref<22x22xf32, #tpu.memory_space<vmem>>, vector<16x16xf32>
    %c51 = arith.constant 51 : index
    %291 = memref.load %arg2[%c51] : memref<98xf32, #tpu.memory_space<smem>>
    %292 = vector.broadcast %291 : f32 to vector<16x16xf32>
    %293 = arith.mulf %292, %290 : vector<16x16xf32>
    %294 = arith.addf %274, %293 : vector<16x16xf32>
    %c0_139 = arith.constant 0 : index
    %c3_140 = arith.constant 3 : index
    %295 = vector.load %arg6[%c0_139, %c3_140] : memref<22x22xf32, #tpu.memory_space<vmem>>, vector<16x16xf32>
    %c52 = arith.constant 52 : index
    %296 = memref.load %arg2[%c52] : memref<98xf32, #tpu.memory_space<smem>>
    %297 = vector.broadcast %296 : f32 to vector<16x16xf32>
    %298 = arith.mulf %297, %295 : vector<16x16xf32>
    %299 = arith.addf %279, %298 : vector<16x16xf32>
    %c0_141 = arith.constant 0 : index
    %c4_142 = arith.constant 4 : index
    %300 = vector.load %arg6[%c0_141, %c4_142] : memref<22x22xf32, #tpu.memory_space<vmem>>, vector<16x16xf32>
    %c53 = arith.constant 53 : index
    %301 = memref.load %arg2[%c53] : memref<98xf32, #tpu.memory_space<smem>>
    %302 = vector.broadcast %301 : f32 to vector<16x16xf32>
    %303 = arith.mulf %302, %300 : vector<16x16xf32>
    %304 = arith.addf %284, %303 : vector<16x16xf32>
    %c0_143 = arith.constant 0 : index
    %c5_144 = arith.constant 5 : index
    %305 = vector.load %arg6[%c0_143, %c5_144] : memref<22x22xf32, #tpu.memory_space<vmem>>, vector<16x16xf32>
    %c54 = arith.constant 54 : index
    %306 = memref.load %arg2[%c54] : memref<98xf32, #tpu.memory_space<smem>>
    %307 = vector.broadcast %306 : f32 to vector<16x16xf32>
    %308 = arith.mulf %307, %305 : vector<16x16xf32>
    %309 = arith.addf %289, %308 : vector<16x16xf32>
    %c0_145 = arith.constant 0 : index
    %c6_146 = arith.constant 6 : index
    %310 = vector.load %arg6[%c0_145, %c6_146] : memref<22x22xf32, #tpu.memory_space<vmem>>, vector<16x16xf32>
    %c55 = arith.constant 55 : index
    %311 = memref.load %arg2[%c55] : memref<98xf32, #tpu.memory_space<smem>>
    %312 = vector.broadcast %311 : f32 to vector<16x16xf32>
    %313 = arith.mulf %312, %310 : vector<16x16xf32>
    %314 = arith.addf %294, %313 : vector<16x16xf32>
    %c1_147 = arith.constant 1 : index
    %c0_148 = arith.constant 0 : index
    %315 = vector.load %arg6[%c1_147, %c0_148] : memref<22x22xf32, #tpu.memory_space<vmem>>, vector<16x16xf32>
    %c56 = arith.constant 56 : index
    %316 = memref.load %arg2[%c56] : memref<98xf32, #tpu.memory_space<smem>>
    %317 = vector.broadcast %316 : f32 to vector<16x16xf32>
    %318 = arith.mulf %317, %315 : vector<16x16xf32>
    %319 = arith.addf %299, %318 : vector<16x16xf32>
    %c1_149 = arith.constant 1 : index
    %c1_150 = arith.constant 1 : index
    %320 = vector.load %arg6[%c1_149, %c1_150] : memref<22x22xf32, #tpu.memory_space<vmem>>, vector<16x16xf32>
    %c57 = arith.constant 57 : index
    %321 = memref.load %arg2[%c57] : memref<98xf32, #tpu.memory_space<smem>>
    %322 = vector.broadcast %321 : f32 to vector<16x16xf32>
    %323 = arith.mulf %322, %320 : vector<16x16xf32>
    %324 = arith.addf %304, %323 : vector<16x16xf32>
    %c1_151 = arith.constant 1 : index
    %c2_152 = arith.constant 2 : index
    %325 = vector.load %arg6[%c1_151, %c2_152] : memref<22x22xf32, #tpu.memory_space<vmem>>, vector<16x16xf32>
    %c58 = arith.constant 58 : index
    %326 = memref.load %arg2[%c58] : memref<98xf32, #tpu.memory_space<smem>>
    %327 = vector.broadcast %326 : f32 to vector<16x16xf32>
    %328 = arith.mulf %327, %325 : vector<16x16xf32>
    %329 = arith.addf %309, %328 : vector<16x16xf32>
    %c1_153 = arith.constant 1 : index
    %c3_154 = arith.constant 3 : index
    %330 = vector.load %arg6[%c1_153, %c3_154] : memref<22x22xf32, #tpu.memory_space<vmem>>, vector<16x16xf32>
    %c59 = arith.constant 59 : index
    %331 = memref.load %arg2[%c59] : memref<98xf32, #tpu.memory_space<smem>>
    %332 = vector.broadcast %331 : f32 to vector<16x16xf32>
    %333 = arith.mulf %332, %330 : vector<16x16xf32>
    %334 = arith.addf %314, %333 : vector<16x16xf32>
    %c1_155 = arith.constant 1 : index
    %c4_156 = arith.constant 4 : index
    %335 = vector.load %arg6[%c1_155, %c4_156] : memref<22x22xf32, #tpu.memory_space<vmem>>, vector<16x16xf32>
    %c60 = arith.constant 60 : index
    %336 = memref.load %arg2[%c60] : memref<98xf32, #tpu.memory_space<smem>>
    %337 = vector.broadcast %336 : f32 to vector<16x16xf32>
    %338 = arith.mulf %337, %335 : vector<16x16xf32>
    %339 = arith.addf %319, %338 : vector<16x16xf32>
    %c1_157 = arith.constant 1 : index
    %c5_158 = arith.constant 5 : index
    %340 = vector.load %arg6[%c1_157, %c5_158] : memref<22x22xf32, #tpu.memory_space<vmem>>, vector<16x16xf32>
    %c61 = arith.constant 61 : index
    %341 = memref.load %arg2[%c61] : memref<98xf32, #tpu.memory_space<smem>>
    %342 = vector.broadcast %341 : f32 to vector<16x16xf32>
    %343 = arith.mulf %342, %340 : vector<16x16xf32>
    %344 = arith.addf %324, %343 : vector<16x16xf32>
    %c1_159 = arith.constant 1 : index
    %c6_160 = arith.constant 6 : index
    %345 = vector.load %arg6[%c1_159, %c6_160] : memref<22x22xf32, #tpu.memory_space<vmem>>, vector<16x16xf32>
    %c62 = arith.constant 62 : index
    %346 = memref.load %arg2[%c62] : memref<98xf32, #tpu.memory_space<smem>>
    %347 = vector.broadcast %346 : f32 to vector<16x16xf32>
    %348 = arith.mulf %347, %345 : vector<16x16xf32>
    %349 = arith.addf %329, %348 : vector<16x16xf32>
    %c2_161 = arith.constant 2 : index
    %c0_162 = arith.constant 0 : index
    %350 = vector.load %arg6[%c2_161, %c0_162] : memref<22x22xf32, #tpu.memory_space<vmem>>, vector<16x16xf32>
    %c63 = arith.constant 63 : index
    %351 = memref.load %arg2[%c63] : memref<98xf32, #tpu.memory_space<smem>>
    %352 = vector.broadcast %351 : f32 to vector<16x16xf32>
    %353 = arith.mulf %352, %350 : vector<16x16xf32>
    %354 = arith.addf %334, %353 : vector<16x16xf32>
    %c2_163 = arith.constant 2 : index
    %c1_164 = arith.constant 1 : index
    %355 = vector.load %arg6[%c2_163, %c1_164] : memref<22x22xf32, #tpu.memory_space<vmem>>, vector<16x16xf32>
    %c64 = arith.constant 64 : index
    %356 = memref.load %arg2[%c64] : memref<98xf32, #tpu.memory_space<smem>>
    %357 = vector.broadcast %356 : f32 to vector<16x16xf32>
    %358 = arith.mulf %357, %355 : vector<16x16xf32>
    %359 = arith.addf %339, %358 : vector<16x16xf32>
    %c2_165 = arith.constant 2 : index
    %c2_166 = arith.constant 2 : index
    %360 = vector.load %arg6[%c2_165, %c2_166] : memref<22x22xf32, #tpu.memory_space<vmem>>, vector<16x16xf32>
    %c65 = arith.constant 65 : index
    %361 = memref.load %arg2[%c65] : memref<98xf32, #tpu.memory_space<smem>>
    %362 = vector.broadcast %361 : f32 to vector<16x16xf32>
    %363 = arith.mulf %362, %360 : vector<16x16xf32>
    %364 = arith.addf %344, %363 : vector<16x16xf32>
    %c2_167 = arith.constant 2 : index
    %c3_168 = arith.constant 3 : index
    %365 = vector.load %arg6[%c2_167, %c3_168] : memref<22x22xf32, #tpu.memory_space<vmem>>, vector<16x16xf32>
    %c66 = arith.constant 66 : index
    %366 = memref.load %arg2[%c66] : memref<98xf32, #tpu.memory_space<smem>>
    %367 = vector.broadcast %366 : f32 to vector<16x16xf32>
    %368 = arith.mulf %367, %365 : vector<16x16xf32>
    %369 = arith.addf %349, %368 : vector<16x16xf32>
    %c2_169 = arith.constant 2 : index
    %c4_170 = arith.constant 4 : index
    %370 = vector.load %arg6[%c2_169, %c4_170] : memref<22x22xf32, #tpu.memory_space<vmem>>, vector<16x16xf32>
    %c67 = arith.constant 67 : index
    %371 = memref.load %arg2[%c67] : memref<98xf32, #tpu.memory_space<smem>>
    %372 = vector.broadcast %371 : f32 to vector<16x16xf32>
    %373 = arith.mulf %372, %370 : vector<16x16xf32>
    %374 = arith.addf %354, %373 : vector<16x16xf32>
    %c2_171 = arith.constant 2 : index
    %c5_172 = arith.constant 5 : index
    %375 = vector.load %arg6[%c2_171, %c5_172] : memref<22x22xf32, #tpu.memory_space<vmem>>, vector<16x16xf32>
    %c68 = arith.constant 68 : index
    %376 = memref.load %arg2[%c68] : memref<98xf32, #tpu.memory_space<smem>>
    %377 = vector.broadcast %376 : f32 to vector<16x16xf32>
    %378 = arith.mulf %377, %375 : vector<16x16xf32>
    %379 = arith.addf %359, %378 : vector<16x16xf32>
    %c2_173 = arith.constant 2 : index
    %c6_174 = arith.constant 6 : index
    %380 = vector.load %arg6[%c2_173, %c6_174] : memref<22x22xf32, #tpu.memory_space<vmem>>, vector<16x16xf32>
    %c69 = arith.constant 69 : index
    %381 = memref.load %arg2[%c69] : memref<98xf32, #tpu.memory_space<smem>>
    %382 = vector.broadcast %381 : f32 to vector<16x16xf32>
    %383 = arith.mulf %382, %380 : vector<16x16xf32>
    %384 = arith.addf %364, %383 : vector<16x16xf32>
    %c3_175 = arith.constant 3 : index
    %c0_176 = arith.constant 0 : index
    %385 = vector.load %arg6[%c3_175, %c0_176] : memref<22x22xf32, #tpu.memory_space<vmem>>, vector<16x16xf32>
    %c70 = arith.constant 70 : index
    %386 = memref.load %arg2[%c70] : memref<98xf32, #tpu.memory_space<smem>>
    %387 = vector.broadcast %386 : f32 to vector<16x16xf32>
    %388 = arith.mulf %387, %385 : vector<16x16xf32>
    %389 = arith.addf %369, %388 : vector<16x16xf32>
    %c3_177 = arith.constant 3 : index
    %c1_178 = arith.constant 1 : index
    %390 = vector.load %arg6[%c3_177, %c1_178] : memref<22x22xf32, #tpu.memory_space<vmem>>, vector<16x16xf32>
    %c71 = arith.constant 71 : index
    %391 = memref.load %arg2[%c71] : memref<98xf32, #tpu.memory_space<smem>>
    %392 = vector.broadcast %391 : f32 to vector<16x16xf32>
    %393 = arith.mulf %392, %390 : vector<16x16xf32>
    %394 = arith.addf %374, %393 : vector<16x16xf32>
    %c3_179 = arith.constant 3 : index
    %c2_180 = arith.constant 2 : index
    %395 = vector.load %arg6[%c3_179, %c2_180] : memref<22x22xf32, #tpu.memory_space<vmem>>, vector<16x16xf32>
    %c72 = arith.constant 72 : index
    %396 = memref.load %arg2[%c72] : memref<98xf32, #tpu.memory_space<smem>>
    %397 = vector.broadcast %396 : f32 to vector<16x16xf32>
    %398 = arith.mulf %397, %395 : vector<16x16xf32>
    %399 = arith.addf %379, %398 : vector<16x16xf32>
    %c3_181 = arith.constant 3 : index
    %c3_182 = arith.constant 3 : index
    %400 = vector.load %arg6[%c3_181, %c3_182] : memref<22x22xf32, #tpu.memory_space<vmem>>, vector<16x16xf32>
    %c73 = arith.constant 73 : index
    %401 = memref.load %arg2[%c73] : memref<98xf32, #tpu.memory_space<smem>>
    %402 = vector.broadcast %401 : f32 to vector<16x16xf32>
    %403 = arith.mulf %402, %400 : vector<16x16xf32>
    %404 = arith.addf %384, %403 : vector<16x16xf32>
    %c3_183 = arith.constant 3 : index
    %c4_184 = arith.constant 4 : index
    %405 = vector.load %arg6[%c3_183, %c4_184] : memref<22x22xf32, #tpu.memory_space<vmem>>, vector<16x16xf32>
    %c74 = arith.constant 74 : index
    %406 = memref.load %arg2[%c74] : memref<98xf32, #tpu.memory_space<smem>>
    %407 = vector.broadcast %406 : f32 to vector<16x16xf32>
    %408 = arith.mulf %407, %405 : vector<16x16xf32>
    %409 = arith.addf %389, %408 : vector<16x16xf32>
    %c3_185 = arith.constant 3 : index
    %c5_186 = arith.constant 5 : index
    %410 = vector.load %arg6[%c3_185, %c5_186] : memref<22x22xf32, #tpu.memory_space<vmem>>, vector<16x16xf32>
    %c75 = arith.constant 75 : index
    %411 = memref.load %arg2[%c75] : memref<98xf32, #tpu.memory_space<smem>>
    %412 = vector.broadcast %411 : f32 to vector<16x16xf32>
    %413 = arith.mulf %412, %410 : vector<16x16xf32>
    %414 = arith.addf %394, %413 : vector<16x16xf32>
    %c3_187 = arith.constant 3 : index
    %c6_188 = arith.constant 6 : index
    %415 = vector.load %arg6[%c3_187, %c6_188] : memref<22x22xf32, #tpu.memory_space<vmem>>, vector<16x16xf32>
    %c76 = arith.constant 76 : index
    %416 = memref.load %arg2[%c76] : memref<98xf32, #tpu.memory_space<smem>>
    %417 = vector.broadcast %416 : f32 to vector<16x16xf32>
    %418 = arith.mulf %417, %415 : vector<16x16xf32>
    %419 = arith.addf %399, %418 : vector<16x16xf32>
    %c4_189 = arith.constant 4 : index
    %c0_190 = arith.constant 0 : index
    %420 = vector.load %arg6[%c4_189, %c0_190] : memref<22x22xf32, #tpu.memory_space<vmem>>, vector<16x16xf32>
    %c77 = arith.constant 77 : index
    %421 = memref.load %arg2[%c77] : memref<98xf32, #tpu.memory_space<smem>>
    %422 = vector.broadcast %421 : f32 to vector<16x16xf32>
    %423 = arith.mulf %422, %420 : vector<16x16xf32>
    %424 = arith.addf %404, %423 : vector<16x16xf32>
    %c4_191 = arith.constant 4 : index
    %c1_192 = arith.constant 1 : index
    %425 = vector.load %arg6[%c4_191, %c1_192] : memref<22x22xf32, #tpu.memory_space<vmem>>, vector<16x16xf32>
    %c78 = arith.constant 78 : index
    %426 = memref.load %arg2[%c78] : memref<98xf32, #tpu.memory_space<smem>>
    %427 = vector.broadcast %426 : f32 to vector<16x16xf32>
    %428 = arith.mulf %427, %425 : vector<16x16xf32>
    %429 = arith.addf %409, %428 : vector<16x16xf32>
    %c4_193 = arith.constant 4 : index
    %c2_194 = arith.constant 2 : index
    %430 = vector.load %arg6[%c4_193, %c2_194] : memref<22x22xf32, #tpu.memory_space<vmem>>, vector<16x16xf32>
    %c79 = arith.constant 79 : index
    %431 = memref.load %arg2[%c79] : memref<98xf32, #tpu.memory_space<smem>>
    %432 = vector.broadcast %431 : f32 to vector<16x16xf32>
    %433 = arith.mulf %432, %430 : vector<16x16xf32>
    %434 = arith.addf %414, %433 : vector<16x16xf32>
    %c4_195 = arith.constant 4 : index
    %c3_196 = arith.constant 3 : index
    %435 = vector.load %arg6[%c4_195, %c3_196] : memref<22x22xf32, #tpu.memory_space<vmem>>, vector<16x16xf32>
    %c80 = arith.constant 80 : index
    %436 = memref.load %arg2[%c80] : memref<98xf32, #tpu.memory_space<smem>>
    %437 = vector.broadcast %436 : f32 to vector<16x16xf32>
    %438 = arith.mulf %437, %435 : vector<16x16xf32>
    %439 = arith.addf %419, %438 : vector<16x16xf32>
    %c4_197 = arith.constant 4 : index
    %c4_198 = arith.constant 4 : index
    %440 = vector.load %arg6[%c4_197, %c4_198] : memref<22x22xf32, #tpu.memory_space<vmem>>, vector<16x16xf32>
    %c81 = arith.constant 81 : index
    %441 = memref.load %arg2[%c81] : memref<98xf32, #tpu.memory_space<smem>>
    %442 = vector.broadcast %441 : f32 to vector<16x16xf32>
    %443 = arith.mulf %442, %440 : vector<16x16xf32>
    %444 = arith.addf %424, %443 : vector<16x16xf32>
    %c4_199 = arith.constant 4 : index
    %c5_200 = arith.constant 5 : index
    %445 = vector.load %arg6[%c4_199, %c5_200] : memref<22x22xf32, #tpu.memory_space<vmem>>, vector<16x16xf32>
    %c82 = arith.constant 82 : index
    %446 = memref.load %arg2[%c82] : memref<98xf32, #tpu.memory_space<smem>>
    %447 = vector.broadcast %446 : f32 to vector<16x16xf32>
    %448 = arith.mulf %447, %445 : vector<16x16xf32>
    %449 = arith.addf %429, %448 : vector<16x16xf32>
    %c4_201 = arith.constant 4 : index
    %c6_202 = arith.constant 6 : index
    %450 = vector.load %arg6[%c4_201, %c6_202] : memref<22x22xf32, #tpu.memory_space<vmem>>, vector<16x16xf32>
    %c83 = arith.constant 83 : index
    %451 = memref.load %arg2[%c83] : memref<98xf32, #tpu.memory_space<smem>>
    %452 = vector.broadcast %451 : f32 to vector<16x16xf32>
    %453 = arith.mulf %452, %450 : vector<16x16xf32>
    %454 = arith.addf %434, %453 : vector<16x16xf32>
    %c5_203 = arith.constant 5 : index
    %c0_204 = arith.constant 0 : index
    %455 = vector.load %arg6[%c5_203, %c0_204] : memref<22x22xf32, #tpu.memory_space<vmem>>, vector<16x16xf32>
    %c84 = arith.constant 84 : index
    %456 = memref.load %arg2[%c84] : memref<98xf32, #tpu.memory_space<smem>>
    %457 = vector.broadcast %456 : f32 to vector<16x16xf32>
    %458 = arith.mulf %457, %455 : vector<16x16xf32>
    %459 = arith.addf %439, %458 : vector<16x16xf32>
    %c5_205 = arith.constant 5 : index
    %c1_206 = arith.constant 1 : index
    %460 = vector.load %arg6[%c5_205, %c1_206] : memref<22x22xf32, #tpu.memory_space<vmem>>, vector<16x16xf32>
    %c85 = arith.constant 85 : index
    %461 = memref.load %arg2[%c85] : memref<98xf32, #tpu.memory_space<smem>>
    %462 = vector.broadcast %461 : f32 to vector<16x16xf32>
    %463 = arith.mulf %462, %460 : vector<16x16xf32>
    %464 = arith.addf %444, %463 : vector<16x16xf32>
    %c5_207 = arith.constant 5 : index
    %c2_208 = arith.constant 2 : index
    %465 = vector.load %arg6[%c5_207, %c2_208] : memref<22x22xf32, #tpu.memory_space<vmem>>, vector<16x16xf32>
    %c86 = arith.constant 86 : index
    %466 = memref.load %arg2[%c86] : memref<98xf32, #tpu.memory_space<smem>>
    %467 = vector.broadcast %466 : f32 to vector<16x16xf32>
    %468 = arith.mulf %467, %465 : vector<16x16xf32>
    %469 = arith.addf %449, %468 : vector<16x16xf32>
    %c5_209 = arith.constant 5 : index
    %c3_210 = arith.constant 3 : index
    %470 = vector.load %arg6[%c5_209, %c3_210] : memref<22x22xf32, #tpu.memory_space<vmem>>, vector<16x16xf32>
    %c87 = arith.constant 87 : index
    %471 = memref.load %arg2[%c87] : memref<98xf32, #tpu.memory_space<smem>>
    %472 = vector.broadcast %471 : f32 to vector<16x16xf32>
    %473 = arith.mulf %472, %470 : vector<16x16xf32>
    %474 = arith.addf %454, %473 : vector<16x16xf32>
    %c5_211 = arith.constant 5 : index
    %c4_212 = arith.constant 4 : index
    %475 = vector.load %arg6[%c5_211, %c4_212] : memref<22x22xf32, #tpu.memory_space<vmem>>, vector<16x16xf32>
    %c88 = arith.constant 88 : index
    %476 = memref.load %arg2[%c88] : memref<98xf32, #tpu.memory_space<smem>>
    %477 = vector.broadcast %476 : f32 to vector<16x16xf32>
    %478 = arith.mulf %477, %475 : vector<16x16xf32>
    %479 = arith.addf %459, %478 : vector<16x16xf32>
    %c5_213 = arith.constant 5 : index
    %c5_214 = arith.constant 5 : index
    %480 = vector.load %arg6[%c5_213, %c5_214] : memref<22x22xf32, #tpu.memory_space<vmem>>, vector<16x16xf32>
    %c89 = arith.constant 89 : index
    %481 = memref.load %arg2[%c89] : memref<98xf32, #tpu.memory_space<smem>>
    %482 = vector.broadcast %481 : f32 to vector<16x16xf32>
    %483 = arith.mulf %482, %480 : vector<16x16xf32>
    %484 = arith.addf %464, %483 : vector<16x16xf32>
    %c5_215 = arith.constant 5 : index
    %c6_216 = arith.constant 6 : index
    %485 = vector.load %arg6[%c5_215, %c6_216] : memref<22x22xf32, #tpu.memory_space<vmem>>, vector<16x16xf32>
    %c90 = arith.constant 90 : index
    %486 = memref.load %arg2[%c90] : memref<98xf32, #tpu.memory_space<smem>>
    %487 = vector.broadcast %486 : f32 to vector<16x16xf32>
    %488 = arith.mulf %487, %485 : vector<16x16xf32>
    %489 = arith.addf %469, %488 : vector<16x16xf32>
    %c6_217 = arith.constant 6 : index
    %c0_218 = arith.constant 0 : index
    %490 = vector.load %arg6[%c6_217, %c0_218] : memref<22x22xf32, #tpu.memory_space<vmem>>, vector<16x16xf32>
    %c91 = arith.constant 91 : index
    %491 = memref.load %arg2[%c91] : memref<98xf32, #tpu.memory_space<smem>>
    %492 = vector.broadcast %491 : f32 to vector<16x16xf32>
    %493 = arith.mulf %492, %490 : vector<16x16xf32>
    %494 = arith.addf %474, %493 : vector<16x16xf32>
    %c6_219 = arith.constant 6 : index
    %c1_220 = arith.constant 1 : index
    %495 = vector.load %arg6[%c6_219, %c1_220] : memref<22x22xf32, #tpu.memory_space<vmem>>, vector<16x16xf32>
    %c92 = arith.constant 92 : index
    %496 = memref.load %arg2[%c92] : memref<98xf32, #tpu.memory_space<smem>>
    %497 = vector.broadcast %496 : f32 to vector<16x16xf32>
    %498 = arith.mulf %497, %495 : vector<16x16xf32>
    %499 = arith.addf %479, %498 : vector<16x16xf32>
    %c6_221 = arith.constant 6 : index
    %c2_222 = arith.constant 2 : index
    %500 = vector.load %arg6[%c6_221, %c2_222] : memref<22x22xf32, #tpu.memory_space<vmem>>, vector<16x16xf32>
    %c93 = arith.constant 93 : index
    %501 = memref.load %arg2[%c93] : memref<98xf32, #tpu.memory_space<smem>>
    %502 = vector.broadcast %501 : f32 to vector<16x16xf32>
    %503 = arith.mulf %502, %500 : vector<16x16xf32>
    %504 = arith.addf %484, %503 : vector<16x16xf32>
    %c6_223 = arith.constant 6 : index
    %c3_224 = arith.constant 3 : index
    %505 = vector.load %arg6[%c6_223, %c3_224] : memref<22x22xf32, #tpu.memory_space<vmem>>, vector<16x16xf32>
    %c94 = arith.constant 94 : index
    %506 = memref.load %arg2[%c94] : memref<98xf32, #tpu.memory_space<smem>>
    %507 = vector.broadcast %506 : f32 to vector<16x16xf32>
    %508 = arith.mulf %507, %505 : vector<16x16xf32>
    %509 = arith.addf %489, %508 : vector<16x16xf32>
    %c6_225 = arith.constant 6 : index
    %c4_226 = arith.constant 4 : index
    %510 = vector.load %arg6[%c6_225, %c4_226] : memref<22x22xf32, #tpu.memory_space<vmem>>, vector<16x16xf32>
    %c95 = arith.constant 95 : index
    %511 = memref.load %arg2[%c95] : memref<98xf32, #tpu.memory_space<smem>>
    %512 = vector.broadcast %511 : f32 to vector<16x16xf32>
    %513 = arith.mulf %512, %510 : vector<16x16xf32>
    %514 = arith.addf %494, %513 : vector<16x16xf32>
    %c6_227 = arith.constant 6 : index
    %c5_228 = arith.constant 5 : index
    %515 = vector.load %arg6[%c6_227, %c5_228] : memref<22x22xf32, #tpu.memory_space<vmem>>, vector<16x16xf32>
    %c96 = arith.constant 96 : index
    %516 = memref.load %arg2[%c96] : memref<98xf32, #tpu.memory_space<smem>>
    %517 = vector.broadcast %516 : f32 to vector<16x16xf32>
    %518 = arith.mulf %517, %515 : vector<16x16xf32>
    %519 = arith.addf %499, %518 : vector<16x16xf32>
    %c6_229 = arith.constant 6 : index
    %c6_230 = arith.constant 6 : index
    %520 = vector.load %arg6[%c6_229, %c6_230] : memref<22x22xf32, #tpu.memory_space<vmem>>, vector<16x16xf32>
    %c97 = arith.constant 97 : index
    %521 = memref.load %arg2[%c97] : memref<98xf32, #tpu.memory_space<smem>>
    %522 = vector.broadcast %521 : f32 to vector<16x16xf32>
    %523 = arith.mulf %522, %520 : vector<16x16xf32>
    %524 = arith.addf %504, %523 : vector<16x16xf32>
    %525 = arith.addf %519, %524 : vector<16x16xf32>
    %526 = arith.addf %509, %514 : vector<16x16xf32>
    %527 = arith.addf %525, %526 : vector<16x16xf32>
    %528 = vector.broadcast %10 : f32 to vector<16x16xf32>
    %529 = arith.mulf %527, %528 : vector<16x16xf32>
    %530 = vector.broadcast %12 : f32 to vector<16x16xf32>
    %531 = arith.addf %529, %530 : vector<16x16xf32>
    %c0_231 = arith.constant 0 : index
    %c0_232 = arith.constant 0 : index
    %c0_233 = arith.constant 0 : index
    %c0_234 = arith.constant 0 : index
    %532 = vector.load %arg4[%c0_231, %c0_232, %c0_233, %c0_234] : memref<2x1x16x16xf32, #tpu.memory_space<vmem>>, vector<1x1x16x16xf32>
    %533 = vector.shape_cast %532 : vector<1x1x16x16xf32> to vector<16x16xf32>
    %534 = vector.shape_cast %531 : vector<16x16xf32> to vector<1x1x16x16xf32>
    tpu.vector_store %arg4[%c0_231, %c0_232, %c0_233, %c0_234], %534 {strides = array<i32>} : memref<2x1x16x16xf32, #tpu.memory_space<vmem>>, vector<1x1x16x16xf32>,
    %c1_235 = arith.constant 1 : index
    %c0_236 = arith.constant 0 : index
    %c0_237 = arith.constant 0 : index
    %c0_238 = arith.constant 0 : index
    %535 = vector.load %arg1[%c1_235, %c0_236, %c0_237, %c0_238] : memref<2x4x16x16xf32, #tpu.memory_space<vmem>>, vector<1x1x16x16xf32>
    %536 = vector.shape_cast %535 : vector<1x1x16x16xf32> to vector<16x16xf32>
    %c1_239 = arith.constant 1 : index
    %c1_240 = arith.constant 1 : index
    %c0_241 = arith.constant 0 : index
    %c0_242 = arith.constant 0 : index
    %537 = vector.load %arg1[%c1_239, %c1_240, %c0_241, %c0_242] : memref<2x4x16x16xf32, #tpu.memory_space<vmem>>, vector<1x1x16x16xf32>
    %538 = vector.shape_cast %537 : vector<1x1x16x16xf32> to vector<16x16xf32>
    %539 = arith.maximumf %536, %538 : vector<16x16xf32>
    %540 = arith.addf %536, %538 : vector<16x16xf32>
    %c1_243 = arith.constant 1 : index
    %c2_244 = arith.constant 2 : index
    %c0_245 = arith.constant 0 : index
    %c0_246 = arith.constant 0 : index
    %541 = vector.load %arg1[%c1_243, %c2_244, %c0_245, %c0_246] : memref<2x4x16x16xf32, #tpu.memory_space<vmem>>, vector<1x1x16x16xf32>
    %542 = vector.shape_cast %541 : vector<1x1x16x16xf32> to vector<16x16xf32>
    %543 = arith.maximumf %539, %542 : vector<16x16xf32>
    %544 = arith.addf %540, %542 : vector<16x16xf32>
    %c1_247 = arith.constant 1 : index
    %c3_248 = arith.constant 3 : index
    %c0_249 = arith.constant 0 : index
    %c0_250 = arith.constant 0 : index
    %545 = vector.load %arg1[%c1_247, %c3_248, %c0_249, %c0_250] : memref<2x4x16x16xf32, #tpu.memory_space<vmem>>, vector<1x1x16x16xf32>
    %546 = vector.shape_cast %545 : vector<1x1x16x16xf32> to vector<16x16xf32>
    %547 = arith.maximumf %543, %546 : vector<16x16xf32>
    %548 = arith.addf %544, %546 : vector<16x16xf32>
    %c3_251 = arith.constant 3 : index
    %c3_252 = arith.constant 3 : index
    %549 = vector.load %arg5[%c3_251, %c3_252] : memref<22x22xf32, #tpu.memory_space<vmem>>, vector<16x16xf32>
    tpu.vector_store %arg5[%c3_251, %c3_252], %547 {strides = array<i32>} : memref<22x22xf32, #tpu.memory_space<vmem>>, vector<16x16xf32>,
    %cst_253 = arith.constant 2.500000e-01 : f32
    %550 = vector.broadcast %cst_253 : f32 to vector<16x16xf32>
    %551 = arith.mulf %548, %550 : vector<16x16xf32>
    %c3_254 = arith.constant 3 : index
    %c3_255 = arith.constant 3 : index
    %552 = vector.load %arg6[%c3_254, %c3_255] : memref<22x22xf32, #tpu.memory_space<vmem>>, vector<16x16xf32>
    tpu.vector_store %arg6[%c3_254, %c3_255], %551 {strides = array<i32>} : memref<22x22xf32, #tpu.memory_space<vmem>>, vector<16x16xf32>,
    %cst_256 = arith.constant 0.000000e+00 : f32
    %553 = vector.broadcast %cst_256 : f32 to vector<16x16xf32>
    %cst_257 = arith.constant 0.000000e+00 : f32
    %554 = vector.broadcast %cst_257 : f32 to vector<16x16xf32>
    %cst_258 = arith.constant 0.000000e+00 : f32
    %555 = vector.broadcast %cst_258 : f32 to vector<16x16xf32>
    %cst_259 = arith.constant 0.000000e+00 : f32
    %556 = vector.broadcast %cst_259 : f32 to vector<16x16xf32>
    %c0_260 = arith.constant 0 : index
    %c0_261 = arith.constant 0 : index
    %557 = vector.load %arg5[%c0_260, %c0_261] : memref<22x22xf32, #tpu.memory_space<vmem>>, vector<16x16xf32>
    %c0_262 = arith.constant 0 : index
    %558 = memref.load %arg2[%c0_262] : memref<98xf32, #tpu.memory_space<smem>>
    %559 = vector.broadcast %558 : f32 to vector<16x16xf32>
    %560 = arith.mulf %559, %557 : vector<16x16xf32>
    %561 = arith.addf %553, %560 : vector<16x16xf32>
    %c0_263 = arith.constant 0 : index
    %c1_264 = arith.constant 1 : index
    %562 = vector.load %arg5[%c0_263, %c1_264] : memref<22x22xf32, #tpu.memory_space<vmem>>, vector<16x16xf32>
    %c1_265 = arith.constant 1 : index
    %563 = memref.load %arg2[%c1_265] : memref<98xf32, #tpu.memory_space<smem>>
    %564 = vector.broadcast %563 : f32 to vector<16x16xf32>
    %565 = arith.mulf %564, %562 : vector<16x16xf32>
    %566 = arith.addf %554, %565 : vector<16x16xf32>
    %c0_266 = arith.constant 0 : index
    %c2_267 = arith.constant 2 : index
    %567 = vector.load %arg5[%c0_266, %c2_267] : memref<22x22xf32, #tpu.memory_space<vmem>>, vector<16x16xf32>
    %c2_268 = arith.constant 2 : index
    %568 = memref.load %arg2[%c2_268] : memref<98xf32, #tpu.memory_space<smem>>
    %569 = vector.broadcast %568 : f32 to vector<16x16xf32>
    %570 = arith.mulf %569, %567 : vector<16x16xf32>
    %571 = arith.addf %555, %570 : vector<16x16xf32>
    %c0_269 = arith.constant 0 : index
    %c3_270 = arith.constant 3 : index
    %572 = vector.load %arg5[%c0_269, %c3_270] : memref<22x22xf32, #tpu.memory_space<vmem>>, vector<16x16xf32>
    %c3_271 = arith.constant 3 : index
    %573 = memref.load %arg2[%c3_271] : memref<98xf32, #tpu.memory_space<smem>>
    %574 = vector.broadcast %573 : f32 to vector<16x16xf32>
    %575 = arith.mulf %574, %572 : vector<16x16xf32>
    %576 = arith.addf %556, %575 : vector<16x16xf32>
    %c0_272 = arith.constant 0 : index
    %c4_273 = arith.constant 4 : index
    %577 = vector.load %arg5[%c0_272, %c4_273] : memref<22x22xf32, #tpu.memory_space<vmem>>, vector<16x16xf32>
    %c4_274 = arith.constant 4 : index
    %578 = memref.load %arg2[%c4_274] : memref<98xf32, #tpu.memory_space<smem>>
    %579 = vector.broadcast %578 : f32 to vector<16x16xf32>
    %580 = arith.mulf %579, %577 : vector<16x16xf32>
    %581 = arith.addf %561, %580 : vector<16x16xf32>
    %c0_275 = arith.constant 0 : index
    %c5_276 = arith.constant 5 : index
    %582 = vector.load %arg5[%c0_275, %c5_276] : memref<22x22xf32, #tpu.memory_space<vmem>>, vector<16x16xf32>
    %c5_277 = arith.constant 5 : index
    %583 = memref.load %arg2[%c5_277] : memref<98xf32, #tpu.memory_space<smem>>
    %584 = vector.broadcast %583 : f32 to vector<16x16xf32>
    %585 = arith.mulf %584, %582 : vector<16x16xf32>
    %586 = arith.addf %566, %585 : vector<16x16xf32>
    %c0_278 = arith.constant 0 : index
    %c6_279 = arith.constant 6 : index
    %587 = vector.load %arg5[%c0_278, %c6_279] : memref<22x22xf32, #tpu.memory_space<vmem>>, vector<16x16xf32>
    %c6_280 = arith.constant 6 : index
    %588 = memref.load %arg2[%c6_280] : memref<98xf32, #tpu.memory_space<smem>>
    %589 = vector.broadcast %588 : f32 to vector<16x16xf32>
    %590 = arith.mulf %589, %587 : vector<16x16xf32>
    %591 = arith.addf %571, %590 : vector<16x16xf32>
    %c1_281 = arith.constant 1 : index
    %c0_282 = arith.constant 0 : index
    %592 = vector.load %arg5[%c1_281, %c0_282] : memref<22x22xf32, #tpu.memory_space<vmem>>, vector<16x16xf32>
    %c7_283 = arith.constant 7 : index
    %593 = memref.load %arg2[%c7_283] : memref<98xf32, #tpu.memory_space<smem>>
    %594 = vector.broadcast %593 : f32 to vector<16x16xf32>
    %595 = arith.mulf %594, %592 : vector<16x16xf32>
    %596 = arith.addf %576, %595 : vector<16x16xf32>
    %c1_284 = arith.constant 1 : index
    %c1_285 = arith.constant 1 : index
    %597 = vector.load %arg5[%c1_284, %c1_285] : memref<22x22xf32, #tpu.memory_space<vmem>>, vector<16x16xf32>
    %c8_286 = arith.constant 8 : index
    %598 = memref.load %arg2[%c8_286] : memref<98xf32, #tpu.memory_space<smem>>
    %599 = vector.broadcast %598 : f32 to vector<16x16xf32>
    %600 = arith.mulf %599, %597 : vector<16x16xf32>
    %601 = arith.addf %581, %600 : vector<16x16xf32>
    %c1_287 = arith.constant 1 : index
    %c2_288 = arith.constant 2 : index
    %602 = vector.load %arg5[%c1_287, %c2_288] : memref<22x22xf32, #tpu.memory_space<vmem>>, vector<16x16xf32>
    %c9_289 = arith.constant 9 : index
    %603 = memref.load %arg2[%c9_289] : memref<98xf32, #tpu.memory_space<smem>>
    %604 = vector.broadcast %603 : f32 to vector<16x16xf32>
    %605 = arith.mulf %604, %602 : vector<16x16xf32>
    %606 = arith.addf %586, %605 : vector<16x16xf32>
    %c1_290 = arith.constant 1 : index
    %c3_291 = arith.constant 3 : index
    %607 = vector.load %arg5[%c1_290, %c3_291] : memref<22x22xf32, #tpu.memory_space<vmem>>, vector<16x16xf32>
    %c10_292 = arith.constant 10 : index
    %608 = memref.load %arg2[%c10_292] : memref<98xf32, #tpu.memory_space<smem>>
    %609 = vector.broadcast %608 : f32 to vector<16x16xf32>
    %610 = arith.mulf %609, %607 : vector<16x16xf32>
    %611 = arith.addf %591, %610 : vector<16x16xf32>
    %c1_293 = arith.constant 1 : index
    %c4_294 = arith.constant 4 : index
    %612 = vector.load %arg5[%c1_293, %c4_294] : memref<22x22xf32, #tpu.memory_space<vmem>>, vector<16x16xf32>
    %c11_295 = arith.constant 11 : index
    %613 = memref.load %arg2[%c11_295] : memref<98xf32, #tpu.memory_space<smem>>
    %614 = vector.broadcast %613 : f32 to vector<16x16xf32>
    %615 = arith.mulf %614, %612 : vector<16x16xf32>
    %616 = arith.addf %596, %615 : vector<16x16xf32>
    %c1_296 = arith.constant 1 : index
    %c5_297 = arith.constant 5 : index
    %617 = vector.load %arg5[%c1_296, %c5_297] : memref<22x22xf32, #tpu.memory_space<vmem>>, vector<16x16xf32>
    %c12_298 = arith.constant 12 : index
    %618 = memref.load %arg2[%c12_298] : memref<98xf32, #tpu.memory_space<smem>>
    %619 = vector.broadcast %618 : f32 to vector<16x16xf32>
    %620 = arith.mulf %619, %617 : vector<16x16xf32>
    %621 = arith.addf %601, %620 : vector<16x16xf32>
    %c1_299 = arith.constant 1 : index
    %c6_300 = arith.constant 6 : index
    %622 = vector.load %arg5[%c1_299, %c6_300] : memref<22x22xf32, #tpu.memory_space<vmem>>, vector<16x16xf32>
    %c13_301 = arith.constant 13 : index
    %623 = memref.load %arg2[%c13_301] : memref<98xf32, #tpu.memory_space<smem>>
    %624 = vector.broadcast %623 : f32 to vector<16x16xf32>
    %625 = arith.mulf %624, %622 : vector<16x16xf32>
    %626 = arith.addf %606, %625 : vector<16x16xf32>
    %c2_302 = arith.constant 2 : index
    %c0_303 = arith.constant 0 : index
    %627 = vector.load %arg5[%c2_302, %c0_303] : memref<22x22xf32, #tpu.memory_space<vmem>>, vector<16x16xf32>
    %c14_304 = arith.constant 14 : index
    %628 = memref.load %arg2[%c14_304] : memref<98xf32, #tpu.memory_space<smem>>
    %629 = vector.broadcast %628 : f32 to vector<16x16xf32>
    %630 = arith.mulf %629, %627 : vector<16x16xf32>
    %631 = arith.addf %611, %630 : vector<16x16xf32>
    %c2_305 = arith.constant 2 : index
    %c1_306 = arith.constant 1 : index
    %632 = vector.load %arg5[%c2_305, %c1_306] : memref<22x22xf32, #tpu.memory_space<vmem>>, vector<16x16xf32>
    %c15_307 = arith.constant 15 : index
    %633 = memref.load %arg2[%c15_307] : memref<98xf32, #tpu.memory_space<smem>>
    %634 = vector.broadcast %633 : f32 to vector<16x16xf32>
    %635 = arith.mulf %634, %632 : vector<16x16xf32>
    %636 = arith.addf %616, %635 : vector<16x16xf32>
    %c2_308 = arith.constant 2 : index
    %c2_309 = arith.constant 2 : index
    %637 = vector.load %arg5[%c2_308, %c2_309] : memref<22x22xf32, #tpu.memory_space<vmem>>, vector<16x16xf32>
    %c16_310 = arith.constant 16 : index
    %638 = memref.load %arg2[%c16_310] : memref<98xf32, #tpu.memory_space<smem>>
    %639 = vector.broadcast %638 : f32 to vector<16x16xf32>
    %640 = arith.mulf %639, %637 : vector<16x16xf32>
    %641 = arith.addf %621, %640 : vector<16x16xf32>
    %c2_311 = arith.constant 2 : index
    %c3_312 = arith.constant 3 : index
    %642 = vector.load %arg5[%c2_311, %c3_312] : memref<22x22xf32, #tpu.memory_space<vmem>>, vector<16x16xf32>
    %c17_313 = arith.constant 17 : index
    %643 = memref.load %arg2[%c17_313] : memref<98xf32, #tpu.memory_space<smem>>
    %644 = vector.broadcast %643 : f32 to vector<16x16xf32>
    %645 = arith.mulf %644, %642 : vector<16x16xf32>
    %646 = arith.addf %626, %645 : vector<16x16xf32>
    %c2_314 = arith.constant 2 : index
    %c4_315 = arith.constant 4 : index
    %647 = vector.load %arg5[%c2_314, %c4_315] : memref<22x22xf32, #tpu.memory_space<vmem>>, vector<16x16xf32>
    %c18_316 = arith.constant 18 : index
    %648 = memref.load %arg2[%c18_316] : memref<98xf32, #tpu.memory_space<smem>>
    %649 = vector.broadcast %648 : f32 to vector<16x16xf32>
    %650 = arith.mulf %649, %647 : vector<16x16xf32>
    %651 = arith.addf %631, %650 : vector<16x16xf32>
    %c2_317 = arith.constant 2 : index
    %c5_318 = arith.constant 5 : index
    %652 = vector.load %arg5[%c2_317, %c5_318] : memref<22x22xf32, #tpu.memory_space<vmem>>, vector<16x16xf32>
    %c19_319 = arith.constant 19 : index
    %653 = memref.load %arg2[%c19_319] : memref<98xf32, #tpu.memory_space<smem>>
    %654 = vector.broadcast %653 : f32 to vector<16x16xf32>
    %655 = arith.mulf %654, %652 : vector<16x16xf32>
    %656 = arith.addf %636, %655 : vector<16x16xf32>
    %c2_320 = arith.constant 2 : index
    %c6_321 = arith.constant 6 : index
    %657 = vector.load %arg5[%c2_320, %c6_321] : memref<22x22xf32, #tpu.memory_space<vmem>>, vector<16x16xf32>
    %c20_322 = arith.constant 20 : index
    %658 = memref.load %arg2[%c20_322] : memref<98xf32, #tpu.memory_space<smem>>
    %659 = vector.broadcast %658 : f32 to vector<16x16xf32>
    %660 = arith.mulf %659, %657 : vector<16x16xf32>
    %661 = arith.addf %641, %660 : vector<16x16xf32>
    %c3_323 = arith.constant 3 : index
    %c0_324 = arith.constant 0 : index
    %662 = vector.load %arg5[%c3_323, %c0_324] : memref<22x22xf32, #tpu.memory_space<vmem>>, vector<16x16xf32>
    %c21_325 = arith.constant 21 : index
    %663 = memref.load %arg2[%c21_325] : memref<98xf32, #tpu.memory_space<smem>>
    %664 = vector.broadcast %663 : f32 to vector<16x16xf32>
    %665 = arith.mulf %664, %662 : vector<16x16xf32>
    %666 = arith.addf %646, %665 : vector<16x16xf32>
    %c3_326 = arith.constant 3 : index
    %c1_327 = arith.constant 1 : index
    %667 = vector.load %arg5[%c3_326, %c1_327] : memref<22x22xf32, #tpu.memory_space<vmem>>, vector<16x16xf32>
    %c22_328 = arith.constant 22 : index
    %668 = memref.load %arg2[%c22_328] : memref<98xf32, #tpu.memory_space<smem>>
    %669 = vector.broadcast %668 : f32 to vector<16x16xf32>
    %670 = arith.mulf %669, %667 : vector<16x16xf32>
    %671 = arith.addf %651, %670 : vector<16x16xf32>
    %c3_329 = arith.constant 3 : index
    %c2_330 = arith.constant 2 : index
    %672 = vector.load %arg5[%c3_329, %c2_330] : memref<22x22xf32, #tpu.memory_space<vmem>>, vector<16x16xf32>
    %c23_331 = arith.constant 23 : index
    %673 = memref.load %arg2[%c23_331] : memref<98xf32, #tpu.memory_space<smem>>
    %674 = vector.broadcast %673 : f32 to vector<16x16xf32>
    %675 = arith.mulf %674, %672 : vector<16x16xf32>
    %676 = arith.addf %656, %675 : vector<16x16xf32>
    %c3_332 = arith.constant 3 : index
    %c3_333 = arith.constant 3 : index
    %677 = vector.load %arg5[%c3_332, %c3_333] : memref<22x22xf32, #tpu.memory_space<vmem>>, vector<16x16xf32>
    %c24_334 = arith.constant 24 : index
    %678 = memref.load %arg2[%c24_334] : memref<98xf32, #tpu.memory_space<smem>>
    %679 = vector.broadcast %678 : f32 to vector<16x16xf32>
    %680 = arith.mulf %679, %677 : vector<16x16xf32>
    %681 = arith.addf %661, %680 : vector<16x16xf32>
    %c3_335 = arith.constant 3 : index
    %c4_336 = arith.constant 4 : index
    %682 = vector.load %arg5[%c3_335, %c4_336] : memref<22x22xf32, #tpu.memory_space<vmem>>, vector<16x16xf32>
    %c25_337 = arith.constant 25 : index
    %683 = memref.load %arg2[%c25_337] : memref<98xf32, #tpu.memory_space<smem>>
    %684 = vector.broadcast %683 : f32 to vector<16x16xf32>
    %685 = arith.mulf %684, %682 : vector<16x16xf32>
    %686 = arith.addf %666, %685 : vector<16x16xf32>
    %c3_338 = arith.constant 3 : index
    %c5_339 = arith.constant 5 : index
    %687 = vector.load %arg5[%c3_338, %c5_339] : memref<22x22xf32, #tpu.memory_space<vmem>>, vector<16x16xf32>
    %c26_340 = arith.constant 26 : index
    %688 = memref.load %arg2[%c26_340] : memref<98xf32, #tpu.memory_space<smem>>
    %689 = vector.broadcast %688 : f32 to vector<16x16xf32>
    %690 = arith.mulf %689, %687 : vector<16x16xf32>
    %691 = arith.addf %671, %690 : vector<16x16xf32>
    %c3_341 = arith.constant 3 : index
    %c6_342 = arith.constant 6 : index
    %692 = vector.load %arg5[%c3_341, %c6_342] : memref<22x22xf32, #tpu.memory_space<vmem>>, vector<16x16xf32>
    %c27_343 = arith.constant 27 : index
    %693 = memref.load %arg2[%c27_343] : memref<98xf32, #tpu.memory_space<smem>>
    %694 = vector.broadcast %693 : f32 to vector<16x16xf32>
    %695 = arith.mulf %694, %692 : vector<16x16xf32>
    %696 = arith.addf %676, %695 : vector<16x16xf32>
    %c4_344 = arith.constant 4 : index
    %c0_345 = arith.constant 0 : index
    %697 = vector.load %arg5[%c4_344, %c0_345] : memref<22x22xf32, #tpu.memory_space<vmem>>, vector<16x16xf32>
    %c28_346 = arith.constant 28 : index
    %698 = memref.load %arg2[%c28_346] : memref<98xf32, #tpu.memory_space<smem>>
    %699 = vector.broadcast %698 : f32 to vector<16x16xf32>
    %700 = arith.mulf %699, %697 : vector<16x16xf32>
    %701 = arith.addf %681, %700 : vector<16x16xf32>
    %c4_347 = arith.constant 4 : index
    %c1_348 = arith.constant 1 : index
    %702 = vector.load %arg5[%c4_347, %c1_348] : memref<22x22xf32, #tpu.memory_space<vmem>>, vector<16x16xf32>
    %c29_349 = arith.constant 29 : index
    %703 = memref.load %arg2[%c29_349] : memref<98xf32, #tpu.memory_space<smem>>
    %704 = vector.broadcast %703 : f32 to vector<16x16xf32>
    %705 = arith.mulf %704, %702 : vector<16x16xf32>
    %706 = arith.addf %686, %705 : vector<16x16xf32>
    %c4_350 = arith.constant 4 : index
    %c2_351 = arith.constant 2 : index
    %707 = vector.load %arg5[%c4_350, %c2_351] : memref<22x22xf32, #tpu.memory_space<vmem>>, vector<16x16xf32>
    %c30_352 = arith.constant 30 : index
    %708 = memref.load %arg2[%c30_352] : memref<98xf32, #tpu.memory_space<smem>>
    %709 = vector.broadcast %708 : f32 to vector<16x16xf32>
    %710 = arith.mulf %709, %707 : vector<16x16xf32>
    %711 = arith.addf %691, %710 : vector<16x16xf32>
    %c4_353 = arith.constant 4 : index
    %c3_354 = arith.constant 3 : index
    %712 = vector.load %arg5[%c4_353, %c3_354] : memref<22x22xf32, #tpu.memory_space<vmem>>, vector<16x16xf32>
    %c31_355 = arith.constant 31 : index
    %713 = memref.load %arg2[%c31_355] : memref<98xf32, #tpu.memory_space<smem>>
    %714 = vector.broadcast %713 : f32 to vector<16x16xf32>
    %715 = arith.mulf %714, %712 : vector<16x16xf32>
    %716 = arith.addf %696, %715 : vector<16x16xf32>
    %c4_356 = arith.constant 4 : index
    %c4_357 = arith.constant 4 : index
    %717 = vector.load %arg5[%c4_356, %c4_357] : memref<22x22xf32, #tpu.memory_space<vmem>>, vector<16x16xf32>
    %c32_358 = arith.constant 32 : index
    %718 = memref.load %arg2[%c32_358] : memref<98xf32, #tpu.memory_space<smem>>
    %719 = vector.broadcast %718 : f32 to vector<16x16xf32>
    %720 = arith.mulf %719, %717 : vector<16x16xf32>
    %721 = arith.addf %701, %720 : vector<16x16xf32>
    %c4_359 = arith.constant 4 : index
    %c5_360 = arith.constant 5 : index
    %722 = vector.load %arg5[%c4_359, %c5_360] : memref<22x22xf32, #tpu.memory_space<vmem>>, vector<16x16xf32>
    %c33_361 = arith.constant 33 : index
    %723 = memref.load %arg2[%c33_361] : memref<98xf32, #tpu.memory_space<smem>>
    %724 = vector.broadcast %723 : f32 to vector<16x16xf32>
    %725 = arith.mulf %724, %722 : vector<16x16xf32>
    %726 = arith.addf %706, %725 : vector<16x16xf32>
    %c4_362 = arith.constant 4 : index
    %c6_363 = arith.constant 6 : index
    %727 = vector.load %arg5[%c4_362, %c6_363] : memref<22x22xf32, #tpu.memory_space<vmem>>, vector<16x16xf32>
    %c34_364 = arith.constant 34 : index
    %728 = memref.load %arg2[%c34_364] : memref<98xf32, #tpu.memory_space<smem>>
    %729 = vector.broadcast %728 : f32 to vector<16x16xf32>
    %730 = arith.mulf %729, %727 : vector<16x16xf32>
    %731 = arith.addf %711, %730 : vector<16x16xf32>
    %c5_365 = arith.constant 5 : index
    %c0_366 = arith.constant 0 : index
    %732 = vector.load %arg5[%c5_365, %c0_366] : memref<22x22xf32, #tpu.memory_space<vmem>>, vector<16x16xf32>
    %c35_367 = arith.constant 35 : index
    %733 = memref.load %arg2[%c35_367] : memref<98xf32, #tpu.memory_space<smem>>
    %734 = vector.broadcast %733 : f32 to vector<16x16xf32>
    %735 = arith.mulf %734, %732 : vector<16x16xf32>
    %736 = arith.addf %716, %735 : vector<16x16xf32>
    %c5_368 = arith.constant 5 : index
    %c1_369 = arith.constant 1 : index
    %737 = vector.load %arg5[%c5_368, %c1_369] : memref<22x22xf32, #tpu.memory_space<vmem>>, vector<16x16xf32>
    %c36_370 = arith.constant 36 : index
    %738 = memref.load %arg2[%c36_370] : memref<98xf32, #tpu.memory_space<smem>>
    %739 = vector.broadcast %738 : f32 to vector<16x16xf32>
    %740 = arith.mulf %739, %737 : vector<16x16xf32>
    %741 = arith.addf %721, %740 : vector<16x16xf32>
    %c5_371 = arith.constant 5 : index
    %c2_372 = arith.constant 2 : index
    %742 = vector.load %arg5[%c5_371, %c2_372] : memref<22x22xf32, #tpu.memory_space<vmem>>, vector<16x16xf32>
    %c37_373 = arith.constant 37 : index
    %743 = memref.load %arg2[%c37_373] : memref<98xf32, #tpu.memory_space<smem>>
    %744 = vector.broadcast %743 : f32 to vector<16x16xf32>
    %745 = arith.mulf %744, %742 : vector<16x16xf32>
    %746 = arith.addf %726, %745 : vector<16x16xf32>
    %c5_374 = arith.constant 5 : index
    %c3_375 = arith.constant 3 : index
    %747 = vector.load %arg5[%c5_374, %c3_375] : memref<22x22xf32, #tpu.memory_space<vmem>>, vector<16x16xf32>
    %c38_376 = arith.constant 38 : index
    %748 = memref.load %arg2[%c38_376] : memref<98xf32, #tpu.memory_space<smem>>
    %749 = vector.broadcast %748 : f32 to vector<16x16xf32>
    %750 = arith.mulf %749, %747 : vector<16x16xf32>
    %751 = arith.addf %731, %750 : vector<16x16xf32>
    %c5_377 = arith.constant 5 : index
    %c4_378 = arith.constant 4 : index
    %752 = vector.load %arg5[%c5_377, %c4_378] : memref<22x22xf32, #tpu.memory_space<vmem>>, vector<16x16xf32>
    %c39_379 = arith.constant 39 : index
    %753 = memref.load %arg2[%c39_379] : memref<98xf32, #tpu.memory_space<smem>>
    %754 = vector.broadcast %753 : f32 to vector<16x16xf32>
    %755 = arith.mulf %754, %752 : vector<16x16xf32>
    %756 = arith.addf %736, %755 : vector<16x16xf32>
    %c5_380 = arith.constant 5 : index
    %c5_381 = arith.constant 5 : index
    %757 = vector.load %arg5[%c5_380, %c5_381] : memref<22x22xf32, #tpu.memory_space<vmem>>, vector<16x16xf32>
    %c40_382 = arith.constant 40 : index
    %758 = memref.load %arg2[%c40_382] : memref<98xf32, #tpu.memory_space<smem>>
    %759 = vector.broadcast %758 : f32 to vector<16x16xf32>
    %760 = arith.mulf %759, %757 : vector<16x16xf32>
    %761 = arith.addf %741, %760 : vector<16x16xf32>
    %c5_383 = arith.constant 5 : index
    %c6_384 = arith.constant 6 : index
    %762 = vector.load %arg5[%c5_383, %c6_384] : memref<22x22xf32, #tpu.memory_space<vmem>>, vector<16x16xf32>
    %c41_385 = arith.constant 41 : index
    %763 = memref.load %arg2[%c41_385] : memref<98xf32, #tpu.memory_space<smem>>
    %764 = vector.broadcast %763 : f32 to vector<16x16xf32>
    %765 = arith.mulf %764, %762 : vector<16x16xf32>
    %766 = arith.addf %746, %765 : vector<16x16xf32>
    %c6_386 = arith.constant 6 : index
    %c0_387 = arith.constant 0 : index
    %767 = vector.load %arg5[%c6_386, %c0_387] : memref<22x22xf32, #tpu.memory_space<vmem>>, vector<16x16xf32>
    %c42_388 = arith.constant 42 : index
    %768 = memref.load %arg2[%c42_388] : memref<98xf32, #tpu.memory_space<smem>>
    %769 = vector.broadcast %768 : f32 to vector<16x16xf32>
    %770 = arith.mulf %769, %767 : vector<16x16xf32>
    %771 = arith.addf %751, %770 : vector<16x16xf32>
    %c6_389 = arith.constant 6 : index
    %c1_390 = arith.constant 1 : index
    %772 = vector.load %arg5[%c6_389, %c1_390] : memref<22x22xf32, #tpu.memory_space<vmem>>, vector<16x16xf32>
    %c43_391 = arith.constant 43 : index
    %773 = memref.load %arg2[%c43_391] : memref<98xf32, #tpu.memory_space<smem>>
    %774 = vector.broadcast %773 : f32 to vector<16x16xf32>
    %775 = arith.mulf %774, %772 : vector<16x16xf32>
    %776 = arith.addf %756, %775 : vector<16x16xf32>
    %c6_392 = arith.constant 6 : index
    %c2_393 = arith.constant 2 : index
    %777 = vector.load %arg5[%c6_392, %c2_393] : memref<22x22xf32, #tpu.memory_space<vmem>>, vector<16x16xf32>
    %c44_394 = arith.constant 44 : index
    %778 = memref.load %arg2[%c44_394] : memref<98xf32, #tpu.memory_space<smem>>
    %779 = vector.broadcast %778 : f32 to vector<16x16xf32>
    %780 = arith.mulf %779, %777 : vector<16x16xf32>
    %781 = arith.addf %761, %780 : vector<16x16xf32>
    %c6_395 = arith.constant 6 : index
    %c3_396 = arith.constant 3 : index
    %782 = vector.load %arg5[%c6_395, %c3_396] : memref<22x22xf32, #tpu.memory_space<vmem>>, vector<16x16xf32>
    %c45_397 = arith.constant 45 : index
    %783 = memref.load %arg2[%c45_397] : memref<98xf32, #tpu.memory_space<smem>>
    %784 = vector.broadcast %783 : f32 to vector<16x16xf32>
    %785 = arith.mulf %784, %782 : vector<16x16xf32>
    %786 = arith.addf %766, %785 : vector<16x16xf32>
    %c6_398 = arith.constant 6 : index
    %c4_399 = arith.constant 4 : index
    %787 = vector.load %arg5[%c6_398, %c4_399] : memref<22x22xf32, #tpu.memory_space<vmem>>, vector<16x16xf32>
    %c46_400 = arith.constant 46 : index
    %788 = memref.load %arg2[%c46_400] : memref<98xf32, #tpu.memory_space<smem>>
    %789 = vector.broadcast %788 : f32 to vector<16x16xf32>
    %790 = arith.mulf %789, %787 : vector<16x16xf32>
    %791 = arith.addf %771, %790 : vector<16x16xf32>
    %c6_401 = arith.constant 6 : index
    %c5_402 = arith.constant 5 : index
    %792 = vector.load %arg5[%c6_401, %c5_402] : memref<22x22xf32, #tpu.memory_space<vmem>>, vector<16x16xf32>
    %c47_403 = arith.constant 47 : index
    %793 = memref.load %arg2[%c47_403] : memref<98xf32, #tpu.memory_space<smem>>
    %794 = vector.broadcast %793 : f32 to vector<16x16xf32>
    %795 = arith.mulf %794, %792 : vector<16x16xf32>
    %796 = arith.addf %776, %795 : vector<16x16xf32>
    %c6_404 = arith.constant 6 : index
    %c6_405 = arith.constant 6 : index
    %797 = vector.load %arg5[%c6_404, %c6_405] : memref<22x22xf32, #tpu.memory_space<vmem>>, vector<16x16xf32>
    %c48_406 = arith.constant 48 : index
    %798 = memref.load %arg2[%c48_406] : memref<98xf32, #tpu.memory_space<smem>>
    %799 = vector.broadcast %798 : f32 to vector<16x16xf32>
    %800 = arith.mulf %799, %797 : vector<16x16xf32>
    %801 = arith.addf %781, %800 : vector<16x16xf32>
    %c0_407 = arith.constant 0 : index
    %c0_408 = arith.constant 0 : index
    %802 = vector.load %arg6[%c0_407, %c0_408] : memref<22x22xf32, #tpu.memory_space<vmem>>, vector<16x16xf32>
    %c49_409 = arith.constant 49 : index
    %803 = memref.load %arg2[%c49_409] : memref<98xf32, #tpu.memory_space<smem>>
    %804 = vector.broadcast %803 : f32 to vector<16x16xf32>
    %805 = arith.mulf %804, %802 : vector<16x16xf32>
    %806 = arith.addf %786, %805 : vector<16x16xf32>
    %c0_410 = arith.constant 0 : index
    %c1_411 = arith.constant 1 : index
    %807 = vector.load %arg6[%c0_410, %c1_411] : memref<22x22xf32, #tpu.memory_space<vmem>>, vector<16x16xf32>
    %c50_412 = arith.constant 50 : index
    %808 = memref.load %arg2[%c50_412] : memref<98xf32, #tpu.memory_space<smem>>
    %809 = vector.broadcast %808 : f32 to vector<16x16xf32>
    %810 = arith.mulf %809, %807 : vector<16x16xf32>
    %811 = arith.addf %791, %810 : vector<16x16xf32>
    %c0_413 = arith.constant 0 : index
    %c2_414 = arith.constant 2 : index
    %812 = vector.load %arg6[%c0_413, %c2_414] : memref<22x22xf32, #tpu.memory_space<vmem>>, vector<16x16xf32>
    %c51_415 = arith.constant 51 : index
    %813 = memref.load %arg2[%c51_415] : memref<98xf32, #tpu.memory_space<smem>>
    %814 = vector.broadcast %813 : f32 to vector<16x16xf32>
    %815 = arith.mulf %814, %812 : vector<16x16xf32>
    %816 = arith.addf %796, %815 : vector<16x16xf32>
    %c0_416 = arith.constant 0 : index
    %c3_417 = arith.constant 3 : index
    %817 = vector.load %arg6[%c0_416, %c3_417] : memref<22x22xf32, #tpu.memory_space<vmem>>, vector<16x16xf32>
    %c52_418 = arith.constant 52 : index
    %818 = memref.load %arg2[%c52_418] : memref<98xf32, #tpu.memory_space<smem>>
    %819 = vector.broadcast %818 : f32 to vector<16x16xf32>
    %820 = arith.mulf %819, %817 : vector<16x16xf32>
    %821 = arith.addf %801, %820 : vector<16x16xf32>
    %c0_419 = arith.constant 0 : index
    %c4_420 = arith.constant 4 : index
    %822 = vector.load %arg6[%c0_419, %c4_420] : memref<22x22xf32, #tpu.memory_space<vmem>>, vector<16x16xf32>
    %c53_421 = arith.constant 53 : index
    %823 = memref.load %arg2[%c53_421] : memref<98xf32, #tpu.memory_space<smem>>
    %824 = vector.broadcast %823 : f32 to vector<16x16xf32>
    %825 = arith.mulf %824, %822 : vector<16x16xf32>
    %826 = arith.addf %806, %825 : vector<16x16xf32>
    %c0_422 = arith.constant 0 : index
    %c5_423 = arith.constant 5 : index
    %827 = vector.load %arg6[%c0_422, %c5_423] : memref<22x22xf32, #tpu.memory_space<vmem>>, vector<16x16xf32>
    %c54_424 = arith.constant 54 : index
    %828 = memref.load %arg2[%c54_424] : memref<98xf32, #tpu.memory_space<smem>>
    %829 = vector.broadcast %828 : f32 to vector<16x16xf32>
    %830 = arith.mulf %829, %827 : vector<16x16xf32>
    %831 = arith.addf %811, %830 : vector<16x16xf32>
    %c0_425 = arith.constant 0 : index
    %c6_426 = arith.constant 6 : index
    %832 = vector.load %arg6[%c0_425, %c6_426] : memref<22x22xf32, #tpu.memory_space<vmem>>, vector<16x16xf32>
    %c55_427 = arith.constant 55 : index
    %833 = memref.load %arg2[%c55_427] : memref<98xf32, #tpu.memory_space<smem>>
    %834 = vector.broadcast %833 : f32 to vector<16x16xf32>
    %835 = arith.mulf %834, %832 : vector<16x16xf32>
    %836 = arith.addf %816, %835 : vector<16x16xf32>
    %c1_428 = arith.constant 1 : index
    %c0_429 = arith.constant 0 : index
    %837 = vector.load %arg6[%c1_428, %c0_429] : memref<22x22xf32, #tpu.memory_space<vmem>>, vector<16x16xf32>
    %c56_430 = arith.constant 56 : index
    %838 = memref.load %arg2[%c56_430] : memref<98xf32, #tpu.memory_space<smem>>
    %839 = vector.broadcast %838 : f32 to vector<16x16xf32>
    %840 = arith.mulf %839, %837 : vector<16x16xf32>
    %841 = arith.addf %821, %840 : vector<16x16xf32>
    %c1_431 = arith.constant 1 : index
    %c1_432 = arith.constant 1 : index
    %842 = vector.load %arg6[%c1_431, %c1_432] : memref<22x22xf32, #tpu.memory_space<vmem>>, vector<16x16xf32>
    %c57_433 = arith.constant 57 : index
    %843 = memref.load %arg2[%c57_433] : memref<98xf32, #tpu.memory_space<smem>>
    %844 = vector.broadcast %843 : f32 to vector<16x16xf32>
    %845 = arith.mulf %844, %842 : vector<16x16xf32>
    %846 = arith.addf %826, %845 : vector<16x16xf32>
    %c1_434 = arith.constant 1 : index
    %c2_435 = arith.constant 2 : index
    %847 = vector.load %arg6[%c1_434, %c2_435] : memref<22x22xf32, #tpu.memory_space<vmem>>, vector<16x16xf32>
    %c58_436 = arith.constant 58 : index
    %848 = memref.load %arg2[%c58_436] : memref<98xf32, #tpu.memory_space<smem>>
    %849 = vector.broadcast %848 : f32 to vector<16x16xf32>
    %850 = arith.mulf %849, %847 : vector<16x16xf32>
    %851 = arith.addf %831, %850 : vector<16x16xf32>
    %c1_437 = arith.constant 1 : index
    %c3_438 = arith.constant 3 : index
    %852 = vector.load %arg6[%c1_437, %c3_438] : memref<22x22xf32, #tpu.memory_space<vmem>>, vector<16x16xf32>
    %c59_439 = arith.constant 59 : index
    %853 = memref.load %arg2[%c59_439] : memref<98xf32, #tpu.memory_space<smem>>
    %854 = vector.broadcast %853 : f32 to vector<16x16xf32>
    %855 = arith.mulf %854, %852 : vector<16x16xf32>
    %856 = arith.addf %836, %855 : vector<16x16xf32>
    %c1_440 = arith.constant 1 : index
    %c4_441 = arith.constant 4 : index
    %857 = vector.load %arg6[%c1_440, %c4_441] : memref<22x22xf32, #tpu.memory_space<vmem>>, vector<16x16xf32>
    %c60_442 = arith.constant 60 : index
    %858 = memref.load %arg2[%c60_442] : memref<98xf32, #tpu.memory_space<smem>>
    %859 = vector.broadcast %858 : f32 to vector<16x16xf32>
    %860 = arith.mulf %859, %857 : vector<16x16xf32>
    %861 = arith.addf %841, %860 : vector<16x16xf32>
    %c1_443 = arith.constant 1 : index
    %c5_444 = arith.constant 5 : index
    %862 = vector.load %arg6[%c1_443, %c5_444] : memref<22x22xf32, #tpu.memory_space<vmem>>, vector<16x16xf32>
    %c61_445 = arith.constant 61 : index
    %863 = memref.load %arg2[%c61_445] : memref<98xf32, #tpu.memory_space<smem>>
    %864 = vector.broadcast %863 : f32 to vector<16x16xf32>
    %865 = arith.mulf %864, %862 : vector<16x16xf32>
    %866 = arith.addf %846, %865 : vector<16x16xf32>
    %c1_446 = arith.constant 1 : index
    %c6_447 = arith.constant 6 : index
    %867 = vector.load %arg6[%c1_446, %c6_447] : memref<22x22xf32, #tpu.memory_space<vmem>>, vector<16x16xf32>
    %c62_448 = arith.constant 62 : index
    %868 = memref.load %arg2[%c62_448] : memref<98xf32, #tpu.memory_space<smem>>
    %869 = vector.broadcast %868 : f32 to vector<16x16xf32>
    %870 = arith.mulf %869, %867 : vector<16x16xf32>
    %871 = arith.addf %851, %870 : vector<16x16xf32>
    %c2_449 = arith.constant 2 : index
    %c0_450 = arith.constant 0 : index
    %872 = vector.load %arg6[%c2_449, %c0_450] : memref<22x22xf32, #tpu.memory_space<vmem>>, vector<16x16xf32>
    %c63_451 = arith.constant 63 : index
    %873 = memref.load %arg2[%c63_451] : memref<98xf32, #tpu.memory_space<smem>>
    %874 = vector.broadcast %873 : f32 to vector<16x16xf32>
    %875 = arith.mulf %874, %872 : vector<16x16xf32>
    %876 = arith.addf %856, %875 : vector<16x16xf32>
    %c2_452 = arith.constant 2 : index
    %c1_453 = arith.constant 1 : index
    %877 = vector.load %arg6[%c2_452, %c1_453] : memref<22x22xf32, #tpu.memory_space<vmem>>, vector<16x16xf32>
    %c64_454 = arith.constant 64 : index
    %878 = memref.load %arg2[%c64_454] : memref<98xf32, #tpu.memory_space<smem>>
    %879 = vector.broadcast %878 : f32 to vector<16x16xf32>
    %880 = arith.mulf %879, %877 : vector<16x16xf32>
    %881 = arith.addf %861, %880 : vector<16x16xf32>
    %c2_455 = arith.constant 2 : index
    %c2_456 = arith.constant 2 : index
    %882 = vector.load %arg6[%c2_455, %c2_456] : memref<22x22xf32, #tpu.memory_space<vmem>>, vector<16x16xf32>
    %c65_457 = arith.constant 65 : index
    %883 = memref.load %arg2[%c65_457] : memref<98xf32, #tpu.memory_space<smem>>
    %884 = vector.broadcast %883 : f32 to vector<16x16xf32>
    %885 = arith.mulf %884, %882 : vector<16x16xf32>
    %886 = arith.addf %866, %885 : vector<16x16xf32>
    %c2_458 = arith.constant 2 : index
    %c3_459 = arith.constant 3 : index
    %887 = vector.load %arg6[%c2_458, %c3_459] : memref<22x22xf32, #tpu.memory_space<vmem>>, vector<16x16xf32>
    %c66_460 = arith.constant 66 : index
    %888 = memref.load %arg2[%c66_460] : memref<98xf32, #tpu.memory_space<smem>>
    %889 = vector.broadcast %888 : f32 to vector<16x16xf32>
    %890 = arith.mulf %889, %887 : vector<16x16xf32>
    %891 = arith.addf %871, %890 : vector<16x16xf32>
    %c2_461 = arith.constant 2 : index
    %c4_462 = arith.constant 4 : index
    %892 = vector.load %arg6[%c2_461, %c4_462] : memref<22x22xf32, #tpu.memory_space<vmem>>, vector<16x16xf32>
    %c67_463 = arith.constant 67 : index
    %893 = memref.load %arg2[%c67_463] : memref<98xf32, #tpu.memory_space<smem>>
    %894 = vector.broadcast %893 : f32 to vector<16x16xf32>
    %895 = arith.mulf %894, %892 : vector<16x16xf32>
    %896 = arith.addf %876, %895 : vector<16x16xf32>
    %c2_464 = arith.constant 2 : index
    %c5_465 = arith.constant 5 : index
    %897 = vector.load %arg6[%c2_464, %c5_465] : memref<22x22xf32, #tpu.memory_space<vmem>>, vector<16x16xf32>
    %c68_466 = arith.constant 68 : index
    %898 = memref.load %arg2[%c68_466] : memref<98xf32, #tpu.memory_space<smem>>
    %899 = vector.broadcast %898 : f32 to vector<16x16xf32>
    %900 = arith.mulf %899, %897 : vector<16x16xf32>
    %901 = arith.addf %881, %900 : vector<16x16xf32>
    %c2_467 = arith.constant 2 : index
    %c6_468 = arith.constant 6 : index
    %902 = vector.load %arg6[%c2_467, %c6_468] : memref<22x22xf32, #tpu.memory_space<vmem>>, vector<16x16xf32>
    %c69_469 = arith.constant 69 : index
    %903 = memref.load %arg2[%c69_469] : memref<98xf32, #tpu.memory_space<smem>>
    %904 = vector.broadcast %903 : f32 to vector<16x16xf32>
    %905 = arith.mulf %904, %902 : vector<16x16xf32>
    %906 = arith.addf %886, %905 : vector<16x16xf32>
    %c3_470 = arith.constant 3 : index
    %c0_471 = arith.constant 0 : index
    %907 = vector.load %arg6[%c3_470, %c0_471] : memref<22x22xf32, #tpu.memory_space<vmem>>, vector<16x16xf32>
    %c70_472 = arith.constant 70 : index
    %908 = memref.load %arg2[%c70_472] : memref<98xf32, #tpu.memory_space<smem>>
    %909 = vector.broadcast %908 : f32 to vector<16x16xf32>
    %910 = arith.mulf %909, %907 : vector<16x16xf32>
    %911 = arith.addf %891, %910 : vector<16x16xf32>
    %c3_473 = arith.constant 3 : index
    %c1_474 = arith.constant 1 : index
    %912 = vector.load %arg6[%c3_473, %c1_474] : memref<22x22xf32, #tpu.memory_space<vmem>>, vector<16x16xf32>
    %c71_475 = arith.constant 71 : index
    %913 = memref.load %arg2[%c71_475] : memref<98xf32, #tpu.memory_space<smem>>
    %914 = vector.broadcast %913 : f32 to vector<16x16xf32>
    %915 = arith.mulf %914, %912 : vector<16x16xf32>
    %916 = arith.addf %896, %915 : vector<16x16xf32>
    %c3_476 = arith.constant 3 : index
    %c2_477 = arith.constant 2 : index
    %917 = vector.load %arg6[%c3_476, %c2_477] : memref<22x22xf32, #tpu.memory_space<vmem>>, vector<16x16xf32>
    %c72_478 = arith.constant 72 : index
    %918 = memref.load %arg2[%c72_478] : memref<98xf32, #tpu.memory_space<smem>>
    %919 = vector.broadcast %918 : f32 to vector<16x16xf32>
    %920 = arith.mulf %919, %917 : vector<16x16xf32>
    %921 = arith.addf %901, %920 : vector<16x16xf32>
    %c3_479 = arith.constant 3 : index
    %c3_480 = arith.constant 3 : index
    %922 = vector.load %arg6[%c3_479, %c3_480] : memref<22x22xf32, #tpu.memory_space<vmem>>, vector<16x16xf32>
    %c73_481 = arith.constant 73 : index
    %923 = memref.load %arg2[%c73_481] : memref<98xf32, #tpu.memory_space<smem>>
    %924 = vector.broadcast %923 : f32 to vector<16x16xf32>
    %925 = arith.mulf %924, %922 : vector<16x16xf32>
    %926 = arith.addf %906, %925 : vector<16x16xf32>
    %c3_482 = arith.constant 3 : index
    %c4_483 = arith.constant 4 : index
    %927 = vector.load %arg6[%c3_482, %c4_483] : memref<22x22xf32, #tpu.memory_space<vmem>>, vector<16x16xf32>
    %c74_484 = arith.constant 74 : index
    %928 = memref.load %arg2[%c74_484] : memref<98xf32, #tpu.memory_space<smem>>
    %929 = vector.broadcast %928 : f32 to vector<16x16xf32>
    %930 = arith.mulf %929, %927 : vector<16x16xf32>
    %931 = arith.addf %911, %930 : vector<16x16xf32>
    %c3_485 = arith.constant 3 : index
    %c5_486 = arith.constant 5 : index
    %932 = vector.load %arg6[%c3_485, %c5_486] : memref<22x22xf32, #tpu.memory_space<vmem>>, vector<16x16xf32>
    %c75_487 = arith.constant 75 : index
    %933 = memref.load %arg2[%c75_487] : memref<98xf32, #tpu.memory_space<smem>>
    %934 = vector.broadcast %933 : f32 to vector<16x16xf32>
    %935 = arith.mulf %934, %932 : vector<16x16xf32>
    %936 = arith.addf %916, %935 : vector<16x16xf32>
    %c3_488 = arith.constant 3 : index
    %c6_489 = arith.constant 6 : index
    %937 = vector.load %arg6[%c3_488, %c6_489] : memref<22x22xf32, #tpu.memory_space<vmem>>, vector<16x16xf32>
    %c76_490 = arith.constant 76 : index
    %938 = memref.load %arg2[%c76_490] : memref<98xf32, #tpu.memory_space<smem>>
    %939 = vector.broadcast %938 : f32 to vector<16x16xf32>
    %940 = arith.mulf %939, %937 : vector<16x16xf32>
    %941 = arith.addf %921, %940 : vector<16x16xf32>
    %c4_491 = arith.constant 4 : index
    %c0_492 = arith.constant 0 : index
    %942 = vector.load %arg6[%c4_491, %c0_492] : memref<22x22xf32, #tpu.memory_space<vmem>>, vector<16x16xf32>
    %c77_493 = arith.constant 77 : index
    %943 = memref.load %arg2[%c77_493] : memref<98xf32, #tpu.memory_space<smem>>
    %944 = vector.broadcast %943 : f32 to vector<16x16xf32>
    %945 = arith.mulf %944, %942 : vector<16x16xf32>
    %946 = arith.addf %926, %945 : vector<16x16xf32>
    %c4_494 = arith.constant 4 : index
    %c1_495 = arith.constant 1 : index
    %947 = vector.load %arg6[%c4_494, %c1_495] : memref<22x22xf32, #tpu.memory_space<vmem>>, vector<16x16xf32>
    %c78_496 = arith.constant 78 : index
    %948 = memref.load %arg2[%c78_496] : memref<98xf32, #tpu.memory_space<smem>>
    %949 = vector.broadcast %948 : f32 to vector<16x16xf32>
    %950 = arith.mulf %949, %947 : vector<16x16xf32>
    %951 = arith.addf %931, %950 : vector<16x16xf32>
    %c4_497 = arith.constant 4 : index
    %c2_498 = arith.constant 2 : index
    %952 = vector.load %arg6[%c4_497, %c2_498] : memref<22x22xf32, #tpu.memory_space<vmem>>, vector<16x16xf32>
    %c79_499 = arith.constant 79 : index
    %953 = memref.load %arg2[%c79_499] : memref<98xf32, #tpu.memory_space<smem>>
    %954 = vector.broadcast %953 : f32 to vector<16x16xf32>
    %955 = arith.mulf %954, %952 : vector<16x16xf32>
    %956 = arith.addf %936, %955 : vector<16x16xf32>
    %c4_500 = arith.constant 4 : index
    %c3_501 = arith.constant 3 : index
    %957 = vector.load %arg6[%c4_500, %c3_501] : memref<22x22xf32, #tpu.memory_space<vmem>>, vector<16x16xf32>
    %c80_502 = arith.constant 80 : index
    %958 = memref.load %arg2[%c80_502] : memref<98xf32, #tpu.memory_space<smem>>
    %959 = vector.broadcast %958 : f32 to vector<16x16xf32>
    %960 = arith.mulf %959, %957 : vector<16x16xf32>
    %961 = arith.addf %941, %960 : vector<16x16xf32>
    %c4_503 = arith.constant 4 : index
    %c4_504 = arith.constant 4 : index
    %962 = vector.load %arg6[%c4_503, %c4_504] : memref<22x22xf32, #tpu.memory_space<vmem>>, vector<16x16xf32>
    %c81_505 = arith.constant 81 : index
    %963 = memref.load %arg2[%c81_505] : memref<98xf32, #tpu.memory_space<smem>>
    %964 = vector.broadcast %963 : f32 to vector<16x16xf32>
    %965 = arith.mulf %964, %962 : vector<16x16xf32>
    %966 = arith.addf %946, %965 : vector<16x16xf32>
    %c4_506 = arith.constant 4 : index
    %c5_507 = arith.constant 5 : index
    %967 = vector.load %arg6[%c4_506, %c5_507] : memref<22x22xf32, #tpu.memory_space<vmem>>, vector<16x16xf32>
    %c82_508 = arith.constant 82 : index
    %968 = memref.load %arg2[%c82_508] : memref<98xf32, #tpu.memory_space<smem>>
    %969 = vector.broadcast %968 : f32 to vector<16x16xf32>
    %970 = arith.mulf %969, %967 : vector<16x16xf32>
    %971 = arith.addf %951, %970 : vector<16x16xf32>
    %c4_509 = arith.constant 4 : index
    %c6_510 = arith.constant 6 : index
    %972 = vector.load %arg6[%c4_509, %c6_510] : memref<22x22xf32, #tpu.memory_space<vmem>>, vector<16x16xf32>
    %c83_511 = arith.constant 83 : index
    %973 = memref.load %arg2[%c83_511] : memref<98xf32, #tpu.memory_space<smem>>
    %974 = vector.broadcast %973 : f32 to vector<16x16xf32>
    %975 = arith.mulf %974, %972 : vector<16x16xf32>
    %976 = arith.addf %956, %975 : vector<16x16xf32>
    %c5_512 = arith.constant 5 : index
    %c0_513 = arith.constant 0 : index
    %977 = vector.load %arg6[%c5_512, %c0_513] : memref<22x22xf32, #tpu.memory_space<vmem>>, vector<16x16xf32>
    %c84_514 = arith.constant 84 : index
    %978 = memref.load %arg2[%c84_514] : memref<98xf32, #tpu.memory_space<smem>>
    %979 = vector.broadcast %978 : f32 to vector<16x16xf32>
    %980 = arith.mulf %979, %977 : vector<16x16xf32>
    %981 = arith.addf %961, %980 : vector<16x16xf32>
    %c5_515 = arith.constant 5 : index
    %c1_516 = arith.constant 1 : index
    %982 = vector.load %arg6[%c5_515, %c1_516] : memref<22x22xf32, #tpu.memory_space<vmem>>, vector<16x16xf32>
    %c85_517 = arith.constant 85 : index
    %983 = memref.load %arg2[%c85_517] : memref<98xf32, #tpu.memory_space<smem>>
    %984 = vector.broadcast %983 : f32 to vector<16x16xf32>
    %985 = arith.mulf %984, %982 : vector<16x16xf32>
    %986 = arith.addf %966, %985 : vector<16x16xf32>
    %c5_518 = arith.constant 5 : index
    %c2_519 = arith.constant 2 : index
    %987 = vector.load %arg6[%c5_518, %c2_519] : memref<22x22xf32, #tpu.memory_space<vmem>>, vector<16x16xf32>
    %c86_520 = arith.constant 86 : index
    %988 = memref.load %arg2[%c86_520] : memref<98xf32, #tpu.memory_space<smem>>
    %989 = vector.broadcast %988 : f32 to vector<16x16xf32>
    %990 = arith.mulf %989, %987 : vector<16x16xf32>
    %991 = arith.addf %971, %990 : vector<16x16xf32>
    %c5_521 = arith.constant 5 : index
    %c3_522 = arith.constant 3 : index
    %992 = vector.load %arg6[%c5_521, %c3_522] : memref<22x22xf32, #tpu.memory_space<vmem>>, vector<16x16xf32>
    %c87_523 = arith.constant 87 : index
    %993 = memref.load %arg2[%c87_523] : memref<98xf32, #tpu.memory_space<smem>>
    %994 = vector.broadcast %993 : f32 to vector<16x16xf32>
    %995 = arith.mulf %994, %992 : vector<16x16xf32>
    %996 = arith.addf %976, %995 : vector<16x16xf32>
    %c5_524 = arith.constant 5 : index
    %c4_525 = arith.constant 4 : index
    %997 = vector.load %arg6[%c5_524, %c4_525] : memref<22x22xf32, #tpu.memory_space<vmem>>, vector<16x16xf32>
    %c88_526 = arith.constant 88 : index
    %998 = memref.load %arg2[%c88_526] : memref<98xf32, #tpu.memory_space<smem>>
    %999 = vector.broadcast %998 : f32 to vector<16x16xf32>
    %1000 = arith.mulf %999, %997 : vector<16x16xf32>
    %1001 = arith.addf %981, %1000 : vector<16x16xf32>
    %c5_527 = arith.constant 5 : index
    %c5_528 = arith.constant 5 : index
    %1002 = vector.load %arg6[%c5_527, %c5_528] : memref<22x22xf32, #tpu.memory_space<vmem>>, vector<16x16xf32>
    %c89_529 = arith.constant 89 : index
    %1003 = memref.load %arg2[%c89_529] : memref<98xf32, #tpu.memory_space<smem>>
    %1004 = vector.broadcast %1003 : f32 to vector<16x16xf32>
    %1005 = arith.mulf %1004, %1002 : vector<16x16xf32>
    %1006 = arith.addf %986, %1005 : vector<16x16xf32>
    %c5_530 = arith.constant 5 : index
    %c6_531 = arith.constant 6 : index
    %1007 = vector.load %arg6[%c5_530, %c6_531] : memref<22x22xf32, #tpu.memory_space<vmem>>, vector<16x16xf32>
    %c90_532 = arith.constant 90 : index
    %1008 = memref.load %arg2[%c90_532] : memref<98xf32, #tpu.memory_space<smem>>
    %1009 = vector.broadcast %1008 : f32 to vector<16x16xf32>
    %1010 = arith.mulf %1009, %1007 : vector<16x16xf32>
    %1011 = arith.addf %991, %1010 : vector<16x16xf32>
    %c6_533 = arith.constant 6 : index
    %c0_534 = arith.constant 0 : index
    %1012 = vector.load %arg6[%c6_533, %c0_534] : memref<22x22xf32, #tpu.memory_space<vmem>>, vector<16x16xf32>
    %c91_535 = arith.constant 91 : index
    %1013 = memref.load %arg2[%c91_535] : memref<98xf32, #tpu.memory_space<smem>>
    %1014 = vector.broadcast %1013 : f32 to vector<16x16xf32>
    %1015 = arith.mulf %1014, %1012 : vector<16x16xf32>
    %1016 = arith.addf %996, %1015 : vector<16x16xf32>
    %c6_536 = arith.constant 6 : index
    %c1_537 = arith.constant 1 : index
    %1017 = vector.load %arg6[%c6_536, %c1_537] : memref<22x22xf32, #tpu.memory_space<vmem>>, vector<16x16xf32>
    %c92_538 = arith.constant 92 : index
    %1018 = memref.load %arg2[%c92_538] : memref<98xf32, #tpu.memory_space<smem>>
    %1019 = vector.broadcast %1018 : f32 to vector<16x16xf32>
    %1020 = arith.mulf %1019, %1017 : vector<16x16xf32>
    %1021 = arith.addf %1001, %1020 : vector<16x16xf32>
    %c6_539 = arith.constant 6 : index
    %c2_540 = arith.constant 2 : index
    %1022 = vector.load %arg6[%c6_539, %c2_540] : memref<22x22xf32, #tpu.memory_space<vmem>>, vector<16x16xf32>
    %c93_541 = arith.constant 93 : index
    %1023 = memref.load %arg2[%c93_541] : memref<98xf32, #tpu.memory_space<smem>>
    %1024 = vector.broadcast %1023 : f32 to vector<16x16xf32>
    %1025 = arith.mulf %1024, %1022 : vector<16x16xf32>
    %1026 = arith.addf %1006, %1025 : vector<16x16xf32>
    %c6_542 = arith.constant 6 : index
    %c3_543 = arith.constant 3 : index
    %1027 = vector.load %arg6[%c6_542, %c3_543] : memref<22x22xf32, #tpu.memory_space<vmem>>, vector<16x16xf32>
    %c94_544 = arith.constant 94 : index
    %1028 = memref.load %arg2[%c94_544] : memref<98xf32, #tpu.memory_space<smem>>
    %1029 = vector.broadcast %1028 : f32 to vector<16x16xf32>
    %1030 = arith.mulf %1029, %1027 : vector<16x16xf32>
    %1031 = arith.addf %1011, %1030 : vector<16x16xf32>
    %c6_545 = arith.constant 6 : index
    %c4_546 = arith.constant 4 : index
    %1032 = vector.load %arg6[%c6_545, %c4_546] : memref<22x22xf32, #tpu.memory_space<vmem>>, vector<16x16xf32>
    %c95_547 = arith.constant 95 : index
    %1033 = memref.load %arg2[%c95_547] : memref<98xf32, #tpu.memory_space<smem>>
    %1034 = vector.broadcast %1033 : f32 to vector<16x16xf32>
    %1035 = arith.mulf %1034, %1032 : vector<16x16xf32>
    %1036 = arith.addf %1016, %1035 : vector<16x16xf32>
    %c6_548 = arith.constant 6 : index
    %c5_549 = arith.constant 5 : index
    %1037 = vector.load %arg6[%c6_548, %c5_549] : memref<22x22xf32, #tpu.memory_space<vmem>>, vector<16x16xf32>
    %c96_550 = arith.constant 96 : index
    %1038 = memref.load %arg2[%c96_550] : memref<98xf32, #tpu.memory_space<smem>>
    %1039 = vector.broadcast %1038 : f32 to vector<16x16xf32>
    %1040 = arith.mulf %1039, %1037 : vector<16x16xf32>
    %1041 = arith.addf %1021, %1040 : vector<16x16xf32>
    %c6_551 = arith.constant 6 : index
    %c6_552 = arith.constant 6 : index
    %1042 = vector.load %arg6[%c6_551, %c6_552] : memref<22x22xf32, #tpu.memory_space<vmem>>, vector<16x16xf32>
    %c97_553 = arith.constant 97 : index
    %1043 = memref.load %arg2[%c97_553] : memref<98xf32, #tpu.memory_space<smem>>
    %1044 = vector.broadcast %1043 : f32 to vector<16x16xf32>
    %1045 = arith.mulf %1044, %1042 : vector<16x16xf32>
    %1046 = arith.addf %1026, %1045 : vector<16x16xf32>
    %1047 = arith.addf %1041, %1046 : vector<16x16xf32>
    %1048 = arith.addf %1031, %1036 : vector<16x16xf32>
    %1049 = arith.addf %1047, %1048 : vector<16x16xf32>
    %1050 = vector.broadcast %10 : f32 to vector<16x16xf32>
    %1051 = arith.mulf %1049, %1050 : vector<16x16xf32>
    %1052 = vector.broadcast %12 : f32 to vector<16x16xf32>
    %1053 = arith.addf %1051, %1052 : vector<16x16xf32>
    %c1_554 = arith.constant 1 : index
    %c0_555 = arith.constant 0 : index
    %c0_556 = arith.constant 0 : index
    %c0_557 = arith.constant 0 : index
    %1054 = vector.load %arg4[%c1_554, %c0_555, %c0_556, %c0_557] : memref<2x1x16x16xf32, #tpu.memory_space<vmem>>, vector<1x1x16x16xf32>
    %1055 = vector.shape_cast %1054 : vector<1x1x16x16xf32> to vector<16x16xf32>
    %1056 = vector.shape_cast %1053 : vector<16x16xf32> to vector<1x1x16x16xf32>
    tpu.vector_store %arg4[%c1_554, %c0_555, %c0_556, %c0_557], %1056 {strides = array<i32>} : memref<2x1x16x16xf32, #tpu.memory_space<vmem>>, vector<1x1x16x16xf32>,
    return
  }
  func.func @transform_0(%arg0: i32) -> (i32, i32, i32, i32) {
    %c0_i32 = arith.constant 0 : i32
    %c0_i32_0 = arith.constant 0 : i32
    %c0_i32_1 = arith.constant 0 : i32
    %c0_i32_2 = arith.constant 0 : i32
    return %arg0, %c0_i32, %c0_i32_0, %c0_i32_1 : i32, i32, i32, i32
  }
  func.func @transform_1(%arg0: i32) -> i32 {
    %c0_i32 = arith.constant 0 : i32
    %c0_i32_0 = arith.constant 0 : i32
    return %c0_i32 : i32
  }
  func.func @transform_2(%arg0: i32) -> i32 {
    %c0_i32 = arith.constant 0 : i32
    %c0_i32_0 = arith.constant 0 : i32
    return %c0_i32 : i32
  }
  func.func @transform_3(%arg0: i32) -> (i32, i32, i32, i32) {
    %c0_i32 = arith.constant 0 : i32
    %c0_i32_0 = arith.constant 0 : i32
    %c0_i32_1 = arith.constant 0 : i32
    %c0_i32_2 = arith.constant 0 : i32
    return %arg0, %c0_i32, %c0_i32_0, %c0_i32_1 : i32, i32, i32, i32
  }
}

</mosaic_0001>

<bundles_post_ra>
// kernel: tpu_custom_call.1
= control target key start
LH: loop header
LB: loop body
LE: loop exit
PB: predicated region body
PF: predicated region fallthrough
CT: control target
= control target key end

     0   :  { %8 = vsyncpa [#allocation5], 0  ;;  %s4836_s0 = inlined_call_operand.hbm [shape: f32[2,4,16,16], index: 0, kind: input, shape index: {}]   ;;  %s4837_s1 = inlined_call_operand.vmem [shape: f32[98], index: 1, kind: input, shape index: {}]   ;;  %s4838_s2 = inlined_call_operand.vmem [shape: f32[4], index: 2, kind: input, shape index: {}]   ;;  %s4839_s3 = inlined_call_operand.hbm [shape: f32[2,1,16,16], index: 3, kind: output, shape index: {}]  }
   0x1   :  { %9 = vsyncpa [#allocation7], 0 }
   0x2   :  { %10 = vsyncpa [#allocation10], 0 }
   0x3   :  { %11 = vsyncpa [#allocation6], 0  ;;  %s3111_s12 = smov [#allocation4]   ;;  %s30_s16 = sshll.u32 %s4837_s1, 4  ;;  %s31_s16 = int_to_ptr.vmem [resolvable:$true] %s30_s16 }
   0x4   :  { %s17_s13 = sshll.u32 %s3111_s12, 4  ;;  %s3035_s19 = scalar_lea.hbm %s4836_s0, 2048  ;;  %s18_s13 = int_to_ptr.vmem [resolvable:$true] %s17_s13 }
   0x5   :  { %p3036_p0 = scmp.ne.s32.totalorder %s4836_s0, %s3035_s19  ;;  %p3039_p1 = scmp.lt.u32.totalorder %s3035_s19, %s4836_s0 }
   0x7   :  { %p3041_p2 = pnand %p3039_p1, %p3036_p0 }
   0x9   :  { %3044 = shalt.err (!%p3041_p2)
}
   0xa   :  { %s3045_s24 = scalar_lea.vmem %s18_s13, 2048  ;;  %p3050_p4 = scmp.lt.s32.totalorder %s18_s13, %s18_s13 }
   0xb   :  { %p3046_p3 = scmp.ne.s32.totalorder %s18_s13, %s3045_s24  ;;  %p3051_p5 = scmp.lt.s32.totalorder %s3045_s24, %s3045_s24 }
   0xd   :  { %p3052_p6 = por %p3051_p5, %p3050_p4 }
   0xf   :  { %p3053_p7 = pnand %p3052_p6, %p3046_p3 }
  0x11   :  { %3056 = shalt.err (!%p3053_p7)
}
  0x12   :  { %s3112_s1 = smov 128   ;;  %s3113_s25 = smov 8  }
  0x13   :  { %23 = dma.hbm_to_vmem [thread:$0]  %s4836_s0, 2048, %s18_s13, [#allocation5], %s3112_s1, %s3112_s1, %s3113_s25  }
  0x14   :  { %s3057_s28 = scalar_lea.vmem %s31_s16, 16  ;;  %p3062_p9 = scmp.lt.s32.totalorder %s31_s16, %s31_s16 }
  0x15   :  { %p3058_p8 = scmp.ne.s32.totalorder %s31_s16, %s3057_s28  ;;  %p3063_p10 = scmp.lt.s32.totalorder %s3057_s28, %s3057_s28 }
  0x17   :  { %p3064_p11 = por %p3063_p10, %p3062_p9 }
  0x19   :  { %p3065_p12 = pnand %p3064_p11, %p3058_p8 }
  0x1b   :  { %3068 = shalt.err (!%p3065_p12)
}
  0x1c   :  { %s3114_s29 = smov [#allocation8]   ;;  %s40_s5 = sshll.u32 %s4838_s2, 4  ;;  %s41_s5 = int_to_ptr.vmem [resolvable:$true] %s40_s5 }
  0x1d   :  { %33 = dma.vmem_to_smem %s31_s16, 16, %s3114_s29, [#allocation7]  }
  0x1e   :  { %s3069_s6 = scalar_lea.vmem %s41_s5, 16  ;;  %p3074_p0 = scmp.lt.s32.totalorder %s41_s5, %s41_s5 }
  0x1f   :  { %p3070_p13 = scmp.ne.s32.totalorder %s41_s5, %s3069_s6  ;;  %p3075_p1 = scmp.lt.s32.totalorder %s3069_s6, %s3069_s6 }
  0x21   :  { %p3076_p2 = por %p3075_p1, %p3074_p0 }
  0x23   :  { %p3077_p3 = pnand %p3076_p2, %p3070_p13 }
  0x25   :  { %3080 = shalt.err (!%p3077_p3)
}
  0x26   :  { %s3115_s0 = smov [#allocation9]  }
  0x27   :  { %43 = dma.vmem_to_smem %s41_s5, 16, %s3115_s0, [#allocation10]  }
  0x28   :  { %3103 = dma.done.wait [#allocation5], 2048  }
  0x29   :  { %3104 = vsyncadd [#allocation5], 4294965248 }
  0x2a   :  { %3105 = dma.done.wait [#allocation7], 16  }
  0x2b   :  { %3106 = vsyncadd [#allocation7], 4294967280 }
  0x2c   :  { %3107 = dma.done.wait [#allocation10], 16  }
  0x2d   :  { %3108 = vsyncadd [#allocation10], 4294967280 }
  0x2e   :  { %53 = sfence }
  0x2f   :  { %v73_v0 = vld [vmem:[#allocation4] sm:$0xff]  ;;  %v76_v1 = vld [vmem:[#allocation4 + $0x10] sm:$0xff]  ;;  %vm54_vm0 = vcmask 179200   ;;  %v74_v4 = vld [vmem:[#allocation4 + $0x8] sm:$0xff]  ;;  %vm57_vm1 = vcmask 177152   ;;  %v3116_v10 = vmov 0.0  }
  0x30   :  { %v83_v2 = vld [vmem:[#allocation4 + $0x20] sm:$0xff]  ;;  %v78_v3 = vmax.f32 %v73_v0, %v76_v1  ;;  %v77_v5 = vld [vmem:[#allocation4 + $0x18] sm:$0xff]  ;;  %v80_v6 = vadd.f32 %v76_v1, %v73_v0  ;;  %v90_v7 = vld [vmem:[#allocation4 + $0x30] sm:$0xff]  ;;  %55 = vst.msk [vmem:[#allocation2] sm:$0xff] %vm54_vm0, %v3116_v10  ;;  %s3117_s2 = smov 3   ;;  %vm104_vm2 = vcmask 154648  }
  0x31   :  { %v79_v8 = vmax.f32 %v74_v4, %v77_v5  ;;  %v84_v9 = vld [vmem:[#allocation4 + $0x28] sm:$0xff]  ;;  %56 = vst.msk [vmem:[#allocation2 + $0x8] sm:$0xff] %vm54_vm0, %v3116_v10  ;;  %59 = vst.msk [vmem:[#allocation3] sm:$0xff] %vm54_vm0, %v3116_v10  ;;  %v81_v11 = vadd.f32 %v77_v5, %v74_v4  ;;  %v91_v15 = vld [vmem:[#allocation4 + $0x38] sm:$0xff]  ;;  %s2810_s7 = sld [smem:[#allocation8 + $0x4]]  ;;  %s2811_s8 = sld [smem:[#allocation8 + $0x5]] }
  0x32   :  { %60 = vst.msk [vmem:[#allocation3 + $0x8] sm:$0xff] %vm54_vm0, %v3116_v10  ;;  %v85_v12 = vmax.f32 %v78_v3, %v83_v2  ;;  %v87_v13 = vadd.f32 %v83_v2, %v80_v6  ;;  %s2812_s9 = sld [smem:[#allocation8 + $0x6]]  ;;  %s2813_s10 = sld [smem:[#allocation8 + $0x7]]  ;;  %vm1427_vm3 = vcmask 130048  }
  0x33   :  { %58 = vst.msk [vmem:[#allocation2 + $0x10] sm:$0x3f] %vm57_vm1, %v3116_v10  ;;  %61 = vst.msk [vmem:[#allocation3 + $0x10] sm:$0x3f] %vm57_vm1, %v3116_v10  ;;  %v86_v14 = vmax.f32 %v79_v8, %v84_v9  ;;  %v88_v16 = vadd.f32 %v84_v9, %v81_v11  ;;  %s3118_s11 = smov 124   ;;  %s2814_s12 = sld [smem:[#allocation8 + $0x8]] }
  0x34   :  { %v92_v17 = vmax.f32 %v85_v12, %v90_v7  ;;  %v94_v18 = vadd.f32 %v90_v7, %v87_v13  ;;  %s2815_s13 = sld [smem:[#allocation8 + $0x9]]  ;;  %s2816_s14 = sld [smem:[#allocation8 + $0xa]] }
  0x35   :  { %v95_v19 = vadd.f32 %v91_v15, %v88_v16  ;;  %v93_v20 = vmax.f32 %v86_v14, %v91_v15  ;;  %s2817_s15 = sld [smem:[#allocation8 + $0xb]]  ;;  %s3119_s16 = smov 127  }
  0x36   :  { %98 = vrot.lane.b32.xlu0 %v92_v17, %s3117_s2  ;;  %v107_v21 = vmul.f32 0.25, %v94_v18  ;;  %s2818_s17 = sld [smem:[#allocation8 + $0xc]]  ;;  %s2819_s18 = sld [smem:[#allocation8 + $0xd]] }
  0x37   :  { %v108_v22 = vmul.f32 0.25, %v95_v19  ;;  %v146_v26 = vstv %s2810_s7  ;;  %v160_v30 = vstv %s2811_s8  ;;  %s2820_s19 = sld [smem:[#allocation8 + $0xe]]  ;;  %s2821_s20 = sld [smem:[#allocation8 + $0xf]] }
  0x38   :  { %111 = vrot.lane.b32.xlu1 %v107_v21, %s3117_s2  ;;  %v174_v34 = vstv %s2812_s9  ;;  %v190_v38 = vstv %s2813_s10  ;;  %s3120_s21 = smov 123   ;;  %s2822_s22 = sld [smem:[#allocation8 + $0x10]] }
  0x39   :  { %v204_v42 = vstv %s2814_s12  ;;  %s2823_s23 = sld [smem:[#allocation8 + $0x11]]  ;;  %s3121_s24 = smov 2  }
  0x3a   :  { %100 = vrot.lane.b32.xlu0 %v93_v20, %s3117_s2  ;;  %v218_v45 = vstv %s2815_s13  ;;  %v232_v48 = vstv %s2816_s14  ;;  %s2824_s26 = sld [smem:[#allocation8 + $0x12]]  ;;  %s2825_s27 = sld [smem:[#allocation8 + $0x13]] }
  0x3b   :  { %v246_v51 = vstv %s2817_s15  ;;  %s3122_s28 = smov 126   ;;  %s2826_s29 = sld [smem:[#allocation8 + $0x14]] }
  0x3c   :  { %113 = vrot.lane.b32.xlu1 %v108_v22, %s3117_s2  ;;  %v260_v54 = vstv %s2818_s17  ;;  %v274_v57 = vstv %s2819_s18  ;;  %s2827_s30 = sld [smem:[#allocation8 + $0x15]]  ;;  %s2828_s4 = sld [smem:[#allocation8 + $0x16]] }
  0x3d   :  { %v290_v61 = vstv %s2820_s19  ;;  %v304_v1 = vstv %s2821_s20  ;;  %s2829_s5 = sld [smem:[#allocation8 + $0x17]]  ;;  %s3123_s6 = smov 122  }
  0x3e   :  { %v318_v4 = vstv %s2822_s22  ;;  %s2830_s0 = sld [smem:[#allocation8 + $0x18]]  ;;  %s3124_s7 = smov 1  }
  0x3f   :  { %v332_v7 = vstv %s2823_s23  ;;  %s2831_s8 = sld [smem:[#allocation8 + $0x19]]  ;;  %s2832_s9 = sld [smem:[#allocation8 + $0x1a]] }
  0x40   :  { %v346_v10 = vstv %s2824_s26  ;;  %v360_v13 = vstv %s2825_s27  ;;  %s2833_s10 = sld [smem:[#allocation8 + $0x1b]]  ;;  %s3125_s12 = smov 125  }
  0x41   :  { %v374_v16 = vstv %s2826_s29  ;;  %s2838_s13 = sld [smem:[#allocation8 + $0x20]]  ;;  %s2839_s14 = sld [smem:[#allocation8 + $0x21]] }
  0x42   :  { %v390_v20 = vstv %s2827_s30  ;;  %s2840_s15 = sld [smem:[#allocation8 + $0x22]]  ;;  %s2841_s17 = sld [smem:[#allocation8 + $0x23]] }
  0x43   :  { %s2842_s18 = sld [smem:[#allocation8 + $0x24]]  ;;  %s2843_s19 = sld [smem:[#allocation8 + $0x25]] }
  0x44   :  { %s2844_s20 = sld [smem:[#allocation8 + $0x26]]  ;;  %s2845_s22 = sld [smem:[#allocation8 + $0x27]] }
  0x45   :  { %s2846_s23 = sld [smem:[#allocation8 + $0x28]]  ;;  %s2847_s26 = sld [smem:[#allocation8 + $0x29]] }
  0x46   :  { %s3247_s27 = sld [smem:[#allocation8 + $0x2a]]  ;;  %s3255_s29 = sld [smem:[#allocation8 + $0x2b]] }
  0x47   :  { %s2850_s30 = sld [smem:[#allocation8 + $0x2c]] }
  0xa8   :  { %v99_v23 = vpop.permute.xlu0 %98 }
  0xa9   :  { %105 = vst.msk [vmem:[#allocation2 + $0x3] sm:$0xff] %vm104_vm2, %v99_v23 }
  0xaa   :  { %v112_v24 = vpop.permute.xlu1 %111 }
  0xab   :  { %117 = vst.msk [vmem:[#allocation3 + $0x3] sm:$0xff] %vm104_vm2, %v112_v24  ;;  %v404_v24 = vstv %s2828_s4  ;;  %s2851_s4 = sld [smem:[#allocation8 + $0x2d]] }
  0xac   :  { %v101_v25 = vpop.permute.xlu0 %100 }
  0xad   :  { %106 = vst.msk [vmem:[#allocation2 + $0xb] sm:$0xff] %vm104_vm2, %v101_v25 }
  0xae   :  { %v114_v27 = vpop.permute.xlu1 %113 }
  0xaf   :  { %118 = vst.msk [vmem:[#allocation3 + $0xb] sm:$0xff] %vm104_vm2, %v114_v27  ;;  %v418_v27 = vstv %s2829_s5  ;;  %s2852_s5 = sld [smem:[#allocation8 + $0x2e]] }
  0xb0   :  { %v119_v28 = vld [vmem:[#allocation2] sm:$0xff] }
  0xb1   :  { %v147_v29 = vmul.f32 %v146_v26, %v119_v28  ;;  %v161_v33 = vmul.f32 %v160_v30, %v119_v28  ;;  %v175_v36 = vmul.f32 %v174_v34, %v119_v28  ;;  %v187_v37 = vld [vmem:[#allocation2 + $0x1] sm:$0xff] }
  0xb2   :  { %v191_v40 = vmul.f32 %v190_v38, %v187_v37  ;;  %v205_v44 = vmul.f32 %v204_v42, %v187_v37  ;;  %v219_v47 = vmul.f32 %v218_v45, %v187_v37  ;;  %v233_v50 = vmul.f32 %v232_v48, %v187_v37  ;;  %v287_v60 = vld [vmem:[#allocation2 + $0x2] sm:$0xff] }
  0xb3   :  { %151 = vrot.lane.b32.xlu0 %v147_v29, %s3118_s11  ;;  %v247_v53 = vmul.f32 %v246_v51, %v187_v37  ;;  %v261_v56 = vmul.f32 %v260_v54, %v187_v37  ;;  %v275_v59 = vmul.f32 %v274_v57, %v187_v37  ;;  %v291_v63 = vmul.f32 %v290_v61, %v287_v60  ;;  %v387_v19 = vld [vmem:[#allocation2 + $0x3] sm:$0xff] }
  0xb4   :  { %v120_v31 = vld [vmem:[#allocation2 + $0x8] sm:$0xff]  ;;  %v305_v3 = vmul.f32 %v304_v1, %v287_v60  ;;  %v319_v6 = vmul.f32 %v318_v4, %v287_v60  ;;  %v333_v9 = vmul.f32 %v332_v7, %v287_v60  ;;  %v347_v12 = vmul.f32 %v346_v10, %v287_v60 }
  0xb5   :  { %v148_v32 = vmul.f32 %v146_v26, %v120_v31  ;;  %v162_v35 = vmul.f32 %v160_v30, %v120_v31  ;;  %v176_v39 = vmul.f32 %v174_v34, %v120_v31  ;;  %v188_v41 = vld [vmem:[#allocation2 + $0x9] sm:$0xff]  ;;  %v361_v15 = vmul.f32 %v360_v13, %v287_v60 }
  0xb6   :  { %v192_v43 = vmul.f32 %v190_v38, %v188_v41  ;;  %v206_v46 = vmul.f32 %v204_v42, %v188_v41  ;;  %v220_v49 = vmul.f32 %v218_v45, %v188_v41  ;;  %v234_v52 = vmul.f32 %v232_v48, %v188_v41  ;;  %v288_v0 = vld [vmem:[#allocation2 + $0xa] sm:$0xff] }
  0xb7   :  { %153 = vrot.lane.b32.xlu1 %v148_v32, %s3118_s11  ;;  %165 = vrot.lane.b32.xlu0 %v161_v33, %s3118_s11  ;;  %v248_v55 = vmul.f32 %v246_v51, %v188_v41  ;;  %v262_v58 = vmul.f32 %v260_v54, %v188_v41  ;;  %v276_v62 = vmul.f32 %v274_v57, %v188_v41  ;;  %v388_v23 = vld [vmem:[#allocation2 + $0xb] sm:$0xff]  ;;  %v432_v30 = vstv %s2830_s0  ;;  %s2853_s0 = sld [smem:[#allocation8 + $0x2f]] }
  0xb8   :  { %v292_v2 = vmul.f32 %v290_v61, %v288_v0  ;;  %v306_v5 = vmul.f32 %v304_v1, %v288_v0  ;;  %v320_v8 = vmul.f32 %v318_v4, %v288_v0  ;;  %v334_v11 = vmul.f32 %v332_v7, %v288_v0  ;;  %v487_v42 = vld [vmem:[#allocation2 + $0x4] sm:$0xff]  ;;  %v556_v57 = vld [vmem:[#allocation2 + $0xd] sm:$0xff] }
  0xb9   :  { %v348_v14 = vmul.f32 %v346_v10, %v288_v0  ;;  %v362_v17 = vmul.f32 %v360_v13, %v288_v0  ;;  %v375_v18 = vmul.f32 %v374_v16, %v287_v60  ;;  %v376_v21 = vmul.f32 %v374_v16, %v288_v0 }
  0xba   :  { %v391_v22 = vmul.f32 %v390_v20, %v387_v19  ;;  %v392_v25 = vmul.f32 %v390_v20, %v388_v23  ;;  %v405_v26 = vmul.f32 %v404_v24, %v387_v19  ;;  %v406_v28 = vmul.f32 %v404_v24, %v388_v23 }
  0xbb   :  { %167 = vrot.lane.b32.xlu1 %v162_v35, %s3118_s11  ;;  %179 = vrot.lane.b32.xlu0 %v175_v36, %s3118_s11  ;;  %v419_v29 = vmul.f32 %v418_v27, %v387_v19  ;;  %v420_v31 = vmul.f32 %v418_v27, %v388_v23  ;;  %v433_v32 = vmul.f32 %v432_v30, %v387_v19  ;;  %v446_v33 = vstv %s2831_s8  ;;  %v656_v27 = vld [vmem:[#allocation2 + $0xe] sm:$0xff]  ;;  %s2854_s8 = sld [smem:[#allocation8 + $0x30]] }
  0xbc   :  { %v434_v34 = vmul.f32 %v432_v30, %v388_v23  ;;  %v447_v35 = vmul.f32 %v446_v33, %v387_v19  ;;  %v460_v36 = vstv %s2832_s9  ;;  %v448_v37 = vmul.f32 %v446_v33, %v388_v23  ;;  %s3295_s9 = sld [smem:[#allocation8 + $0x31]] }
  0xbd   :  { %v461_v38 = vmul.f32 %v460_v36, %v387_v19  ;;  %v558_v54 = vstv %s2841_s17  ;;  %v586_v61 = vstv %s2843_s19  ;;  %v600_v1 = vstv %s2844_s20  ;;  %s2860_s17 = sld [smem:[#allocation8 + $0x36]]  ;;  %s3343_s19 = sld [smem:[#allocation8 + $0x3c]] }
  0xbe   :  { %v588_v4 = vmul.f32 %v586_v61, %v556_v57  ;;  %v642_v16 = vstv %s2847_s26  ;;  %v686_v33 = vstv %s2850_s30  ;;  %s3351_s20 = sld [smem:[#allocation8 + $0x3d]]  ;;  %s3385_s26 = sld [smem:[#allocation8 + $0x40]] }
  0xbf   :  { %181 = vrot.lane.b32.xlu1 %v176_v39, %s3118_s11  ;;  %195 = vrot.lane.b32.xlu0 %v191_v40, %s3117_s2  ;;  %v474_v39 = vstv %s2833_s10  ;;  %v462_v40 = vmul.f32 %v460_v36, %v388_v23  ;;  %s3303_s10 = sld [smem:[#allocation8 + $0x32]]  ;;  %s2873_s30 = sld [smem:[#allocation8 + $0x43]] }
  0xc0   :  { %v475_v41 = vmul.f32 %v474_v39, %v387_v19 }
  0xc3   :  { %197 = vrot.lane.b32.xlu1 %v192_v43, %s3117_s2  ;;  %209 = vrot.lane.b32.xlu0 %v205_v44, %s3119_s16  ;;  %v514_v43 = vstv %s2838_s13  ;;  %v476_v44 = vmul.f32 %v474_v39, %v388_v23  ;;  %s2857_s13 = sld [smem:[#allocation8 + $0x33]] }
  0xc4   :  { %v515_v45 = vmul.f32 %v514_v43, %v487_v42 }
  0xc7   :  { %211 = vrot.lane.b32.xlu1 %v206_v46, %s3119_s16  ;;  %223 = vrot.lane.b32.xlu0 %v219_v47, %s3119_s16  ;;  %v488_v46 = vld [vmem:[#allocation2 + $0xc] sm:$0xff]  ;;  %v528_v47 = vstv %s2839_s14  ;;  %s2858_s14 = sld [smem:[#allocation8 + $0x34]] }
  0xc8   :  { %v516_v48 = vmul.f32 %v514_v43, %v488_v46  ;;  %v530_v51 = vmul.f32 %v528_v47, %v488_v46  ;;  %v714_v43 = vstv %s2852_s5  ;;  %s2875_s5 = sld [smem:[#allocation8 + $0x45]] }
  0xcb   :  { %225 = vrot.lane.b32.xlu1 %v220_v49, %s3119_s16  ;;  %237 = vrot.lane.b32.xlu0 %v233_v50, %s3119_s16  ;;  %v529_v49 = vmul.f32 %v528_v47, %v487_v42  ;;  %v542_v50 = vstv %s2840_s15  ;;  %s2859_s15 = sld [smem:[#allocation8 + $0x35]] }
  0xcf   :  { %239 = vrot.lane.b32.xlu1 %v234_v52, %s3119_s16  ;;  %251 = vrot.lane.b32.xlu0 %v247_v53, %s3119_s16  ;;  %v543_v52 = vmul.f32 %v542_v50, %v487_v42  ;;  %v555_v53 = vld [vmem:[#allocation2 + $0x5] sm:$0xff] }
  0xd0   :  { %v587_v0 = vmul.f32 %v586_v61, %v555_v53  ;;  %v643_v20 = vmul.f32 %v642_v16, %v555_v53 }
  0xd3   :  { %253 = vrot.lane.b32.xlu1 %v248_v55, %s3119_s16  ;;  %265 = vrot.lane.b32.xlu0 %v261_v56, %s3120_s21  ;;  %v544_v55 = vmul.f32 %v542_v50, %v488_v46  ;;  %v559_v56 = vmul.f32 %v558_v54, %v555_v53 }
  0xd7   :  { %267 = vrot.lane.b32.xlu1 %v262_v58, %s3120_s21  ;;  %279 = vrot.lane.b32.xlu0 %v275_v59, %s3120_s21  ;;  %v572_v58 = vstv %s2842_s18  ;;  %v560_v59 = vmul.f32 %v558_v54, %v556_v57  ;;  %s2861_s18 = sld [smem:[#allocation8 + $0x37]] }
  0xd8   :  { %v573_v60 = vmul.f32 %v572_v58, %v555_v53 }
  0xdb   :  { %281 = vrot.lane.b32.xlu1 %v276_v62, %s3120_s21  ;;  %295 = vrot.lane.b32.xlu0 %v291_v63, %s3121_s24  ;;  %v574_v63 = vmul.f32 %v572_v58, %v556_v57  ;;  %v755_v58 = vld [vmem:[#allocation3] sm:$0xff] }
  0xdf   :  { %297 = vrot.lane.b32.xlu1 %v292_v2, %s3121_s24  ;;  %309 = vrot.lane.b32.xlu0 %v305_v3, %s3121_s24 }
  0xe3   :  { %311 = vrot.lane.b32.xlu1 %v306_v5, %s3121_s24  ;;  %323 = vrot.lane.b32.xlu0 %v319_v6, %s3122_s28  ;;  %v601_v5 = vmul.f32 %v600_v1, %v555_v53  ;;  %v614_v6 = vstv %s2845_s22  ;;  %s3362_s22 = sld [smem:[#allocation8 + $0x3e]] }
  0xe4   :  { %v615_v10 = vmul.f32 %v614_v6, %v555_v53 }
  0xe7   :  { %325 = vrot.lane.b32.xlu1 %v320_v8, %s3122_s28  ;;  %337 = vrot.lane.b32.xlu0 %v333_v9, %s3122_s28  ;;  %v602_v9 = vmul.f32 %v600_v1, %v556_v57  ;;  %v756_v1 = vld [vmem:[#allocation3 + $0x8] sm:$0xff] }
  0xeb   :  { %339 = vrot.lane.b32.xlu1 %v334_v11, %s3122_s28  ;;  %351 = vrot.lane.b32.xlu0 %v347_v12, %s3122_s28  ;;  %v628_v11 = vstv %s2846_s23  ;;  %s3374_s23 = sld [smem:[#allocation8 + $0x3f]] }
  0xec   :  { %v630_v19 = vmul.f32 %v628_v11, %v556_v57 }
  0xef   :  { %353 = vrot.lane.b32.xlu1 %v348_v14, %s3122_s28  ;;  %365 = vrot.lane.b32.xlu0 %v361_v15, %s3122_s28  ;;  %v616_v14 = vmul.f32 %v614_v6, %v556_v57  ;;  %v629_v15 = vmul.f32 %v628_v11, %v555_v53  ;;  %v742_v53 = vstv %s2854_s8  ;;  %v786_v11 = vstv %s2857_s13  ;;  %s3436_s8 = sld [smem:[#allocation8 + $0x47]]  ;;  %s2880_s13 = sld [smem:[#allocation8 + $0x4a]] }
  0xf3   :  { %367 = vrot.lane.b32.xlu1 %v362_v17, %s3122_s28  ;;  %379 = vrot.lane.b32.xlu0 %v375_v18, %s3123_s6 }
  0xf7   :  { %381 = vrot.lane.b32.xlu1 %v376_v21, %s3123_s6  ;;  %395 = vrot.lane.b32.xlu0 %v391_v22, %s3124_s7  ;;  %v655_v21 = vld [vmem:[#allocation2 + $0x6] sm:$0xff]  ;;  %v658_v22 = vstv %s3247_s27  ;;  %s2871_s27 = sld [smem:[#allocation8 + $0x41]] }
  0xf8   :  { %v715_v47 = vmul.f32 %v714_v43, %v655_v21 }
  0xfb   :  { %397 = vrot.lane.b32.xlu1 %v392_v25, %s3124_s7  ;;  %409 = vrot.lane.b32.xlu0 %v405_v26, %s3124_s7  ;;  %v644_v25 = vmul.f32 %v642_v16, %v556_v57  ;;  %v659_v26 = vmul.f32 %v658_v22, %v655_v21  ;;  %v743_v57 = vmul.f32 %v742_v53, %v655_v21 }
  0xff   :  { %411 = vrot.lane.b32.xlu1 %v406_v28, %s3124_s7  ;;  %423 = vrot.lane.b32.xlu0 %v419_v29, %s3124_s7  ;;  %v672_v28 = vstv %s3255_s29  ;;  %s2872_s29 = sld [smem:[#allocation8 + $0x42]] }
 0x100   :  { %v674_v36 = vmul.f32 %v672_v28, %v656_v27 }
 0x103   :  { %425 = vrot.lane.b32.xlu1 %v420_v31, %s3124_s7  ;;  %437 = vrot.lane.b32.xlu0 %v433_v32, %s3125_s12  ;;  %v660_v31 = vmul.f32 %v658_v22, %v656_v27  ;;  %v673_v32 = vmul.f32 %v672_v28, %v655_v21 }
 0x107   :  { %439 = vrot.lane.b32.xlu1 %v434_v34, %s3125_s12  ;;  %451 = vrot.lane.b32.xlu0 %v447_v35, %s3125_s12 }
 0x10b   :  { %453 = vrot.lane.b32.xlu1 %v448_v37, %s3125_s12  ;;  %465 = vrot.lane.b32.xlu0 %v461_v38, %s3125_s12  ;;  %v687_v37 = vmul.f32 %v686_v33, %v655_v21  ;;  %v700_v38 = vstv %s2851_s4  ;;  %s2874_s4 = sld [smem:[#allocation8 + $0x44]] }
 0x10c   :  { %v701_v42 = vmul.f32 %v700_v38, %v655_v21  ;;  %v702_v46 = vmul.f32 %v700_v38, %v656_v27 }
 0x10f   :  { %467 = vrot.lane.b32.xlu1 %v462_v40, %s3125_s12  ;;  %479 = vrot.lane.b32.xlu0 %v475_v41, %s3125_s12  ;;  %v688_v41 = vmul.f32 %v686_v33, %v656_v27 }
 0x113   :  { %481 = vrot.lane.b32.xlu1 %v476_v44, %s3125_s12  ;;  %519 = vrot.lane.b32.xlu0 %v515_v45, %s3118_s11 }
 0x117   :  { %521 = vrot.lane.b32.xlu1 %v516_v48, %s3118_s11  ;;  %533 = vrot.lane.b32.xlu0 %v529_v49, %s3118_s11  ;;  %v728_v48 = vstv %s2853_s0  ;;  %s3428_s0 = sld [smem:[#allocation8 + $0x46]] }
 0x11b   :  { %535 = vrot.lane.b32.xlu1 %v530_v51, %s3118_s11  ;;  %547 = vrot.lane.b32.xlu0 %v543_v52, %s3118_s11  ;;  %v716_v51 = vmul.f32 %v714_v43, %v656_v27  ;;  %v729_v52 = vmul.f32 %v728_v48, %v655_v21  ;;  %v842_v43 = vstv %s2861_s18  ;;  %s3484_s18 = sld [smem:[#allocation8 + $0x4e]] }
 0x11f   :  { %549 = vrot.lane.b32.xlu1 %v544_v55, %s3118_s11  ;;  %563 = vrot.lane.b32.xlu0 %v559_v56, %s3117_s2  ;;  %v730_v56 = vmul.f32 %v728_v48, %v656_v27 }
 0x123   :  { %565 = vrot.lane.b32.xlu1 %v560_v59, %s3117_s2  ;;  %577 = vrot.lane.b32.xlu0 %v573_v60, %s3119_s16  ;;  %v758_v59 = vstv %s3295_s9  ;;  %s2878_s9 = sld [smem:[#allocation8 + $0x48]] }
 0x125   :  { %v3233_v62 = vpop.permute.xlu0 %151 }
 0x126   :  { %4864 = vst [vmem:[#allocation16_spill] sm:$0xff] %v3233_v62 }
 0x127   :  { %579 = vrot.lane.b32.xlu1 %v574_v63, %s3119_s16  ;;  %591 = vrot.lane.b32.xlu0 %v587_v0, %s3119_s16  ;;  %v744_v63 = vmul.f32 %v742_v53, %v656_v27  ;;  %v759_v0 = vmul.f32 %v758_v59, %v755_v58  ;;  %v814_v27 = vstv %s2859_s15  ;;  %v882_v53 = vstv %s3343_s19  ;;  %s2882_s15 = sld [smem:[#allocation8 + $0x4c]]  ;;  %s2885_s19 = sld [smem:[#allocation8 + $0x4f]] }
 0x128   :  { %v815_v33 = vmul.f32 %v814_v27, %v755_v58 }
 0x129   :  { %v3237_v2 = vpop.permute.xlu1 %153  ;;  %v3239_v3 = vpop.permute.xlu0 %165 }
 0x12a   :  { %4865 = vst [vmem:[#allocation17_spill] sm:$0xff] %v3237_v2  ;;  %v1082_v2 = vstv %s2880_s13  ;;  %s2903_s13 = sld [smem:[#allocation8 + $0x61]] }
 0x12b   :  { %593 = vrot.lane.b32.xlu1 %v588_v4, %s3119_s16  ;;  %605 = vrot.lane.b32.xlu0 %v601_v5, %s3119_s16  ;;  %v772_v4 = vstv %s3303_s10  ;;  %s2879_s10 = sld [smem:[#allocation8 + $0x49]] }
 0x12c   :  { %v774_v16 = vmul.f32 %v772_v4, %v756_v1 }
 0x12d   :  { %v3243_v7 = vpop.permute.xlu1 %167  ;;  %v3245_v8 = vpop.permute.xlu0 %179 }
 0x12e   :  { %4866 = vst [vmem:[#allocation18_spill] sm:$0xff] %v3245_v8 }
 0x12f   :  { %607 = vrot.lane.b32.xlu1 %v602_v9, %s3119_s16  ;;  %619 = vrot.lane.b32.xlu0 %v615_v10, %s3119_s16  ;;  %v760_v9 = vmul.f32 %v758_v59, %v756_v1  ;;  %v773_v10 = vmul.f32 %v772_v4, %v755_v58  ;;  %v844_v59 = vmul.f32 %v842_v43, %v756_v1 }
 0x131   :  { %v3251_v12 = vpop.permute.xlu1 %181  ;;  %v3253_v13 = vpop.permute.xlu0 %195 }
 0x132   :  { %4867 = vst [vmem:[#allocation19_spill] sm:$0xff] %v3251_v12 }
 0x133   :  { %621 = vrot.lane.b32.xlu1 %v616_v14, %s3119_s16  ;;  %633 = vrot.lane.b32.xlu0 %v629_v15, %s3120_s21 }
 0x135   :  { %v3259_v17 = vpop.permute.xlu1 %197  ;;  %v3261_v18 = vpop.permute.xlu0 %209 }
 0x136   :  { %4868 = vst [vmem:[#allocation20_spill] sm:$0xff] %v3261_v18 }
 0x137   :  { %635 = vrot.lane.b32.xlu1 %v630_v19, %s3120_s21  ;;  %647 = vrot.lane.b32.xlu0 %v643_v20, %s3120_s21  ;;  %v787_v19 = vmul.f32 %v786_v11, %v755_v58  ;;  %v800_v20 = vstv %s2858_s14  ;;  %s2881_s14 = sld [smem:[#allocation8 + $0x4b]] }
 0x139   :  { %v3266_v23 = vpop.permute.xlu1 %211  ;;  %v3268_v24 = vpop.permute.xlu0 %223 }
 0x13a   :  { %4869 = vst [vmem:[#allocation21_spill] sm:$0xff] %v3266_v23  ;;  %v1068_v23 = vstv %s2879_s10  ;;  %s2902_s10 = sld [smem:[#allocation8 + $0x60]] }
 0x13b   :  { %649 = vrot.lane.b32.xlu1 %v644_v25, %s3120_s21  ;;  %663 = vrot.lane.b32.xlu0 %v659_v26, %s3121_s24  ;;  %v788_v25 = vmul.f32 %v786_v11, %v756_v1  ;;  %v801_v26 = vmul.f32 %v800_v20, %v755_v58  ;;  %v910_v11 = vstv %s3362_s22  ;;  %s2887_s22 = sld [smem:[#allocation8 + $0x51]] }
 0x13d   :  { %v3273_v29 = vpop.permute.xlu1 %225  ;;  %v3275_v30 = vpop.permute.xlu0 %237  ;;  %v1096_v62 = vstv %s2881_s14  ;;  %s2807_s14 = sld [smem:[#allocation8 + $0x1]] }
 0x13e   :  { %4870 = vst [vmem:[#allocation22_spill] sm:$0xff] %v3275_v30 }
 0x13f   :  { %665 = vrot.lane.b32.xlu1 %v660_v31, %s3121_s24  ;;  %677 = vrot.lane.b32.xlu0 %v673_v32, %s3121_s24  ;;  %v802_v32 = vmul.f32 %v800_v20, %v756_v1 }
 0x141   :  { %v3279_v34 = vpop.permute.xlu1 %239  ;;  %v3281_v35 = vpop.permute.xlu0 %251 }
 0x142   :  { %4871 = vst [vmem:[#allocation23_spill] sm:$0xff] %v3279_v34  ;;  %v1292_v34 = vld [vmem:[#allocation3 + $0xe] sm:$0xff] }
 0x143   :  { %679 = vrot.lane.b32.xlu1 %v674_v36, %s3121_s24  ;;  %691 = vrot.lane.b32.xlu0 %v687_v37, %s3122_s28  ;;  %v828_v36 = vstv %s2860_s17  ;;  %s3476_s17 = sld [smem:[#allocation8 + $0x4d]] }
 0x144   :  { %v830_v48 = vmul.f32 %v828_v36, %v756_v1 }
 0x145   :  { %v3285_v39 = vpop.permute.xlu1 %253  ;;  %v3287_v40 = vpop.permute.xlu0 %265 }
 0x146   :  { %4872 = vst [vmem:[#allocation24_spill] sm:$0xff] %v3287_v40 }
 0x147   :  { %693 = vrot.lane.b32.xlu1 %v688_v41, %s3122_s28  ;;  %705 = vrot.lane.b32.xlu0 %v701_v42, %s3122_s28  ;;  %v816_v41 = vmul.f32 %v814_v27, %v756_v1  ;;  %v829_v42 = vmul.f32 %v828_v36, %v755_v58  ;;  %v926_v27 = vstv %s3374_s23  ;;  %s2888_s23 = sld [smem:[#allocation8 + $0x52]] }
 0x149   :  { %v3291_v44 = vpop.permute.xlu1 %267  ;;  %v3293_v45 = vpop.permute.xlu0 %279 }
 0x14a   :  { %4873 = vst [vmem:[#allocation25_spill] sm:$0xff] %v3291_v44 }
 0x14b   :  { %707 = vrot.lane.b32.xlu1 %v702_v46, %s3122_s28  ;;  %719 = vrot.lane.b32.xlu0 %v715_v47, %s3122_s28 }
 0x14d   :  { %v3299_v49 = vpop.permute.xlu1 %281  ;;  %v3301_v50 = vpop.permute.xlu0 %295 }
 0x14e   :  { %4874 = vst [vmem:[#allocation26_spill] sm:$0xff] %v3301_v50 }
 0x14f   :  { %721 = vrot.lane.b32.xlu1 %v716_v51, %s3122_s28  ;;  %733 = vrot.lane.b32.xlu0 %v729_v52, %s3122_s28  ;;  %v843_v51 = vmul.f32 %v842_v43, %v755_v58  ;;  %v3359_v52 = vld [vmem:[#allocation3 + $0x1] sm:$0xff]  ;;  %v896_v58 = vstv %s3351_s20  ;;  %v940_v43 = vstv %s3385_s26  ;;  %s2886_s20 = sld [smem:[#allocation8 + $0x50]]  ;;  %s2889_s26 = sld [smem:[#allocation8 + $0x53]] }
 0x150   :  { %v897_v1 = vmul.f32 %v896_v58, %v3359_v52 }
 0x151   :  { %v3307_v54 = vpop.permute.xlu1 %297  ;;  %v3309_v55 = vpop.permute.xlu0 %309 }
 0x152   :  { %4875 = vst [vmem:[#allocation27_spill] sm:$0xff] %v3307_v54  ;;  %v1291_v54 = vld [vmem:[#allocation3 + $0x6] sm:$0xff] }
 0x153   :  { %735 = vrot.lane.b32.xlu1 %v730_v56, %s3122_s28  ;;  %747 = vrot.lane.b32.xlu0 %v743_v57, %s3123_s6 }
 0x155   :  { %v3314_v60 = vpop.permute.xlu1 %311  ;;  %v3316_v61 = vpop.permute.xlu0 %323 }
 0x156   :  { %4876 = vst [vmem:[#allocation28_spill] sm:$0xff] %v3316_v61  ;;  %v1040_v61 = vstv %s3436_s8  ;;  %s2900_s8 = sld [smem:[#allocation8 + $0x5e]] }
 0x157   :  { %749 = vrot.lane.b32.xlu1 %v744_v63, %s3123_s6  ;;  %763 = vrot.lane.b32.xlu0 %v759_v0, %s3124_s7  ;;  %v883_v63 = vmul.f32 %v882_v53, %v3359_v52  ;;  %v3371_v0 = vld [vmem:[#allocation3 + $0x9] sm:$0xff] }
 0x158   :  { %v898_v20 = vmul.f32 %v896_v58, %v3371_v0  ;;  %v912_v36 = vmul.f32 %v910_v11, %v3371_v0 }
 0x159   :  { %v3321_v5 = vpop.permute.xlu1 %325  ;;  %v3323_v6 = vpop.permute.xlu0 %337 }
 0x15a   :  { %4877 = vst [vmem:[#allocation29_spill] sm:$0xff] %v3321_v5  ;;  %v1026_v5 = vstv %s3428_s0  ;;  %s2899_s0 = sld [smem:[#allocation8 + $0x5d]] }
 0x15b   :  { %765 = vrot.lane.b32.xlu1 %v760_v9, %s3124_s7  ;;  %777 = vrot.lane.b32.xlu0 %v773_v10, %s3124_s7  ;;  %v884_v10 = vmul.f32 %v882_v53, %v3371_v0 }
 0x15d   :  { %v3327_v14 = vpop.permute.xlu1 %339  ;;  %v3329_v15 = vpop.permute.xlu0 %351 }
 0x15e   :  { %4878 = vst [vmem:[#allocation30_spill] sm:$0xff] %v3329_v15 }
 0x15f   :  { %779 = vrot.lane.b32.xlu1 %v774_v16, %s3124_s7  ;;  %791 = vrot.lane.b32.xlu0 %v787_v19, %s3124_s7 }
 0x160   :  { %v1322_v30 = vstv %s2899_s0  ;;  %s3876_s0 = sld [smem:[#allocation8 + $0x7]] }
 0x161   :  { %v3333_v21 = vpop.permute.xlu1 %353  ;;  %v3335_v22 = vpop.permute.xlu0 %365 }
 0x162   :  { %4879 = vst [vmem:[#allocation31_spill] sm:$0xff] %v3333_v21  ;;  %v3540_v21 = vld [vmem:[#allocation3 + $0x5] sm:$0xff] }
 0x163   :  { %793 = vrot.lane.b32.xlu1 %v788_v25, %s3124_s7  ;;  %805 = vrot.lane.b32.xlu0 %v801_v26, %s3125_s12  ;;  %v911_v25 = vmul.f32 %v910_v11, %v3359_v52  ;;  %v923_v26 = vld [vmem:[#allocation3 + $0x2] sm:$0xff]  ;;  %4907 = vst [vmem:[#allocation59_spill] sm:$0xff] %v3540_v21 }
 0x165   :  { %v3339_v28 = vpop.permute.xlu1 %367  ;;  %v3341_v31 = vpop.permute.xlu0 %379 }
 0x166   :  { %4880 = vst [vmem:[#allocation32_spill] sm:$0xff] %v3341_v31 }
 0x167   :  { %807 = vrot.lane.b32.xlu1 %v802_v32, %s3125_s12  ;;  %819 = vrot.lane.b32.xlu0 %v815_v33, %s3125_s12 }
 0x169   :  { %v3347_v37 = vpop.permute.xlu1 %381  ;;  %v3349_v38 = vpop.permute.xlu0 %395 }
 0x16a   :  { %4881 = vst [vmem:[#allocation33_spill] sm:$0xff] %v3347_v37 }
 0x16b   :  { %821 = vrot.lane.b32.xlu1 %v816_v41, %s3125_s12  ;;  %833 = vrot.lane.b32.xlu0 %v829_v42, %s3125_s12  ;;  %v927_v41 = vmul.f32 %v926_v27, %v923_v26  ;;  %v924_v42 = vld [vmem:[#allocation3 + $0xa] sm:$0xff] }
 0x16c   :  { %v928_v53 = vmul.f32 %v926_v27, %v924_v42 }
 0x16d   :  { %v3355_v46 = vpop.permute.xlu1 %397  ;;  %v3357_v47 = vpop.permute.xlu0 %409 }
 0x16e   :  { %4882 = vst [vmem:[#allocation34_spill] sm:$0xff] %v3357_v47 }
 0x16f   :  { %835 = vrot.lane.b32.xlu1 %v830_v48, %s3125_s12  ;;  %847 = vrot.lane.b32.xlu0 %v843_v51, %s3125_s12 }
 0x171   :  { %v3366_v56 = vpop.permute.xlu1 %411  ;;  %v3368_v57 = vpop.permute.xlu0 %423 }
 0x172   :  { %4883 = vst [vmem:[#allocation35_spill] sm:$0xff] %v3366_v56  ;;  %v1182_v56 = vstv %s2887_s22  ;;  %s3797_s22 = sld [smem:[#allocation8 + $0x55]] }
 0x173   :  { %849 = vrot.lane.b32.xlu1 %v844_v59, %s3125_s12  ;;  %887 = vrot.lane.b32.xlu0 %v883_v63, %s3118_s11  ;;  %v941_v59 = vmul.f32 %v940_v43, %v923_v26  ;;  %v954_v63 = vstv %s2871_s27  ;;  %s3524_s27 = sld [smem:[#allocation8 + $0x58]] }
 0x174   :  { %v955_v11 = vmul.f32 %v954_v63, %v923_v26 }
 0x175   :  { %v3378_v4 = vpop.permute.xlu1 %425  ;;  %v3380_v9 = vpop.permute.xlu0 %437 }
 0x176   :  { %4884 = vst [vmem:[#allocation36_spill] sm:$0xff] %v3380_v9  ;;  %v1023_v9 = vld [vmem:[#allocation3 + $0x3] sm:$0xff] }
 0x177   :  { %889 = vrot.lane.b32.xlu1 %v884_v10, %s3118_s11  ;;  %901 = vrot.lane.b32.xlu0 %v897_v1, %s3118_s11  ;;  %v942_v1 = vmul.f32 %v940_v43, %v924_v42  ;;  %v1027_v44 = vmul.f32 %v1026_v5, %v1023_v9 }
 0x179   :  { %v3389_v16 = vpop.permute.xlu1 %439  ;;  %v3391_v19 = vpop.permute.xlu0 %451 }
 0x17a   :  { %4885 = vst [vmem:[#allocation37_spill] sm:$0xff] %v3389_v16  ;;  %v996_v16 = vstv %s2874_s4  ;;  %s3555_s4 = sld [smem:[#allocation8 + $0x5b]] }
 0x17b   :  { %903 = vrot.lane.b32.xlu1 %v898_v20, %s3118_s11  ;;  %915 = vrot.lane.b32.xlu0 %v911_v25, %s3118_s11  ;;  %v968_v20 = vstv %s2872_s29  ;;  %s3532_s29 = sld [smem:[#allocation8 + $0x59]] }
 0x17d   :  { %v3398_v32 = vpop.permute.xlu1 %453  ;;  %v3400_v33 = vpop.permute.xlu0 %465 }
 0x17e   :  { %4886 = vst [vmem:[#allocation38_spill] sm:$0xff] %v3400_v33  ;;  %v1196_v33 = vstv %s2888_s23  ;;  %s3811_s23 = sld [smem:[#allocation8 + $0x57]] }
 0x17f   :  { %917 = vrot.lane.b32.xlu1 %v912_v36, %s3118_s11  ;;  %931 = vrot.lane.b32.xlu0 %v927_v41, %s3117_s2  ;;  %v956_v36 = vmul.f32 %v954_v63, %v924_v42  ;;  %v969_v41 = vmul.f32 %v968_v20, %v923_v26 }
 0x181   :  { %v3406_v48 = vpop.permute.xlu1 %467  ;;  %v3408_v51 = vpop.permute.xlu0 %479 }
 0x182   :  { %4887 = vst [vmem:[#allocation39_spill] sm:$0xff] %v3406_v48  ;;  %v1168_v48 = vstv %s2886_s20  ;;  %s3763_s20 = sld [smem:[#allocation8 + $0x3b]] }
 0x183   :  { %933 = vrot.lane.b32.xlu1 %v928_v53, %s3117_s2  ;;  %945 = vrot.lane.b32.xlu0 %v941_v59, %s3119_s16  ;;  %v982_v53 = vstv %s2873_s30  ;;  %s3543_s30 = sld [smem:[#allocation8 + $0x5a]] }
 0x185   :  { %v3412_v58 = vpop.permute.xlu1 %481  ;;  %v3414_v10 = vpop.permute.xlu0 %519 }
 0x186   :  { %4888 = vst [vmem:[#allocation40_spill] sm:$0xff] %v3414_v10  ;;  %v970_v10 = vmul.f32 %v968_v20, %v924_v42 }
 0x187   :  { %947 = vrot.lane.b32.xlu1 %v942_v1, %s3119_s16  ;;  %959 = vrot.lane.b32.xlu0 %v955_v11, %s3119_s16  ;;  %v983_v1 = vmul.f32 %v982_v53, %v923_v26 }
 0x189   :  { %v3418_v25 = vpop.permute.xlu1 %521  ;;  %v3420_v27 = vpop.permute.xlu0 %533 }
 0x18a   :  { %4889 = vst [vmem:[#allocation41_spill] sm:$0xff] %v3418_v25  ;;  %v1010_v25 = vstv %s2875_s5  ;;  %s3566_s5 = sld [smem:[#allocation8 + $0x5c]] }
 0x18b   :  { %961 = vrot.lane.b32.xlu1 %v956_v36, %s3119_s16  ;;  %973 = vrot.lane.b32.xlu0 %v969_v41, %s3119_s16  ;;  %v984_v36 = vmul.f32 %v982_v53, %v924_v42  ;;  %v997_v41 = vmul.f32 %v996_v16, %v923_v26 }
 0x18d   :  { %v3424_v43 = vpop.permute.xlu1 %535  ;;  %v3426_v59 = vpop.permute.xlu0 %547 }
 0x18e   :  { %4890 = vst [vmem:[#allocation42_spill] sm:$0xff] %v3426_v59  ;;  %v1140_v59 = vstv %s3484_s18  ;;  %s3708_s18 = sld [smem:[#allocation8 + $0x1f]] }
 0x18f   :  { %975 = vrot.lane.b32.xlu1 %v970_v10, %s3119_s16  ;;  %987 = vrot.lane.b32.xlu0 %v983_v1, %s3119_s16  ;;  %v998_v10 = vmul.f32 %v996_v16, %v924_v42  ;;  %v1011_v1 = vmul.f32 %v1010_v25, %v923_v26 }
 0x190   :  { %v1308_v50 = vstv %s3566_s5  ;;  %s3869_s5 = sld [smem:[#allocation8 + $0x6]] }
 0x191   :  { %v3432_v63 = vpop.permute.xlu1 %549  ;;  %v3434_v11 = vpop.permute.xlu0 %563  ;;  %v1310_v8 = vmul.f32 %v1308_v50, %v1292_v34 }
 0x192   :  { %4891 = vst [vmem:[#allocation43_spill] sm:$0xff] %v3432_v63  ;;  %v1126_v63 = vstv %s3476_s17  ;;  %s3692_s17 = sld [smem:[#allocation8 + $0x1d]] }
 0x193   :  { %989 = vrot.lane.b32.xlu1 %v984_v36, %s3119_s16  ;;  %1001 = vrot.lane.b32.xlu0 %v997_v41, %s3120_s21  ;;  %v1012_v36 = vmul.f32 %v1010_v25, %v924_v42  ;;  %v1024_v41 = vld [vmem:[#allocation3 + $0xb] sm:$0xff] }
 0x194   :  { %v1070_v18 = vmul.f32 %v1068_v23, %v1024_v41 }
 0x195   :  { %v3440_v20 = vpop.permute.xlu1 %565  ;;  %v3442_v37 = vpop.permute.xlu0 %577 }
 0x196   :  { %4892 = vst [vmem:[#allocation44_spill] sm:$0xff] %v3442_v37  ;;  %v1041_v37 = vmul.f32 %v1040_v61, %v1023_v9 }
 0x197   :  { %1003 = vrot.lane.b32.xlu1 %v998_v10, %s3120_s21  ;;  %1015 = vrot.lane.b32.xlu0 %v1011_v1, %s3120_s21  ;;  %v1028_v10 = vmul.f32 %v1026_v5, %v1024_v41  ;;  %v1054_v1 = vstv %s2878_s9  ;;  %s2901_s9 = sld [smem:[#allocation8 + $0x5f]] }
 0x198   :  { %v1056_v40 = vmul.f32 %v1054_v1, %v1024_v41 }
 0x199   :  { %v3447_v53 = vpop.permute.xlu1 %579  ;;  %v3449_v31 = vpop.permute.xlu0 %591 }
 0x19a   :  { %4893 = vst [vmem:[#allocation45_spill] sm:$0xff] %v3447_v53  ;;  %v1042_v53 = vmul.f32 %v1040_v61, %v1024_v41 }
 0x19b   :  { %1017 = vrot.lane.b32.xlu1 %v1012_v36, %s3120_s21  ;;  %1031 = vrot.lane.b32.xlu0 %v1027_v44, %s3121_s24  ;;  %v1055_v36 = vmul.f32 %v1054_v1, %v1023_v9 }
 0x19d   :  { %v3454_v16 = vpop.permute.xlu1 %593  ;;  %v3456_v26 = vpop.permute.xlu0 %605 }
 0x19e   :  { %4894 = vst [vmem:[#allocation46_spill] sm:$0xff] %v3456_v26 }
 0x19f   :  { %1033 = vrot.lane.b32.xlu1 %v1028_v10, %s3121_s24  ;;  %1045 = vrot.lane.b32.xlu0 %v1041_v37, %s3121_s24  ;;  %v1069_v10 = vmul.f32 %v1068_v23, %v1023_v9 }
 0x1a1   :  { %v3460_v42 = vpop.permute.xlu1 %607  ;;  %v3462_v25 = vpop.permute.xlu0 %619 }
 0x1a2   :  { %4895 = vst [vmem:[#allocation47_spill] sm:$0xff] %v3460_v42  ;;  %v1123_v42 = vld [vmem:[#allocation3 + $0x4] sm:$0xff] }
 0x1a3   :  { %1047 = vrot.lane.b32.xlu1 %v1042_v53, %s3121_s24  ;;  %1059 = vrot.lane.b32.xlu0 %v1055_v36, %s3122_s28  ;;  %v1083_v53 = vmul.f32 %v1082_v2, %v1023_v9  ;;  %v1127_v26 = vmul.f32 %v1126_v63, %v1123_v42 }
 0x1a5   :  { %v3466_v44 = vpop.permute.xlu1 %621  ;;  %v3468_v5 = vpop.permute.xlu0 %633 }
 0x1a6   :  { %4896 = vst [vmem:[#allocation48_spill] sm:$0xff] %v3468_v5  ;;  %v1110_v5 = vstv %s2882_s15  ;;  %s2809_s15 = sld [smem:[#allocation8 + $0x3]] }
 0x1a7   :  { %1061 = vrot.lane.b32.xlu1 %v1056_v40, %s3122_s28  ;;  %1073 = vrot.lane.b32.xlu0 %v1069_v10, %s3122_s28  ;;  %v1084_v40 = vmul.f32 %v1082_v2, %v1024_v41  ;;  %v1097_v10 = vmul.f32 %v1096_v62, %v1023_v9 }
 0x1a9   :  { %v3472_v61 = vpop.permute.xlu1 %635  ;;  %v3474_v37 = vpop.permute.xlu0 %647 }
 0x1aa   :  { %4897 = vst [vmem:[#allocation49_spill] sm:$0xff] %v3472_v61 }
 0x1ab   :  { %1075 = vrot.lane.b32.xlu1 %v1070_v18, %s3122_s28  ;;  %1087 = vrot.lane.b32.xlu0 %v1083_v53, %s3122_s28  ;;  %v1098_v18 = vmul.f32 %v1096_v62, %v1024_v41  ;;  %v1111_v53 = vmul.f32 %v1110_v5, %v1023_v9 }
 0x1ad   :  { %v3480_v1 = vpop.permute.xlu1 %649  ;;  %v3482_v36 = vpop.permute.xlu0 %663 }
 0x1ae   :  { %4898 = vst [vmem:[#allocation50_spill] sm:$0xff] %v3482_v36 }
 0x1af   :  { %1089 = vrot.lane.b32.xlu1 %v1084_v40, %s3122_s28  ;;  %1101 = vrot.lane.b32.xlu0 %v1097_v10, %s3122_s28  ;;  %v1112_v40 = vmul.f32 %v1110_v5, %v1024_v41  ;;  %v1124_v10 = vld [vmem:[#allocation3 + $0xc] sm:$0xff] }
 0x1b1   :  { %v3488_v23 = vpop.permute.xlu1 %665  ;;  %v3490_v61 = vpop.permute.xlu0 %677 }
 0x1b2   :  { %4899 = vst [vmem:[#allocation51_spill] sm:$0xff] %v3488_v23  ;;  %v1141_v23 = vmul.f32 %v1140_v59, %v1123_v42 }
 0x1b3   :  { %1103 = vrot.lane.b32.xlu1 %v1098_v18, %s3122_s28  ;;  %1115 = vrot.lane.b32.xlu0 %v1111_v53, %s3123_s6  ;;  %v1128_v18 = vmul.f32 %v1126_v63, %v1124_v10  ;;  %v1154_v53 = vstv %s2885_s19  ;;  %s3747_s19 = sld [smem:[#allocation8 + $0x39]] }
 0x1b5   :  { %v3495_v2 = vpop.permute.xlu1 %679  ;;  %v3497_v36 = vpop.permute.xlu0 %691 }
 0x1b6   :  { %4900 = vst [vmem:[#allocation52_spill] sm:$0xff] %v3497_v36  ;;  %v1142_v36 = vmul.f32 %v1140_v59, %v1124_v10 }
 0x1b7   :  { %1117 = vrot.lane.b32.xlu1 %v1112_v40, %s3123_s6  ;;  %1131 = vrot.lane.b32.xlu0 %v1127_v26, %s3124_s7  ;;  %v1155_v40 = vmul.f32 %v1154_v53, %v1123_v42 }
 0x1b9   :  { %v3502_v62 = vpop.permute.xlu1 %693  ;;  %v3504_v9 = vpop.permute.xlu0 %705 }
 0x1ba   :  { %4901 = vst [vmem:[#allocation53_spill] sm:$0xff] %v3502_v62  ;;  %v1156_v62 = vmul.f32 %v1154_v53, %v1124_v10 }
 0x1bb   :  { %1133 = vrot.lane.b32.xlu1 %v1128_v18, %s3124_s7  ;;  %1145 = vrot.lane.b32.xlu0 %v1141_v23, %s3124_s7  ;;  %v1169_v18 = vmul.f32 %v1168_v48, %v1123_v42 }
 0x1bd   :  { %v3508_v41 = vpop.permute.xlu1 %707  ;;  %v3510_v5 = vpop.permute.xlu0 %719 }
 0x1be   :  { %4902 = vst [vmem:[#allocation54_spill] sm:$0xff] %v3510_v5  ;;  %v1170_v5 = vmul.f32 %v1168_v48, %v1124_v10 }
 0x1bf   :  { %1147 = vrot.lane.b32.xlu1 %v1142_v36, %s3124_s7  ;;  %1159 = vrot.lane.b32.xlu0 %v1155_v40, %s3124_s7  ;;  %v1183_v36 = vmul.f32 %v1182_v56, %v1123_v42 }
 0x1c1   :  { %v3514_v63 = vpop.permute.xlu1 %721  ;;  %v3516_v26 = vpop.permute.xlu0 %733 }
 0x1c2   :  { %4903 = vst [vmem:[#allocation55_spill] sm:$0xff] %v3514_v63  ;;  %v1210_v63 = vstv %s2889_s26  ;;  %s2907_s26 = sld [smem:[#allocation8 + $0x4]] }
 0x1c3   :  { %1161 = vrot.lane.b32.xlu1 %v1156_v62, %s3124_s7  ;;  %1173 = vrot.lane.b32.xlu0 %v1169_v18, %s3125_s12  ;;  %v1184_v62 = vmul.f32 %v1182_v56, %v1124_v10  ;;  %v1197_v18 = vmul.f32 %v1196_v33, %v1123_v42 }
 0x1c5   :  { %v3520_v59 = vpop.permute.xlu1 %735  ;;  %v3522_v23 = vpop.permute.xlu0 %747 }
 0x1c6   :  { %4904 = vst [vmem:[#allocation56_spill] sm:$0xff] %v3522_v23 }
 0x1c7   :  { %1175 = vrot.lane.b32.xlu1 %v1170_v5, %s3125_s12  ;;  %1187 = vrot.lane.b32.xlu0 %v1183_v36, %s3125_s12  ;;  %v1198_v5 = vmul.f32 %v1196_v33, %v1124_v10  ;;  %v1211_v36 = vmul.f32 %v1210_v63, %v1123_v42  ;;  %v1264_v33 = vstv %s3532_s29  ;;  %s2808_s29 = sld [smem:[#allocation8 + $0x2]] }
 0x1c9   :  { %v3528_v53 = vpop.permute.xlu1 %749  ;;  %v3530_v40 = vpop.permute.xlu0 %763 }
 0x1ca   :  { %4905 = vst [vmem:[#allocation57_spill] sm:$0xff] %v3528_v53  ;;  %v1250_v53 = vstv %s3524_s27  ;;  %s2806_s27 = sld [smem:[#allocation9 + $0x3]] }
 0x1cb   :  { %1189 = vrot.lane.b32.xlu1 %v1184_v62, %s3125_s12  ;;  %1201 = vrot.lane.b32.xlu0 %v1197_v18, %s3125_s12  ;;  %v1212_v18 = vmul.f32 %v1210_v63, %v1124_v10  ;;  %v1251_v47 = vmul.f32 %v1250_v53, %v3540_v21  ;;  %v1265_v10 = vmul.f32 %v1264_v33, %v3540_v21  ;;  %v1278_v63 = vstv %s3543_s30  ;;  %s3865_s30 = sld [smem:[#allocation8 + $0x5]] }
 0x1cd   :  { %v3536_v48 = vpop.permute.xlu1 %765  ;;  %v3538_v23 = vpop.permute.xlu0 %777 }
 0x1ce   :  { %4906 = vst [vmem:[#allocation58_spill] sm:$0xff] %v3538_v23  ;;  %v3552_v23 = vld [vmem:[#allocation3 + $0xd] sm:$0xff] }
 0x1cf   :  { %1203 = vrot.lane.b32.xlu1 %v1198_v5, %s3125_s12  ;;  %1215 = vrot.lane.b32.xlu0 %v1211_v36, %s3125_s12  ;;  %4909 = vst [vmem:[#allocation61_spill] sm:$0xff] %v3552_v23  ;;  %v1252_v36 = vmul.f32 %v1250_v53, %v3552_v23  ;;  %v1294_v53 = vstv %s3555_s4 }
 0x1d0   :  { %s66_s4 = sadd.f32 1e-05, %s2806_s27  ;;  %s2921_s27 = sld [smem:[#allocation8 + $0x12]] }
 0x1d1   :  { %v3547_v56 = vpop.permute.xlu1 %779  ;;  %v3549_v62 = vpop.permute.xlu0 %791 }
 0x1d2   :  { %4908 = vst [vmem:[#allocation60_spill] sm:$0xff] %v3547_v56 }
 0x1d3   :  { %1217 = vrot.lane.b32.xlu1 %v1212_v18, %s3125_s12  ;;  %1255 = vrot.lane.b32.xlu0 %v1251_v47, %s3118_s11  ;;  %v1266_v47 = vmul.f32 %v1264_v33, %v3552_v23 }
 0x1d5   :  { %v3559_v42 = vpop.permute.xlu1 %793  ;;  %v3561_v5 = vpop.permute.xlu0 %805 }
 0x1d6   :  { %4910 = vst [vmem:[#allocation62_spill] sm:$0xff] %v3559_v42  ;;  %4911 = vst [vmem:[#allocation63_spill] sm:$0xff] %v3561_v5  ;;  %v1279_v5 = vmul.f32 %v1278_v63, %v3540_v21  ;;  %v1350_v21 = vstv %s2901_s9  ;;  %s3888_s9 = sld [smem:[#allocation8 + $0x8]] }
 0x1d7   :  { %1257 = vrot.lane.b32.xlu1 %v1252_v36, %s3118_s11  ;;  %1269 = vrot.lane.b32.xlu0 %v1265_v10, %s3118_s11  ;;  %v1280_v10 = vmul.f32 %v1278_v63, %v3552_v23  ;;  %v1336_v23 = vstv %s2900_s8  ;;  %s3885_s8 = sld [smem:[#allocation8 + $0x1e]] }
 0x1d9   :  { %v3570_v56 = vpop.permute.xlu1 %807  ;;  %v3572_v18 = vpop.permute.xlu0 %819 }
 0x1da   :  { %4912 = vst [vmem:[#allocation64_spill] sm:$0xff] %v3570_v56  ;;  %v1295_v56 = vmul.f32 %v1294_v53, %v1291_v54 }
 0x1db   :  { %1271 = vrot.lane.b32.xlu1 %v1266_v47, %s3118_s11  ;;  %1283 = vrot.lane.b32.xlu0 %v1279_v5, %s3118_s11  ;;  %v1296_v47 = vmul.f32 %v1294_v53, %v1292_v34  ;;  %v1309_v5 = vmul.f32 %v1308_v50, %v1291_v54 }
 0x1dd   :  { %v3579_v15 = vpop.permute.xlu1 %821  ;;  %v3581_v36 = vpop.permute.xlu0 %833 }
 0x1de   :  { %4913 = vst [vmem:[#allocation65_spill] sm:$0xff] %v3581_v36 }
 0x1df   :  { %1285 = vrot.lane.b32.xlu1 %v1280_v10, %s3118_s11  ;;  %1299 = vrot.lane.b32.xlu0 %v1295_v56, %s3117_s2  ;;  %v1323_v10 = vmul.f32 %v1322_v30, %v1291_v54 }
 0x1e1   :  { %v3587_v33 = vpop.permute.xlu1 %835  ;;  %v3589_v12 = vpop.permute.xlu0 %847 }
 0x1e2   :  { %4914 = vst [vmem:[#allocation66_spill] sm:$0xff] %v3587_v33  ;;  %v1324_v33 = vmul.f32 %v1322_v30, %v1292_v34 }
 0x1e3   :  { %1301 = vrot.lane.b32.xlu1 %v1296_v47, %s3117_s2  ;;  %1313 = vrot.lane.b32.xlu0 %v1309_v5, %s3119_s16  ;;  %v1337_v47 = vmul.f32 %v1336_v23, %v1291_v54 }
 0x1e5   :  { %v3593_v63 = vpop.permute.xlu1 %849  ;;  %v3595_v36 = vpop.permute.xlu0 %887 }
 0x1e6   :  { %4915 = vst [vmem:[#allocation67_spill] sm:$0xff] %v3593_v63  ;;  %4916 = vst [vmem:[#allocation68_spill] sm:$0xff] %v3595_v36  ;;  %v1338_v36 = vmul.f32 %v1336_v23, %v1292_v34  ;;  %v1364_v63 = vstv %s2902_s10  ;;  %s3901_s10 = sld [smem:[#allocation8 + $0x9]] }
 0x1e7   :  { %1315 = vrot.lane.b32.xlu1 %v1310_v8, %s3119_s16  ;;  %1327 = vrot.lane.b32.xlu0 %v1323_v10, %s3119_s16  ;;  %v1351_v8 = vmul.f32 %v1350_v21, %v1291_v54  ;;  %v1365_v42 = vmul.f32 %v1364_v63, %v1291_v54 }
 0x1e9   :  { %v3599_v56 = vpop.permute.xlu1 %889  ;;  %v3601_v53 = vpop.permute.xlu0 %901 }
 0x1ea   :  { %4917 = vst [vmem:[#allocation69_spill] sm:$0xff] %v3599_v56  ;;  %v1352_v56 = vmul.f32 %v1350_v21, %v1292_v34 }
 0x1eb   :  { %1329 = vrot.lane.b32.xlu1 %v1324_v33, %s3119_s16  ;;  %1341 = vrot.lane.b32.xlu0 %v1337_v47, %s3119_s16  ;;  %v1378_v33 = vstv %s2903_s13  ;;  %s3915_s13 = sld [smem:[#allocation8 + $0xa]] }
 0x1ec   :  { %v1380_v21 = vmul.f32 %v1378_v33, %v1292_v34 }
 0x1ed   :  { %v3605_v50 = vpop.permute.xlu1 %903  ;;  %v3607_v5 = vpop.permute.xlu0 %915 }
 0x1ee   :  { %4918 = vst [vmem:[#allocation70_spill] sm:$0xff] %v3605_v50  ;;  %4919 = vst [vmem:[#allocation71_spill] sm:$0xff] %v3607_v5  ;;  %v1366_v5 = vmul.f32 %v1364_v63, %v1292_v34  ;;  %v1379_v50 = vmul.f32 %v1378_v33, %v1291_v54 }
 0x1ef   :  { %1343 = vrot.lane.b32.xlu1 %v1338_v36, %s3119_s16  ;;  %1355 = vrot.lane.b32.xlu0 %v1351_v8, %s3119_s16 }
 0x1f1   :  { %v3611_v10 = vpop.permute.xlu1 %917  ;;  %v3613_v30 = vpop.permute.xlu0 %931 }
 0x1f2   :  { %4920 = vst [vmem:[#allocation72_spill] sm:$0xff] %v3611_v10  ;;  %4921 = vst [vmem:[#allocation73_spill] sm:$0xff] %v3613_v30 }
 0x1f3   :  { %1357 = vrot.lane.b32.xlu1 %v1352_v56, %s3119_s16  ;;  %1369 = vrot.lane.b32.xlu0 %v1365_v42, %s3120_s21 }
 0x1f5   :  { %v3617_v47 = vpop.permute.xlu1 %933  ;;  %v3619_v23 = vpop.permute.xlu0 %945 }
 0x1f6   :  { %4922 = vst [vmem:[#allocation74_spill] sm:$0xff] %v3617_v47  ;;  %4923 = vst [vmem:[#allocation75_spill] sm:$0xff] %v3619_v23 }
 0x1f7   :  { %1371 = vrot.lane.b32.xlu1 %v1366_v5, %s3120_s21  ;;  %1383 = vrot.lane.b32.xlu0 %v1379_v50, %s3120_s21 }
 0x1f9   :  { %v3623_v36 = vpop.permute.xlu1 %947  ;;  %v3625_v8 = vpop.permute.xlu0 %959 }
 0x1fa   :  { %4924 = vst [vmem:[#allocation76_spill] sm:$0xff] %v3623_v36 }
 0x1fb   :  { %1385 = vrot.lane.b32.xlu1 %v1380_v21, %s3120_s21 }
 0x1fd   :  { %v3628_v56 = vpop.permute.xlu1 %961  ;;  %v3630_v42 = vpop.permute.xlu0 %973 }
 0x1fe   :  { %4925 = vst [vmem:[#allocation77_spill] sm:$0xff] %v3628_v56  ;;  %4926 = vst [vmem:[#allocation78_spill] sm:$0xff] %v3630_v42 }
 0x201   :  { %v3632_v10 = vpop.permute.xlu1 %975  ;;  %v3634_v23 = vpop.permute.xlu0 %987 }
 0x202   :  { %4927 = vst [vmem:[#allocation79_spill] sm:$0xff] %v3632_v10  ;;  %4928 = vst [vmem:[#allocation80_spill] sm:$0xff] %v3634_v23 }
 0x205   :  { %v3636_v54 = vpop.permute.xlu1 %989  ;;  %v3638_v63 = vpop.permute.xlu0 %1001 }
 0x206   :  { %4929 = vst [vmem:[#allocation81_spill] sm:$0xff] %v3636_v54  ;;  %4930 = vst [vmem:[#allocation82_spill] sm:$0xff] %v3638_v63 }
 0x209   :  { %v3640_v50 = vpop.permute.xlu1 %1003  ;;  %v3642_v5 = vpop.permute.xlu0 %1015 }
 0x20a   :  { %4931 = vst [vmem:[#allocation83_spill] sm:$0xff] %v3640_v50  ;;  %4932 = vst [vmem:[#allocation84_spill] sm:$0xff] %v3642_v5 }
 0x20d   :  { %v3644_v36 = vpop.permute.xlu1 %1017  ;;  %v3646_v34 = vpop.permute.xlu0 %1031 }
 0x20e   :  { %4933 = vst [vmem:[#allocation85_spill] sm:$0xff] %v3644_v36  ;;  %4934 = vst [vmem:[#allocation86_spill] sm:$0xff] %v3646_v34 }
 0x211   :  { %v3648_v33 = vpop.permute.xlu1 %1033  ;;  %v3650_v21 = vpop.permute.xlu0 %1045 }
 0x212   :  { %4935 = vst [vmem:[#allocation87_spill] sm:$0xff] %v3648_v33  ;;  %4936 = vst [vmem:[#allocation88_spill] sm:$0xff] %v3650_v21 }
 0x215   :  { %v3652_v42 = vpop.permute.xlu1 %1047  ;;  %v3654_v10 = vpop.permute.xlu0 %1059 }
 0x216   :  { %4937 = vst [vmem:[#allocation89_spill] sm:$0xff] %v3652_v42  ;;  %4938 = vst [vmem:[#allocation90_spill] sm:$0xff] %v3654_v10 }
 0x219   :  { %v3656_v47 = vpop.permute.xlu1 %1061  ;;  %v3658_v54 = vpop.permute.xlu0 %1073 }
 0x21a   :  { %4939 = vst [vmem:[#allocation91_spill] sm:$0xff] %v3656_v47  ;;  %4940 = vst [vmem:[#allocation92_spill] sm:$0xff] %v3658_v54 }
 0x21d   :  { %v3660_v63 = vpop.permute.xlu1 %1075  ;;  %v3662_v50 = vpop.permute.xlu0 %1087 }
 0x21e   :  { %4941 = vst [vmem:[#allocation93_spill] sm:$0xff] %v3660_v63  ;;  %4942 = vst [vmem:[#allocation94_spill] sm:$0xff] %v3662_v50  ;;  %v128_v63 = vstv %s2807_s14  ;;  %s3926_s14 = sld [smem:[#allocation8 + $0xb]] }
 0x221   :  { %v3664_v23 = vpop.permute.xlu1 %1089  ;;  %v3666_v36 = vpop.permute.xlu0 %1101 }
 0x222   :  { %4943 = vst [vmem:[#allocation95_spill] sm:$0xff] %v3664_v23  ;;  %4944 = vst [vmem:[#allocation96_spill] sm:$0xff] %v3666_v36  ;;  %v3684_v36 = vld [vmem:[#allocation2] sm:$0xff] }
 0x225   :  { %v3668_v34 = vpop.permute.xlu1 %1103  ;;  %v3670_v33 = vpop.permute.xlu0 %1115 }
 0x226   :  { %4945 = vst [vmem:[#allocation97_spill] sm:$0xff] %v3668_v34  ;;  %4946 = vst [vmem:[#allocation98_spill] sm:$0xff] %v3670_v33  ;;  %v129_v34 = vmul.f32 %v3684_v36, %v128_v63 }
 0x229   :  { %v3672_v42 = vpop.permute.xlu1 %1117  ;;  %v3674_v10 = vpop.permute.xlu0 %1131 }
 0x22a   :  { %4947 = vst [vmem:[#allocation99_spill] sm:$0xff] %v3672_v42  ;;  %4948 = vst [vmem:[#allocation100_spill] sm:$0xff] %v3674_v10  ;;  %v171_v42 = vadd.f32 %v3239_v3, %v129_v34  ;;  %v140_v10 = vstv %s2809_s15  ;;  %s3935_s15 = sld [smem:[#allocation8 + $0x3a]] }
 0x22d   :  { %v3676_v47 = vpop.permute.xlu1 %1133  ;;  %v3678_v21 = vpop.permute.xlu0 %1145 }
 0x22e   :  { %4949 = vst [vmem:[#allocation101_spill] sm:$0xff] %v3676_v47  ;;  %4950 = vst [vmem:[#allocation102_spill] sm:$0xff] %v3678_v21  ;;  %v3694_v21 = vld [vmem:[#allocation2 + $0x8] sm:$0xff] }
 0x22f   :  { %v130_v47 = vmul.f32 %v3694_v21, %v128_v63  ;;  %v142_v63 = vmul.f32 %v3694_v21, %v140_v10 }
 0x231   :  { %v3680_v50 = vpop.permute.xlu1 %1147  ;;  %v3682_v23 = vpop.permute.xlu0 %1159 }
 0x232   :  { %4951 = vst [vmem:[#allocation103_spill] sm:$0xff] %v3680_v50  ;;  %4952 = vst [vmem:[#allocation104_spill] sm:$0xff] %v3682_v23  ;;  %v229_v50 = vadd.f32 %v3268_v24, %v171_v42 }
 0x234   :  { %v285_v3 = vadd.f32 %v3293_v45, %v229_v50  ;;  %v496_v50 = vstv %s3692_s17  ;;  %s3938_s17 = sld [smem:[#allocation8 + $0xc]] }
 0x235   :  { %v3687_v33 = vpop.permute.xlu1 %1161  ;;  %v3689_v54 = vpop.permute.xlu0 %1173 }
 0x236   :  { %4953 = vst [vmem:[#allocation105_spill] sm:$0xff] %v3687_v33  ;;  %4954 = vst [vmem:[#allocation106_spill] sm:$0xff] %v3689_v54  ;;  %v172_v33 = vadd.f32 %v3243_v7, %v130_v47  ;;  %v141_v54 = vmul.f32 %v3684_v36, %v140_v10  ;;  %v343_v5 = vadd.f32 %v3323_v6, %v285_v3  ;;  %v3730_v10 = vld [vmem:[#allocation2 + $0x4] sm:$0xff] }
 0x238   :  { %v201_v34 = vadd.f32 %v3253_v13, %v141_v54  ;;  %v230_v30 = vadd.f32 %v3273_v29, %v172_v33  ;;  %v401_v45 = vadd.f32 %v3349_v38, %v343_v5  ;;  %v202_v13 = vadd.f32 %v3259_v17, %v142_v63 }
 0x239   :  { %v3698_v23 = vpop.permute.xlu1 %1175  ;;  %v3700_v56 = vpop.permute.xlu0 %1187  ;;  %v497_v17 = vmul.f32 %v3730_v10, %v496_v50  ;;  %v508_v5 = vstv %s3708_s18  ;;  %s3948_s18 = sld [smem:[#allocation8 + $0xd]] }
 0x23a   :  { %v257_v7 = vadd.f32 %v3281_v35, %v201_v34  ;;  %v286_v47 = vadd.f32 %v3299_v49, %v230_v30  ;;  %v457_v54 = vadd.f32 %v3391_v19, %v401_v45  ;;  %v258_v35 = vadd.f32 %v3285_v39, %v202_v13 }
 0x23c   :  { %v315_v29 = vadd.f32 %v3309_v55, %v257_v7  ;;  %v344_v6 = vadd.f32 %v3327_v14, %v286_v47  ;;  %v316_v55 = vadd.f32 %v3314_v60, %v258_v35  ;;  %v499_v30 = vadd.f32 %v497_v17, %v457_v54  ;;  %v3744_v7 = vld [vmem:[#allocation2 + $0xc] sm:$0xff] }
 0x23d   :  { %v3710_v24 = vpop.permute.xlu1 %1189  ;;  %v3712_v42 = vpop.permute.xlu0 %1201  ;;  %v498_v60 = vmul.f32 %v3744_v7, %v496_v50  ;;  %v509_v47 = vmul.f32 %v3730_v10, %v508_v5 }
 0x23e   :  { %v371_v49 = vadd.f32 %v3335_v22, %v315_v29  ;;  %v402_v38 = vadd.f32 %v3355_v46, %v344_v6  ;;  %v372_v39 = vadd.f32 %v3339_v28, %v316_v55  ;;  %v539_v46 = vadd.f32 %v3420_v27, %v499_v30 }
 0x240   :  { %v429_v14 = vadd.f32 %v3368_v57, %v371_v49  ;;  %v458_v19 = vadd.f32 %v3398_v32, %v402_v38  ;;  %v430_v57 = vadd.f32 %v3378_v4, %v372_v39  ;;  %v597_v45 = vadd.f32 %v3449_v31, %v539_v46 }
 0x241   :  { %v3723_v33 = vpop.permute.xlu1 %1203  ;;  %v3725_v3 = vpop.permute.xlu0 %1215  ;;  %v510_v4 = vmul.f32 %v3744_v7, %v508_v5 }
 0x242   :  { %v485_v22 = vadd.f32 %v3408_v51, %v429_v14  ;;  %v500_v32 = vadd.f32 %v498_v60, %v458_v19  ;;  %v486_v51 = vadd.f32 %v3412_v58, %v430_v57  ;;  %v653_v50 = vadd.f32 %v3474_v37, %v597_v45  ;;  %v4956_v45 = vld [vmem:[#allocation67_spill] sm:$0xff] }
 0x244   :  { %v540_v27 = vadd.f32 %v3424_v43, %v500_v32  ;;  %v511_v29 = vadd.f32 %v509_v47, %v485_v22  ;;  %v711_v31 = vadd.f32 %v3504_v9, %v653_v50  ;;  %v512_v58 = vadd.f32 %v510_v4, %v486_v51  ;;  %v4959_v50 = vld [vmem:[#allocation73_spill] sm:$0xff] }
 0x245   :  { %v3737_v34 = vpop.permute.xlu1 %1217  ;;  %v3739_v63 = vpop.permute.xlu0 %1255 }
 0x246   :  { %v569_v6 = vadd.f32 %v3434_v11, %v511_v29  ;;  %v598_v54 = vadd.f32 %v3454_v16, %v540_v27  ;;  %v769_v37 = vadd.f32 %v3530_v40, %v711_v31  ;;  %v864_v11 = vstv %s3747_s19  ;;  %v4958_v27 = vld [vmem:[#allocation84_spill] sm:$0xff]  ;;  %s3960_s19 = sld [smem:[#allocation8 + $0xe]] }
 0x247   :  { %v570_v17 = vadd.f32 %v3440_v20, %v512_v58  ;;  %v865_v30 = vmul.f32 %v864_v11, %v3359_v52  ;;  %v866_v46 = vmul.f32 %v864_v11, %v3371_v0  ;;  %v4961_v58 = vld [vmem:[#allocation92_spill] sm:$0xff] }
 0x248   :  { %v625_v43 = vadd.f32 %v3462_v25, %v569_v6  ;;  %v654_v38 = vadd.f32 %v3480_v1, %v598_v54  ;;  %v825_v55 = vadd.f32 %v3572_v18, %v769_v37  ;;  %v876_v18 = vstv %s3763_s20  ;;  %v4960_v54 = vld [vmem:[#allocation77_spill] sm:$0xff]  ;;  %v4962_v11 = vld [vmem:[#allocation80_spill] sm:$0xff]  ;;  %s3971_s20 = sld [smem:[#allocation8 + $0xf]] }
 0x249   :  { %v3752_v13 = vpop.permute.xlu1 %1257  ;;  %v3754_v28 = vpop.permute.xlu0 %1269  ;;  %v626_v25 = vadd.f32 %v3466_v44, %v570_v17  ;;  %v878_v4 = vmul.f32 %v876_v18, %v3371_v0 }
 0x24a   :  { %v683_v16 = vadd.f32 %v3490_v61, %v625_v43  ;;  %v712_v9 = vadd.f32 %v3508_v41, %v654_v38  ;;  %v867_v5 = vadd.f32 %v865_v30, %v825_v55  ;;  %v4964_v55 = vld [vmem:[#allocation100_spill] sm:$0xff] }
 0x24b   :  { %v684_v20 = vadd.f32 %v3495_v2, %v626_v25  ;;  %v4955_v2 = vld [vmem:[#allocation62_spill] sm:$0xff] }
 0x24c   :  { %v739_v1 = vadd.f32 %v3516_v26, %v683_v16  ;;  %v770_v40 = vadd.f32 %v3536_v48, %v712_v9  ;;  %v907_v48 = vadd.f32 %v3601_v53, %v867_v5  ;;  %v4963_v16 = vld [vmem:[#allocation85_spill] sm:$0xff] }
 0x24d   :  { %v3765_v35 = vpop.permute.xlu1 %1271  ;;  %v3767_v49 = vpop.permute.xlu0 %1283  ;;  %v740_v44 = vadd.f32 %v3520_v59, %v684_v20  ;;  %v4966_v20 = vld [vmem:[#allocation88_spill] sm:$0xff] }
 0x24e   :  { %v797_v61 = vadd.f32 %v3549_v62, %v739_v1  ;;  %v826_v41 = vadd.f32 %v3579_v15, %v770_v40  ;;  %v877_v15 = vmul.f32 %v876_v18, %v3359_v52  ;;  %v965_v57 = vadd.f32 %v3625_v8, %v907_v48  ;;  %v4965_v40 = vld [vmem:[#allocation74_spill] sm:$0xff]  ;;  %v4968_v48 = vld [vmem:[#allocation81_spill] sm:$0xff] }
 0x24f   :  { %v798_v62 = vadd.f32 %v4955_v2, %v740_v44  ;;  %v1232_v1 = vstv %s3797_s22  ;;  %v4969_v2 = vld [vmem:[#allocation96_spill] sm:$0xff]  ;;  %s3980_s22 = sld [smem:[#allocation8 + $0x56]] }
 0x250   :  { %v853_v26 = vadd.f32 %v3589_v12, %v797_v61  ;;  %v868_v60 = vadd.f32 %v866_v46, %v826_v41  ;;  %v4957_v12 = vld [vmem:[#allocation70_spill] sm:$0xff]  ;;  %v1021_v29 = vadd.f32 %v4958_v27, %v965_v57  ;;  %v4967_v41 = vld [vmem:[#allocation93_spill] sm:$0xff]  ;;  %v4971_v57 = vld [vmem:[#allocation59_spill] sm:$0xff] }
 0x251   :  { %v3777_v14 = vpop.permute.xlu1 %1285  ;;  %v3779_v19 = vpop.permute.xlu0 %1299  ;;  %v854_v59 = vadd.f32 %v4956_v45, %v798_v62  ;;  %v1233_v45 = vmul.f32 %v1232_v1, %v4971_v57 }
 0x252   :  { %v908_v51 = vadd.f32 %v4957_v12, %v868_v60  ;;  %v879_v53 = vadd.f32 %v877_v15, %v853_v26  ;;  %v1079_v43 = vadd.f32 %v4961_v58, %v1021_v29  ;;  %v4970_v60 = vld [vmem:[#allocation101_spill] sm:$0xff] }
 0x253   :  { %v880_v37 = vadd.f32 %v878_v4, %v854_v59  ;;  %v4972_v59 = vld [vmem:[#allocation89_spill] sm:$0xff] }
 0x254   :  { %v937_v6 = vadd.f32 %v4959_v50, %v879_v53  ;;  %v966_v31 = vadd.f32 %v4960_v54, %v908_v51  ;;  %v1137_v25 = vadd.f32 %v4964_v55, %v1079_v43  ;;  %v4973_v51 = vld [vmem:[#allocation104_spill] sm:$0xff] }
 0x255   :  { %v3789_v39 = vpop.permute.xlu1 %1301  ;;  %v3791_v22 = vpop.permute.xlu0 %1313  ;;  %v938_v30 = vadd.f32 %v4965_v40, %v880_v37  ;;  %v1431_v50 = vld [vmem:[#allocation4 + $0x40] sm:$0xff] }
 0x256   :  { %v993_v17 = vadd.f32 %v4962_v11, %v937_v6  ;;  %v1022_v9 = vadd.f32 %v4963_v16, %v966_v31  ;;  %v1193_v18 = vadd.f32 %v3700_v56, %v1137_v25  ;;  %v1434_v56 = vld [vmem:[#allocation4 + $0x50] sm:$0xff]  ;;  %v1244_v6 = vstv %s3811_s23  ;;  %v4974_v31 = vld [vmem:[#allocation97_spill] sm:$0xff]  ;;  %s3985_s23 = sld [smem:[#allocation8 + $0x10]] }
 0x257   :  { %v994_v46 = vadd.f32 %v4968_v48, %v938_v30  ;;  %v4975_v11 = vld [vmem:[#allocation61_spill] sm:$0xff]  ;;  %v1436_v16 = vmax.f32 %v1431_v50, %v1434_v56  ;;  %v1441_v30 = vld [vmem:[#allocation4 + $0x60] sm:$0xff] }
 0x258   :  { %v1051_v61 = vadd.f32 %v4966_v20, %v993_v17  ;;  %v1080_v5 = vadd.f32 %v4967_v41, %v1022_v9  ;;  %v1235_v29 = vadd.f32 %v1233_v45, %v1193_v18  ;;  %v1234_v17 = vmul.f32 %v1232_v1, %v4975_v11  ;;  %v4976_v9 = vld [vmem:[#allocation105_spill] sm:$0xff] }
 0x259   :  { %v3802_v32 = vpop.permute.xlu1 %1315  ;;  %v1328_v47 = vpop.permute.xlu0 %1327  ;;  %v1052_v12 = vadd.f32 %v4972_v59, %v994_v46  ;;  %v1432_v20 = vld [vmem:[#allocation4 + $0x48] sm:$0xff]  ;;  %v1443_v1 = vmax.f32 %v1436_v16, %v1441_v30 }
 0x25a   :  { %v1107_v62 = vadd.f32 %v4969_v2, %v1051_v61  ;;  %v1138_v15 = vadd.f32 %v4970_v60, %v1080_v5  ;;  %v1275_v37 = vadd.f32 %v3754_v28, %v1235_v29  ;;  %v1435_v61 = vld [vmem:[#allocation4 + $0x58] sm:$0xff]  ;;  %v1438_v2 = vadd.f32 %v1434_v56, %v1431_v50  ;;  %v1442_v45 = vld [vmem:[#allocation4 + $0x68] sm:$0xff] }
 0x25b   :  { %v1108_v58 = vadd.f32 %v4974_v31, %v1052_v12  ;;  %v1437_v46 = vmax.f32 %v1432_v20, %v1435_v61  ;;  %v1246_v60 = vmul.f32 %v1244_v6, %v4975_v11  ;;  %v1439_v59 = vadd.f32 %v1435_v61, %v1432_v20  ;;  %v1449_v50 = vld [vmem:[#allocation4 + $0x78] sm:$0xff] }
 0x25c   :  { %v1165_v53 = vadd.f32 %v4973_v51, %v1107_v62  ;;  %v1194_v27 = vadd.f32 %v3710_v24, %v1138_v15  ;;  %v1245_v24 = vmul.f32 %v1244_v6, %v4971_v57  ;;  %v1333_v40 = vadd.f32 %v1328_v47, %v1275_v37  ;;  %v1448_v15 = vld [vmem:[#allocation4 + $0x70] sm:$0xff] }
 0x25d   :  { %v1330_v8 = vpop.permute.xlu1 %1329  ;;  %v3813_v38 = vpop.permute.xlu0 %1341  ;;  %v1166_v55 = vadd.f32 %v4976_v9, %v1108_v58  ;;  %v1445_v51 = vadd.f32 %v1441_v30, %v1438_v2  ;;  %v1444_v29 = vmax.f32 %v1437_v46, %v1442_v45  ;;  %v1531_v2 = vstv %s3869_s5  ;;  %s2925_s5 = sld [smem:[#allocation8 + $0x16]] }
 0x25e   :  { %v1221_v43 = vadd.f32 %v3725_v3, %v1165_v53  ;;  %v1236_v25 = vadd.f32 %v1234_v17, %v1194_v27  ;;  %v1450_v27 = vmax.f32 %v1443_v1, %v1448_v15 }
 0x25f   :  { %v1222_v18 = vadd.f32 %v3737_v34, %v1166_v55  ;;  %v1451_v6 = vmax.f32 %v1444_v29, %v1449_v50  ;;  %v4981_v29 = vld [vmem:[#allocation23_spill] sm:$0xff] }
 0x260   :  { %v1276_v3 = vadd.f32 %v3765_v35, %v1236_v25  ;;  %v1247_v28 = vadd.f32 %v1245_v24, %v1221_v43  ;;  %v1503_v25 = vstv %s2907_s26  ;;  %v67_v24 = vstv %s66_s4  ;;  %s3997_s26 = sld [smem:[#allocation8 + $0x11]]  ;;  %s2924_s4 = sld [smem:[#allocation8 + $0x15]] }
 0x261   :  { %v3823_v44 = vpop.permute.xlu1 %1343  ;;  %v1356_v26 = vpop.permute.xlu0 %1355  ;;  %v1248_v34 = vadd.f32 %v1246_v60, %v1222_v18  ;;  %3019 = vrsqrt.f32 %v67_v24  ;;  %v4978_v60 = vld [vmem:[#allocation22_spill] sm:$0xff] }
 0x262   :  { %v1305_v62 = vadd.f32 %v3779_v19, %v1247_v28  ;;  %v1334_v47 = vadd.f32 %v1330_v8, %v1276_v3  ;;  %v1446_v19 = vadd.f32 %v1442_v45, %v1439_v59  ;;  %v1452_v8 = vadd.f32 %v1448_v15, %v1445_v51  ;;  %v4977_v28 = vld [vmem:[#allocation18_spill] sm:$0xff]  ;;  %v4979_v15 = vld [vmem:[#allocation19_spill] sm:$0xff] }
 0x263   :  { %v1306_v31 = vadd.f32 %v3789_v39, %v1248_v34  ;;  %v4980_v59 = vld [vmem:[#allocation26_spill] sm:$0xff] }
 0x264   :  { %v1361_v53 = vadd.f32 %v1356_v26, %v1305_v62  ;;  %v1453_v58 = vadd.f32 %v1449_v50, %v1446_v19  ;;  %v1464_v26 = vmul.f32 0.25, %v1452_v8  ;;  %v4982_v19 = vld [vmem:[#allocation30_spill] sm:$0xff]  ;;  %v4983_v50 = vld [vmem:[#allocation27_spill] sm:$0xff] }
 0x265   :  { %v1358_v4 = vpop.permute.xlu1 %1357  ;;  %v3833_v54 = vpop.permute.xlu0 %1369 }
 0x266   :  { %v1362_v56 = vadd.f32 %v1358_v4, %v1306_v31  ;;  %v1465_v43 = vmul.f32 0.25, %v1453_v58 }
 0x269   :  { %v3841_v41 = vpop.permute.xlu1 %1371  ;;  %v1384_v5 = vpop.permute.xlu0 %1383 }
 0x26a   :  { %v1389_v48 = vadd.f32 %v1384_v5, %v1333_v40  ;;  %v134_v40 = vstv %s2808_s29  ;;  %v1517_v5 = vstv %s3865_s30  ;;  %s2922_s29 = sld [smem:[#allocation8 + $0x13]]  ;;  %s2923_s30 = sld [smem:[#allocation8 + $0x14]] }
 0x26b   :  { %v135_v18 = vmul.f32 %v3684_v36, %v134_v40  ;;  %v136_v62 = vmul.f32 %v3694_v21, %v134_v40  ;;  %v4986_v40 = vld [vmem:[#allocation38_spill] sm:$0xff] }
 0x26c   :  { %1393 = vrot.lane.b32.xlu0 %v1389_v48, %s3119_s16 }
 0x26d   :  { %v1386_v12 = vpop.permute.xlu1 %1385  ;;  %v185_v48 = vadd.f32 %v4977_v28, %v135_v18  ;;  %v186_v45 = vadd.f32 %v4979_v15, %v136_v62 }
 0x26e   :  { %v1390_v35 = vadd.f32 %v1386_v12, %v1334_v47 }
 0x26f   :  { %v243_v47 = vadd.f32 %v4978_v60, %v185_v48  ;;  %v244_v31 = vadd.f32 %v4981_v29, %v186_v45  ;;  %v4989_v60 = vld [vmem:[#allocation42_spill] sm:$0xff] }
 0x270   :  { %1395 = vrot.lane.b32.xlu1 %v1390_v35, %s3119_s16  ;;  %1403 = vrot.lane.b32.xlu0 %v1361_v53, %s3119_s16  ;;  %v3020_v53 = vpop.eup %3019 }
 0x271   :  { %v301_v12 = vadd.f32 %v4980_v59, %v243_v47  ;;  %3001 = vpush %v3020_v53 }
 0x273   :  { %v357_v8 = vadd.f32 %v4982_v19, %v301_v12  ;;  %v1589_v12 = vstv %s3915_s13  ;;  %s2930_s13 = sld [smem:[#allocation8 + $0x1b]] }
 0x274   :  { %1405 = vrot.lane.b32.xlu1 %v1362_v56, %s3119_s16  ;;  %1456 = vrot.lane.b32.xlu0 %v1450_v27, %s3117_s2  ;;  %v1547_v27 = vstv %s3876_s0  ;;  %v302_v56 = vadd.f32 %v4983_v50, %v244_v31  ;;  %v4992_v31 = vld [vmem:[#allocation50_spill] sm:$0xff]  ;;  %s2926_s0 = sld [smem:[#allocation8 + $0x17]] }
 0x278   :  { %1458 = vrot.lane.b32.xlu1 %v1451_v6, %s3117_s2  ;;  %1468 = vrot.lane.b32.xlu0 %v1464_v26, %s3117_s2  ;;  %v4984_v6 = vld [vmem:[#allocation34_spill] sm:$0xff] }
 0x279   :  { %v415_v58 = vadd.f32 %v4984_v6, %v357_v8  ;;  %v4993_v6 = vld [vmem:[#allocation47_spill] sm:$0xff] }
 0x27c   :  { %1470 = vrot.lane.b32.xlu1 %v1465_v43, %s3117_s2 }
 0x2de   :  { %v3856_v39 = vpop.permute.xlu0 %1393 }
 0x2e2   :  { %v3858_v37 = vpop.permute.xlu1 %1395  ;;  %v3860_v17 = vpop.permute.xlu0 %1403 }
 0x2e6   :  { %v3862_v4 = vpop.permute.xlu1 %1405  ;;  %v1457_v16 = vpop.permute.xlu0 %1456 }
 0x2e7   :  { %1462 = vst.msk [vmem:[#allocation2 + $0x3] sm:$0xff] %vm104_vm2, %v1457_v16  ;;  %v502_v16 = vstv %s3885_s8  ;;  %s2927_s8 = sld [smem:[#allocation8 + $0x18]] }
 0x2e8   :  { %v503_v18 = vmul.f32 %v3730_v10, %v502_v16  ;;  %v504_v15 = vmul.f32 %v3744_v7, %v502_v16  ;;  %v4995_v16 = vld [vmem:[#allocation51_spill] sm:$0xff] }
 0x2ea   :  { %v1459_v9 = vpop.permute.xlu1 %1458  ;;  %v1469_v55 = vpop.permute.xlu0 %1468 }
 0x2eb   :  { %1463 = vst.msk [vmem:[#allocation2 + $0xb] sm:$0xff] %vm104_vm2, %v1459_v9  ;;  %1474 = vst.msk [vmem:[#allocation3 + $0x3] sm:$0xff] %vm104_vm2, %v1469_v55  ;;  %v1561_v55 = vstv %s3888_s9  ;;  %s2928_s9 = sld [smem:[#allocation8 + $0x19]] }
 0x2ee   :  { %v3871_v30 = vld [vmem:[#allocation2] sm:$0xff]  ;;  %v1471_v20 = vpop.permute.xlu1 %1470 }
 0x2ef   :  { %v1504_v61 = vmul.f32 %v1503_v25, %v3871_v30  ;;  %1475 = vst.msk [vmem:[#allocation3 + $0xb] sm:$0xff] %vm104_vm2, %v1471_v20  ;;  %v1518_v46 = vmul.f32 %v1517_v5, %v3871_v30  ;;  %v1532_v34 = vmul.f32 %v1531_v2, %v3871_v30  ;;  %v3898_v35 = vld [vmem:[#allocation2 + $0x1] sm:$0xff]  ;;  %v471_v20 = vadd.f32 %v4986_v40, %v415_v58 }
 0x2f0   :  { %v1548_v43 = vmul.f32 %v1547_v27, %v3898_v35  ;;  %v1562_v48 = vmul.f32 %v1561_v55, %v3898_v35  ;;  %v1590_v50 = vmul.f32 %v1589_v12, %v3898_v35 }
 0x2f1   :  { %1508 = vrot.lane.b32.xlu0 %v1504_v61, %s3118_s11  ;;  %v4987_v61 = vld [vmem:[#allocation35_spill] sm:$0xff]  ;;  %v505_v62 = vadd.f32 %v503_v18, %v471_v20 }
 0x2f2   :  { %v3880_v3 = vld [vmem:[#allocation2 + $0x8] sm:$0xff] }
 0x2f3   :  { %v1505_v1 = vmul.f32 %v1503_v25, %v3880_v3  ;;  %v1519_v51 = vmul.f32 %v1517_v5, %v3880_v3  ;;  %v1533_v26 = vmul.f32 %v1531_v2, %v3880_v3  ;;  %v3912_v9 = vld [vmem:[#allocation2 + $0x9] sm:$0xff]  ;;  %v553_v47 = vadd.f32 %v4989_v60, %v505_v62 }
 0x2f4   :  { %v4985_v25 = vld [vmem:[#allocation31_spill] sm:$0xff]  ;;  %v1549_v28 = vmul.f32 %v1547_v27, %v3912_v9  ;;  %v1563_v45 = vmul.f32 %v1561_v55, %v3912_v9  ;;  %v1591_v40 = vmul.f32 %v1589_v12, %v3912_v9 }
 0x2f5   :  { %1510 = vrot.lane.b32.xlu1 %v1505_v1, %s3118_s11  ;;  %1522 = vrot.lane.b32.xlu0 %v1518_v46, %s3118_s11  ;;  %v358_v24 = vadd.f32 %v4985_v25, %v302_v56  ;;  %v1575_v1 = vstv %s3901_s10  ;;  %v4988_v46 = vld [vmem:[#allocation39_spill] sm:$0xff]  ;;  %v1603_v56 = vstv %s3926_s14  ;;  %v4996_v25 = vld [vmem:[#allocation58_spill] sm:$0xff]  ;;  %s2929_s10 = sld [smem:[#allocation8 + $0x1a]]  ;;  %s2935_s14 = sld [smem:[#allocation8 + $0x20]] }
 0x2f6   :  { %v1576_v59 = vmul.f32 %v1575_v1, %v3898_v35  ;;  %v4991_v27 = vld [vmem:[#allocation43_spill] sm:$0xff]  ;;  %v1577_v8 = vmul.f32 %v1575_v1, %v3912_v9  ;;  %v1604_v20 = vmul.f32 %v1603_v56, %v3898_v35  ;;  %v1605_v60 = vmul.f32 %v1603_v56, %v3912_v9 }
 0x2f7   :  { %v416_v5 = vadd.f32 %v4987_v61, %v358_v24  ;;  %v870_v61 = vstv %s3935_s15  ;;  %v4997_v18 = vld [vmem:[#allocation55_spill] sm:$0xff]  ;;  %s2936_s15 = sld [smem:[#allocation8 + $0x21]] }
 0x2f8   :  { %v871_v62 = vmul.f32 %v870_v61, %v3359_v52 }
 0x2f9   :  { %1524 = vrot.lane.b32.xlu1 %v1519_v51, %s3118_s11  ;;  %1536 = vrot.lane.b32.xlu0 %v1532_v34, %s3118_s11  ;;  %v472_v2 = vadd.f32 %v4988_v46, %v416_v5  ;;  %v4990_v34 = vld [vmem:[#allocation46_spill] sm:$0xff]  ;;  %v1617_v5 = vstv %s3938_s17  ;;  %v4999_v46 = vld [vmem:[#allocation60_spill] sm:$0xff]  ;;  %s2937_s17 = sld [smem:[#allocation8 + $0x22]] }
 0x2fa   :  { %v611_v53 = vadd.f32 %v4990_v34, %v553_v47  ;;  %v1618_v47 = vmul.f32 %v1617_v5, %v3898_v35 }
 0x2fb   :  { %v506_v51 = vadd.f32 %v504_v15, %v472_v2  ;;  %v1631_v15 = vstv %s3948_s18  ;;  %s2938_s18 = sld [smem:[#allocation8 + $0x23]] }
 0x2fc   :  { %v669_v19 = vadd.f32 %v4992_v31, %v611_v53  ;;  %v872_v53 = vmul.f32 %v870_v61, %v3371_v0  ;;  %v3982_v31 = vld [vmem:[#allocation2 + $0x2] sm:$0xff] }
 0x2fd   :  { %1538 = vrot.lane.b32.xlu1 %v1533_v26, %s3118_s11  ;;  %1552 = vrot.lane.b32.xlu0 %v1548_v43, %s3117_s2  ;;  %v554_v29 = vadd.f32 %v4991_v27, %v506_v51  ;;  %v4994_v26 = vld [vmem:[#allocation54_spill] sm:$0xff]  ;;  %v5001_v51 = vld [vmem:[#allocation71_spill] sm:$0xff]  ;;  %v1619_v27 = vmul.f32 %v1617_v5, %v3912_v9 }
 0x2fe   :  { %v725_v43 = vadd.f32 %v4994_v26, %v669_v19  ;;  %v1647_v19 = vstv %s3960_s19  ;;  %v5004_v26 = vld [vmem:[#allocation86_spill] sm:$0xff]  ;;  %v5007_v5 = vld [vmem:[#allocation87_spill] sm:$0xff]  ;;  %s4068_s19 = sld [smem:[#allocation8]] }
 0x2ff   :  { %v612_v58 = vadd.f32 %v4993_v6, %v554_v29  ;;  %v1632_v29 = vmul.f32 %v1631_v15, %v3898_v35  ;;  %v5003_v6 = vld [vmem:[#allocation72_spill] sm:$0xff] }
 0x300   :  { %v783_v24 = vadd.f32 %v4996_v25, %v725_v43  ;;  %v1633_v43 = vmul.f32 %v1631_v15, %v3912_v9  ;;  %v1661_v25 = vstv %s3971_s20  ;;  %v5010_v15 = vld [vmem:[#allocation103_spill] sm:$0xff]  ;;  %s4072_s20 = sld [smem:[#allocation8 + $0x24]] }
 0x301   :  { %1554 = vrot.lane.b32.xlu1 %v1549_v28, %s3117_s2  ;;  %1566 = vrot.lane.b32.xlu0 %v1562_v48, %s3119_s16  ;;  %v670_v55 = vadd.f32 %v4995_v16, %v612_v58  ;;  %v4998_v48 = vld [vmem:[#allocation65_spill] sm:$0xff]  ;;  %v1648_v16 = vmul.f32 %v1647_v19, %v3982_v31 }
 0x302   :  { %v839_v1 = vadd.f32 %v4998_v48, %v783_v24  ;;  %v5005_v24 = vld [vmem:[#allocation79_spill] sm:$0xff] }
 0x303   :  { %v726_v28 = vadd.f32 %v4997_v18, %v670_v55  ;;  %v3994_v55 = vld [vmem:[#allocation2 + $0xa] sm:$0xff] }
 0x304   :  { %v873_v12 = vadd.f32 %v871_v62, %v839_v1  ;;  %v1649_v48 = vmul.f32 %v1647_v19, %v3994_v55  ;;  %v1662_v1 = vmul.f32 %v1661_v25, %v3982_v31  ;;  %v5009_v62 = vld [vmem:[#allocation95_spill] sm:$0xff] }
 0x305   :  { %1568 = vrot.lane.b32.xlu1 %v1563_v45, %s3119_s16  ;;  %1580 = vrot.lane.b32.xlu0 %v1576_v59, %s3119_s16  ;;  %v784_v2 = vadd.f32 %v4999_v46, %v726_v28  ;;  %v5000_v45 = vld [vmem:[#allocation66_spill] sm:$0xff]  ;;  %v1238_v46 = vstv %s3980_s22  ;;  %s4080_s22 = sld [smem:[#allocation8 + $0x25]] }
 0x306   :  { %v921_v34 = vadd.f32 %v5001_v51, %v873_v12  ;;  %v5008_v28 = vld [vmem:[#allocation102_spill] sm:$0xff]  ;;  %v1663_v12 = vmul.f32 %v1661_v25, %v3994_v55 }
 0x307   :  { %v840_v59 = vadd.f32 %v5000_v45, %v784_v2  ;;  %v1675_v2 = vstv %s3985_s23  ;;  %v1744_v25 = vld [vmem:[#allocation2 + $0x3] sm:$0xff]  ;;  %s4090_s23 = sld [smem:[#allocation8 + $0x26]] }
 0x308   :  { %v1676_v51 = vmul.f32 %v1675_v2, %v3982_v31  ;;  %v1677_v19 = vmul.f32 %v1675_v2, %v3994_v55  ;;  %v1803_v2 = vstv %s2928_s9  ;;  %s4204_s9 = sld [smem:[#allocation8 + $0x3f]] }
 0x309   :  { %1582 = vrot.lane.b32.xlu1 %v1577_v8, %s3119_s16  ;;  %1594 = vrot.lane.b32.xlu0 %v1590_v50, %s3119_s16  ;;  %v874_v8 = vadd.f32 %v872_v53, %v840_v59  ;;  %v5002_v50 = vld [vmem:[#allocation78_spill] sm:$0xff]  ;;  %v1239_v59 = vmul.f32 %v1238_v46, %v4971_v57 }
 0x30a   :  { %v979_v56 = vadd.f32 %v5002_v50, %v921_v34  ;;  %v1689_v34 = vstv %s3997_s26  ;;  %s4101_s26 = sld [smem:[#allocation8 + $0x27]] }
 0x30b   :  { %v922_v58 = vadd.f32 %v5003_v6, %v874_v8  ;;  %v1690_v8 = vmul.f32 %v1689_v34, %v3982_v31 }
 0x30c   :  { %v1037_v35 = vadd.f32 %v5004_v26, %v979_v56 }
 0x30d   :  { %1596 = vrot.lane.b32.xlu1 %v1591_v40, %s3119_s16  ;;  %1608 = vrot.lane.b32.xlu0 %v1604_v20, %s3119_s16  ;;  %v980_v40 = vadd.f32 %v5005_v24, %v922_v58  ;;  %v5006_v20 = vld [vmem:[#allocation94_spill] sm:$0xff]  ;;  %v1703_v58 = vstv %s2921_s27  ;;  %v1747_v24 = vstv %s2924_s4  ;;  %s4103_s27 = sld [smem:[#allocation8 + $0x1c]]  ;;  %s4149_s4 = sld [smem:[#allocation8 + $0x2f]] }
 0x30e   :  { %v1093_v61 = vadd.f32 %v5006_v20, %v1037_v35  ;;  %v1704_v35 = vmul.f32 %v1703_v58, %v3982_v31  ;;  %v1748_v20 = vmul.f32 %v1747_v24, %v1744_v25 }
 0x30f   :  { %v1038_v18 = vadd.f32 %v5007_v5, %v980_v40  ;;  %v1761_v5 = vstv %s2925_s5  ;;  %s4169_s5 = sld [smem:[#allocation8 + $0x33]] }
 0x310   :  { %v1151_v9 = vadd.f32 %v5008_v28, %v1093_v61  ;;  %v1745_v61 = vld [vmem:[#allocation2 + $0xb] sm:$0xff]  ;;  %v1762_v28 = vmul.f32 %v1761_v5, %v1744_v25 }
 0x311   :  { %1610 = vrot.lane.b32.xlu1 %v1605_v60, %s3119_s16  ;;  %1622 = vrot.lane.b32.xlu0 %v1618_v47, %s3120_s21  ;;  %v1094_v60 = vadd.f32 %v5009_v62, %v1038_v18  ;;  %v1749_v18 = vmul.f32 %v1747_v24, %v1745_v61 }
 0x312   :  { %v1207_v47 = vadd.f32 %v3712_v42, %v1151_v9  ;;  %v1763_v9 = vmul.f32 %v1761_v5, %v1745_v61 }
 0x313   :  { %v1152_v45 = vadd.f32 %v5010_v15, %v1094_v60  ;;  %v1804_v60 = vmul.f32 %v1803_v2, %v1744_v25  ;;  %v1805_v15 = vmul.f32 %v1803_v2, %v1745_v61 }
 0x315   :  { %1624 = vrot.lane.b32.xlu1 %v1619_v27, %s3120_s21  ;;  %1636 = vrot.lane.b32.xlu0 %v1632_v29, %s3120_s21  ;;  %v1208_v53 = vadd.f32 %v3723_v33, %v1152_v45  ;;  %v1241_v27 = vadd.f32 %v1239_v59, %v1207_v47  ;;  %v1240_v29 = vmul.f32 %v1238_v46, %v4975_v11  ;;  %v1817_v47 = vstv %s2929_s10  ;;  %s4220_s10 = sld [smem:[#allocation8 + $0x43]] }
 0x316   :  { %v1818_v45 = vmul.f32 %v1817_v47, %v1744_v25  ;;  %v1831_v59 = vstv %s2930_s13  ;;  %s4238_s13 = sld [smem:[#allocation8 + $0x47]] }
 0x317   :  { %v1289_v42 = vadd.f32 %v3767_v49, %v1241_v27  ;;  %v1242_v50 = vadd.f32 %v1240_v29, %v1208_v53  ;;  %v1691_v49 = vmul.f32 %v1689_v34, %v3994_v55  ;;  %v4059_v34 = vld [vmem:[#allocation2 + $0x4] sm:$0xff]  ;;  %v1871_v53 = vstv %s2935_s14  ;;  %v4064_v29 = vld [vmem:[#allocation2 + $0xc] sm:$0xff]  ;;  %s4240_s14 = sld [smem:[#allocation8 + $0x54]] }
 0x318   :  { %v1833_v27 = vmul.f32 %v1831_v59, %v1745_v61 }
 0x319   :  { %1638 = vrot.lane.b32.xlu1 %v1633_v43, %s3120_s21  ;;  %1652 = vrot.lane.b32.xlu0 %v1648_v16, %s3121_s24  ;;  %v1347_v56 = vadd.f32 %v3813_v38, %v1289_v42  ;;  %v1290_v33 = vadd.f32 %v3777_v14, %v1242_v50  ;;  %v1717_v43 = vstv %s2922_s29  ;;  %v1705_v14 = vmul.f32 %v1703_v58, %v3994_v55  ;;  %s4118_s29 = sld [smem:[#allocation8 + $0x28]] }
 0x31a   :  { %v1731_v16 = vstv %s2923_s30  ;;  %v1872_v42 = vmul.f32 %v1871_v53, %v4059_v34  ;;  %v1915_v58 = vstv %s2938_s18  ;;  %s4133_s30 = sld [smem:[#allocation8 + $0x2b]]  ;;  %s4275_s18 = sld [smem:[#allocation8 + $0x4f]] }
 0x31b   :  { %v1409_v6 = vadd.f32 %v3860_v17, %v1347_v56  ;;  %v1348_v26 = vadd.f32 %v3823_v44, %v1290_v33  ;;  %v1718_v17 = vmul.f32 %v1717_v43, %v3982_v31  ;;  %v1719_v44 = vmul.f32 %v1717_v43, %v3994_v55  ;;  %v4087_v43 = vld [vmem:[#allocation2 + $0xd] sm:$0xff] }
 0x31c   :  { %v1733_v40 = vmul.f32 %v1731_v16, %v3994_v55  ;;  %v1899_v56 = vstv %s2937_s17  ;;  %s4258_s17 = sld [smem:[#allocation9]] }
 0x31d   :  { %1654 = vrot.lane.b32.xlu1 %v1649_v48, %s3121_s24  ;;  %1666 = vrot.lane.b32.xlu0 %v1662_v1, %s3121_s24  ;;  %v1410_v38 = vadd.f32 %v3862_v4, %v1348_v26  ;;  %v1732_v4 = vmul.f32 %v1731_v16, %v3982_v31  ;;  %v1775_v31 = vstv %s2926_s0  ;;  %v1789_v1 = vstv %s2927_s8  ;;  %s4171_s0 = sld [smem:[#allocation8 + $0x38]]  ;;  %s4185_s8 = sld [smem:[#allocation8 + $0x37]] }
 0x31e   :  { %v1776_v48 = vmul.f32 %v1775_v31, %v1744_v25  ;;  %v1777_v55 = vmul.f32 %v1775_v31, %v1745_v61  ;;  %v1790_v46 = vmul.f32 %v1789_v1, %v1744_v25  ;;  %v1791_v62 = vmul.f32 %v1789_v1, %v1745_v61  ;;  %v5014_v1 = vld [vmem:[#allocation24_spill] sm:$0xff] }
 0x31f   :  { %v122_v26 = vstv %s4068_s19  ;;  %s4280_s19 = sld [smem:[#allocation9 + $0x2]] }
 0x321   :  { %1668 = vrot.lane.b32.xlu1 %v1663_v12, %s3121_s24  ;;  %1680 = vrot.lane.b32.xlu0 %v1676_v51, %s3122_s28  ;;  %v1819_v12 = vmul.f32 %v1817_v47, %v1745_v61  ;;  %v1832_v51 = vmul.f32 %v1831_v59, %v1744_v25  ;;  %v5011_v25 = vld [vmem:[#allocation16_spill] sm:$0xff] }
 0x325   :  { %1682 = vrot.lane.b32.xlu1 %v1677_v19, %s3122_s28  ;;  %1694 = vrot.lane.b32.xlu0 %v1690_v8, %s3122_s28  ;;  %v1885_v19 = vstv %s2936_s15  ;;  %v1873_v8 = vmul.f32 %v1871_v53, %v4064_v29  ;;  %v5018_v53 = vld [vmem:[#allocation32_spill] sm:$0xff]  ;;  %s4254_s15 = sld [smem:[#allocation8 + $0x4b]] }
 0x326   :  { %v1886_v50 = vmul.f32 %v1885_v19, %v4059_v34  ;;  %v1887_v33 = vmul.f32 %v1885_v19, %v4064_v29  ;;  %v490_v19 = vstv %s4103_s27  ;;  %s4314_s27 = sld [smem:[#allocation8 + $0x5b]] }
 0x329   :  { %1696 = vrot.lane.b32.xlu1 %v1691_v49, %s3122_s28  ;;  %1413 = vrot.lane.b32.xlu0 %v1409_v6, %s3122_s28  ;;  %v1900_v6 = vmul.f32 %v1899_v56, %v4059_v34  ;;  %v4078_v49 = vld [vmem:[#allocation2 + $0x5] sm:$0xff] }
 0x32d   :  { %1415 = vrot.lane.b32.xlu1 %v1410_v38, %s3122_s28  ;;  %1708 = vrot.lane.b32.xlu0 %v1704_v35, %s3122_s28  ;;  %v1901_v38 = vmul.f32 %v1899_v56, %v4064_v29  ;;  %v1916_v35 = vmul.f32 %v1915_v58, %v4078_v49  ;;  %v5020_v56 = vld [vmem:[#allocation36_spill] sm:$0xff] }
 0x331   :  { %1710 = vrot.lane.b32.xlu1 %v1705_v14, %s3122_s28  ;;  %1722 = vrot.lane.b32.xlu0 %v1718_v17, %s3122_s28  ;;  %v1929_v14 = vstv %s4072_s20  ;;  %v123_v17 = vmul.f32 %v3684_v36, %v122_v26  ;;  %v124_v36 = vmul.f32 %v3694_v21, %v122_v26  ;;  %v5015_v21 = vld [vmem:[#allocation21_spill] sm:$0xff]  ;;  %s3002_s20 = spop %3001 }
 0x333   :  { %v157_v24 = vadd.f32 %v5011_v25, %v123_v17  ;;  %v491_v17 = vmul.f32 %v3730_v10, %v490_v19  ;;  %v5023_v10 = vld [vmem:[#allocation40_spill] sm:$0xff] }
 0x335   :  { %1724 = vrot.lane.b32.xlu1 %v1719_v44, %s3122_s28  ;;  %1736 = vrot.lane.b32.xlu0 %v1732_v4, %s3123_s6  ;;  %v1917_v44 = vmul.f32 %v1915_v58, %v4087_v43  ;;  %v1930_v4 = vmul.f32 %v1929_v14, %v4078_v49 }
 0x339   :  { %1738 = vrot.lane.b32.xlu1 %v1733_v40, %s3123_s6  ;;  %1752 = vrot.lane.b32.xlu0 %v1748_v20, %s3124_s7  ;;  %v1943_v40 = vstv %s4080_s22  ;;  %v5012_v20 = vld [vmem:[#allocation20_spill] sm:$0xff]  ;;  %s4293_s22 = sld [smem:[#allocation8 + $0x53]] }
 0x33a   :  { %v215_v61 = vadd.f32 %v5012_v20, %v157_v24  ;;  %v1944_v31 = vmul.f32 %v1943_v40, %v4078_v49 }
 0x33d   :  { %1754 = vrot.lane.b32.xlu1 %v1749_v18, %s3124_s7  ;;  %1766 = vrot.lane.b32.xlu0 %v1762_v28, %s3124_s7  ;;  %v1931_v28 = vmul.f32 %v1929_v14, %v4087_v43 }
 0x341   :  { %1768 = vrot.lane.b32.xlu1 %v1763_v9, %s3124_s7  ;;  %1780 = vrot.lane.b32.xlu0 %v1776_v48, %s3124_s7  ;;  %v5013_v9 = vld [vmem:[#allocation17_spill] sm:$0xff] }
 0x342   :  { %v158_v48 = vadd.f32 %v5013_v9, %v124_v36  ;;  %v4164_v9 = vld [vmem:[#allocation2 + $0x6] sm:$0xff] }
 0x344   :  { %v216_v2 = vadd.f32 %v5015_v21, %v158_v48  ;;  %v2029_v48 = vstv %s4133_s30 }
 0x345   :  { %1782 = vrot.lane.b32.xlu1 %v1777_v55, %s3124_s7  ;;  %1794 = vrot.lane.b32.xlu0 %v1790_v46, %s3125_s12  ;;  %v271_v55 = vadd.f32 %v5014_v1, %v215_v61  ;;  %v1957_v46 = vstv %s4090_s23  ;;  %v4167_v1 = vld [vmem:[#allocation2 + $0xe] sm:$0xff]  ;;  %s2804_s23 = sld [smem:[#allocation9 + $0x1]] }
 0x346   :  { %v1958_v59 = vmul.f32 %v1957_v46, %v4078_v49  ;;  %v1959_v26 = vmul.f32 %v1957_v46, %v4087_v43  ;;  %v5024_v46 = vld [vmem:[#allocation44_spill] sm:$0xff] }
 0x349   :  { %1796 = vrot.lane.b32.xlu1 %v1791_v62, %s3125_s12  ;;  %1808 = vrot.lane.b32.xlu0 %v1804_v60, %s3125_s12  ;;  %v5016_v62 = vld [vmem:[#allocation28_spill] sm:$0xff] }
 0x34a   :  { %v329_v60 = vadd.f32 %v5016_v62, %v271_v55  ;;  %v2030_v62 = vmul.f32 %v2029_v48, %v4164_v9 }
 0x34d   :  { %1810 = vrot.lane.b32.xlu1 %v1805_v15, %s3125_s12  ;;  %1822 = vrot.lane.b32.xlu0 %v1818_v45, %s3125_s12  ;;  %v1945_v45 = vmul.f32 %v1943_v40, %v4087_v43 }
 0x351   :  { %1824 = vrot.lane.b32.xlu1 %v1819_v12, %s3125_s12  ;;  %1836 = vrot.lane.b32.xlu0 %v1832_v51, %s3125_s12  ;;  %v5017_v12 = vld [vmem:[#allocation25_spill] sm:$0xff] }
 0x352   :  { %v272_v51 = vadd.f32 %v5017_v12, %v216_v2  ;;  %v5026_v12 = vld [vmem:[#allocation48_spill] sm:$0xff] }
 0x355   :  { %1838 = vrot.lane.b32.xlu1 %v1833_v27, %s3125_s12  ;;  %1876 = vrot.lane.b32.xlu0 %v1872_v42, %s3118_s11  ;;  %v385_v27 = vadd.f32 %v5018_v53, %v329_v60  ;;  %v1971_v42 = vstv %s4101_s26  ;;  %v2031_v60 = vmul.f32 %v2029_v48, %v4167_v1  ;;  %v2085_v53 = vstv %s4149_s4  ;;  %s4298_s26 = smul.f32 %s3002_s20, %s4258_s17  ;;  %s4330_s4 = sld [smem:[#allocation8 + $0x5f]] }
 0x356   :  { %v1973_v20 = vmul.f32 %v1971_v42, %v4087_v43  ;;  %s4391_s17 = sld [smem:[#allocation8 + $0x1c]]  ;;  %s4437_s20 = sld [smem:[#allocation8 + $0x32]] }
 0x357   :  { %s71_s30 = smul.f32 %s4280_s19, %s4298_s26  ;;  %s4408_s19 = sld [smem:[#allocation8 + $0x1e]] }
 0x359   :  { %1878 = vrot.lane.b32.xlu1 %v1873_v8, %s3118_s11  ;;  %1890 = vrot.lane.b32.xlu0 %v1886_v50, %s3118_s11  ;;  %v5019_v8 = vld [vmem:[#allocation29_spill] sm:$0xff] }
 0x35a   :  { %v330_v50 = vadd.f32 %v5019_v8, %v272_v51 }
 0x35d   :  { %1892 = vrot.lane.b32.xlu1 %v1887_v33, %s3118_s11  ;;  %1904 = vrot.lane.b32.xlu0 %v1900_v6, %s3118_s11  ;;  %v443_v33 = vadd.f32 %v5020_v56, %v385_v27  ;;  %v5027_v27 = vld [vmem:[#allocation45_spill] sm:$0xff] }
 0x35f   :  { %v493_v24 = vadd.f32 %v491_v17, %v443_v33  ;;  %v2086_v33 = vmul.f32 %v2085_v53, %v4164_v9 }
 0x361   :  { %1906 = vrot.lane.b32.xlu1 %v1901_v38, %s3118_s11  ;;  %1920 = vrot.lane.b32.xlu0 %v1916_v35, %s3117_s2  ;;  %v1972_v38 = vmul.f32 %v1971_v42, %v4078_v49  ;;  %v5021_v35 = vld [vmem:[#allocation33_spill] sm:$0xff] }
 0x362   :  { %v386_v14 = vadd.f32 %v5021_v35, %v330_v50 }
 0x363   :  { %v4095_v16 = vpop.permute.xlu0 %1508 }
 0x365   :  { %1922 = vrot.lane.b32.xlu1 %v1917_v44, %s3117_s2  ;;  %1934 = vrot.lane.b32.xlu0 %v1930_v4, %s3119_s16  ;;  %v1985_v44 = vstv %s4118_s29  ;;  %v5022_v4 = vld [vmem:[#allocation37_spill] sm:$0xff]  ;;  %s4419_s29 = sld [smem:[#allocation8 + $0x31]] }
 0x366   :  { %v444_v25 = vadd.f32 %v5022_v4, %v386_v14  ;;  %v1986_v61 = vmul.f32 %v1985_v44, %v4078_v49  ;;  %v5030_v14 = vld [vmem:[#allocation56_spill] sm:$0xff]  ;;  %v4199_v4 = vld [vmem:[#allocation3 + $0x8] sm:$0xff] }
 0x367   :  { %v4109_v5 = vpop.permute.xlu1 %1510  ;;  %v4111_v18 = vpop.permute.xlu0 %1522 }
 0x369   :  { %1936 = vrot.lane.b32.xlu1 %v1931_v28, %s3119_s16  ;;  %1948 = vrot.lane.b32.xlu0 %v1944_v31, %s3119_s16  ;;  %v525_v28 = vadd.f32 %v5023_v10, %v493_v24  ;;  %v492_v31 = vmul.f32 %v3744_v7, %v490_v19  ;;  %v5028_v19 = vld [vmem:[#allocation52_spill] sm:$0xff]  ;;  %v4202_v24 = vld [vmem:[#allocation3] sm:$0xff] }
 0x36b   :  { %v4124_v47 = vpop.permute.xlu1 %1524  ;;  %v4126_v15 = vpop.permute.xlu0 %1536  ;;  %v494_v55 = vadd.f32 %v492_v31, %v444_v25  ;;  %v583_v21 = vadd.f32 %v5024_v46, %v525_v28  ;;  %v2143_v25 = vstv %s4169_s5  ;;  %v5032_v28 = vld [vmem:[#allocation63_spill] sm:$0xff]  ;;  %s72_s5 = ssub.f32 %s2804_s23, %s71_s30  ;;  %s4485_s23 = sld [smem:[#allocation8 + $0x36]] }
 0x36c   :  { %v2145_v46 = vmul.f32 %v2143_v25, %v4199_v4  ;;  %s4527_s30 = sld [smem:[#allocation8 + $0x3e]] }
 0x36d   :  { %1950 = vrot.lane.b32.xlu1 %v1945_v45, %s3119_s16  ;;  %1962 = vrot.lane.b32.xlu0 %v1958_v59, %s3119_s16  ;;  %v5025_v45 = vld [vmem:[#allocation41_spill] sm:$0xff]  ;;  %v639_v51 = vadd.f32 %v5026_v12, %v583_v21  ;;  %v2144_v21 = vmul.f32 %v2143_v25, %v4202_v24  ;;  %v5034_v12 = vld [vmem:[#allocation64_spill] sm:$0xff]  ;;  %v5038_v25 = vld [vmem:[#allocation75_spill] sm:$0xff] }
 0x36e   :  { %v526_v59 = vadd.f32 %v5025_v45, %v494_v55 }
 0x36f   :  { %v4140_v6 = vpop.permute.xlu1 %1538  ;;  %v4142_v58 = vpop.permute.xlu0 %1552  ;;  %v697_v8 = vadd.f32 %v5028_v19, %v639_v51 }
 0x370   :  { %v584_v42 = vadd.f32 %v5027_v27, %v526_v59  ;;  %v2199_v59 = vstv %s4185_s8  ;;  %s4363_s8 = sld [smem:[#allocation8 + $0x2a]] }
 0x371   :  { %1964 = vrot.lane.b32.xlu1 %v1959_v26, %s3119_s16  ;;  %1976 = vrot.lane.b32.xlu0 %v1972_v38, %s3119_s16  ;;  %v2087_v26 = vmul.f32 %v2085_v53, %v4167_v1  ;;  %v5029_v38 = vld [vmem:[#allocation49_spill] sm:$0xff]  ;;  %v753_v17 = vadd.f32 %v5030_v14, %v697_v8  ;;  %v2201_v19 = vmul.f32 %v2199_v59, %v4199_v4 }
 0x372   :  { %v640_v35 = vadd.f32 %v5029_v38, %v584_v42  ;;  %v2200_v8 = vmul.f32 %v2199_v59, %v4202_v24  ;;  %v4233_v38 = vld [vmem:[#allocation3 + $0xa] sm:$0xff]  ;;  %v4236_v14 = vld [vmem:[#allocation3 + $0x2] sm:$0xff] }
 0x373   :  { %v4154_v40 = vpop.permute.xlu1 %1554  ;;  %v4156_v36 = vpop.permute.xlu0 %1566  ;;  %v811_v31 = vadd.f32 %v5032_v28, %v753_v17  ;;  %5036 = vst [vmem:[#allocation62_spill] sm:$0xff] %v4233_v38  ;;  %5037 = vst [vmem:[#allocation67_spill] sm:$0xff] %v4236_v14 }
 0x375   :  { %1978 = vrot.lane.b32.xlu1 %v1973_v20, %s3119_s16  ;;  %1990 = vrot.lane.b32.xlu0 %v1986_v61, %s3120_s21  ;;  %v858_v20 = vstv %s4171_s0  ;;  %v5031_v61 = vld [vmem:[#allocation53_spill] sm:$0xff]  ;;  %s4349_s0 = sld [smem:[#allocation8 + $0x29]] }
 0x376   :  { %v698_v10 = vadd.f32 %v5031_v61, %v640_v35  ;;  %v859_v45 = vmul.f32 %v858_v20, %v3359_v52  ;;  %v2283_v35 = vstv %s4204_s9  ;;  %s4365_s9 = sld [smem:[#allocation8]] }
 0x377   :  { %v4176_v2 = vpop.permute.xlu1 %1568  ;;  %v4178_v7 = vpop.permute.xlu0 %1580  ;;  %v2284_v28 = vmul.f32 %v2283_v35, %v4236_v14 }
 0x378   :  { %v861_v53 = vadd.f32 %v859_v45, %v811_v31  ;;  %v5039_v31 = vld [vmem:[#allocation69_spill] sm:$0xff]  ;;  %v5041_v45 = vld [vmem:[#allocation76_spill] sm:$0xff] }
 0x379   :  { %2034 = vrot.lane.b32.xlu1 %v2030_v62, %s3121_s24  ;;  %2036 = vrot.lane.b32.xlu0 %v2031_v60, %s3121_s24  ;;  %v5033_v62 = vld [vmem:[#allocation57_spill] sm:$0xff] }
 0x37a   :  { %v754_v60 = vadd.f32 %v5033_v62, %v698_v10 }
 0x37b   :  { %v4191_v50 = vpop.permute.xlu1 %1582  ;;  %v4193_v56 = vpop.permute.xlu0 %1594 }
 0x37c   :  { %v812_v51 = vadd.f32 %v5034_v12, %v754_v60  ;;  %v2339_v60 = vstv %s4220_s10  ;;  %v5042_v12 = vld [vmem:[#allocation90_spill] sm:$0xff]  ;;  %s4371_s10 = sld [smem:[#allocation8 + $0x1]] }
 0x37d   :  { %2090 = vrot.lane.b32.xlu1 %v2086_v33, %s3122_s28  ;;  %2092 = vrot.lane.b32.xlu0 %v2087_v26, %s3122_s28  ;;  %v5035_v33 = vld [vmem:[#allocation68_spill] sm:$0xff]  ;;  %v860_v26 = vmul.f32 %v858_v20, %v3371_v0  ;;  %v2285_v20 = vmul.f32 %v2283_v35, %v4233_v38  ;;  %v5044_v35 = vld [vmem:[#allocation98_spill] sm:$0xff] }
 0x37e   :  { %v893_v52 = vadd.f32 %v5035_v33, %v861_v53  ;;  %v2340_v33 = vmul.f32 %v2339_v60, %v4236_v14 }
 0x37f   :  { %v4211_v48 = vpop.permute.xlu1 %1596  ;;  %v4213_v55 = vpop.permute.xlu0 %1608  ;;  %v862_v17 = vadd.f32 %v860_v26, %v812_v51 }
 0x380   :  { %v951_v61 = vadd.f32 %v5038_v25, %v893_v52  ;;  %v5043_v52 = vld [vmem:[#allocation83_spill] sm:$0xff] }
 0x381   :  { %2150 = vrot.lane.b32.xlu0 %v2145_v46, %s3124_s7  ;;  %2148 = vrot.lane.b32.xlu1 %v2144_v21, %s3124_s7  ;;  %v894_v46 = vadd.f32 %v5039_v31, %v862_v17  ;;  %v5040_v21 = vld [vmem:[#allocation82_spill] sm:$0xff]  ;;  %v5047_v31 = vld [vmem:[#allocation91_spill] sm:$0xff] }
 0x382   :  { %v1007_v62 = vadd.f32 %v5040_v21, %v951_v61  ;;  %v4270_v25 = vld [vmem:[#allocation3 + $0xb] sm:$0xff]  ;;  %v2397_v61 = vstv %s4238_s13  ;;  %s4379_s13 = sld [smem:[#allocation8 + $0x2]] }
 0x383   :  { %v4225_v27 = vpop.permute.xlu1 %1610  ;;  %v4227_v42 = vpop.permute.xlu0 %1622  ;;  %v952_v59 = vadd.f32 %v5041_v45, %v894_v46  ;;  %5045 = vst [vmem:[#allocation70_spill] sm:$0xff] %v4270_v25  ;;  %v5048_v21 = vld [vmem:[#allocation106_spill] sm:$0xff] }
 0x384   :  { %v1065_v51 = vadd.f32 %v5042_v12, %v1007_v62 }
 0x385   :  { %2206 = vrot.lane.b32.xlu0 %v2201_v19, %s3125_s12  ;;  %2204 = vrot.lane.b32.xlu1 %v2200_v8, %s3125_s12  ;;  %v2341_v8 = vmul.f32 %v2339_v60, %v4233_v38  ;;  %v1008_v26 = vadd.f32 %v5043_v52, %v952_v59  ;;  %v2399_v59 = vmul.f32 %v2397_v61, %v4270_v25  ;;  %v2453_v52 = vstv %s4254_s15  ;;  %s4389_s15 = sld [smem:[#allocation8 + $0x2e]]  ;;  %v3026_v38 = vld [vmem:[#allocation2 + $0x8] sm:$0xff] }
 0x386   :  { %v1121_v17 = vadd.f32 %v5044_v35, %v1065_v51  ;;  %v5049_v51 = vld [vmem:[#allocation99_spill] sm:$0xff] }
 0x387   :  { %v4245_v10 = vpop.permute.xlu1 %1624  ;;  %v4247_v0 = vpop.permute.xlu0 %1636  ;;  %v1066_v46 = vadd.f32 %v5047_v31, %v1008_v26 }
 0x388   :  { %v1179_v62 = vadd.f32 %v5048_v21, %v1121_v17 }
 0x389   :  { %2290 = vrot.lane.b32.xlu0 %v2285_v20, %s3117_s2  ;;  %2288 = vrot.lane.b32.xlu1 %v2284_v28, %s3117_s2  ;;  %v4273_v20 = vld [vmem:[#allocation3 + $0x3] sm:$0xff]  ;;  %v1226_v28 = vstv %s4240_s14  ;;  %s4385_s14 = sld [smem:[#allocation8 + $0x3]] }
 0x38a   :  { %5046 = vst [vmem:[#allocation84_spill] sm:$0xff] %v4273_v20  ;;  %v2398_v12 = vmul.f32 %v2397_v61, %v4273_v20  ;;  %v2454_v31 = vmul.f32 %v2453_v52, %v4273_v20  ;;  %v1228_v21 = vmul.f32 %v1226_v28, %v4975_v11 }
 0x38b   :  { %v4262_v53 = vpop.permute.xlu1 %1638  ;;  %v4264_v19 = vpop.permute.xlu0 %1652 }
 0x38d   :  { %2346 = vrot.lane.b32.xlu0 %v2341_v8, %s3119_s16  ;;  %2344 = vrot.lane.b32.xlu1 %v2340_v33, %s3119_s16  ;;  %v1122_v8 = vadd.f32 %v5049_v51, %v1066_v46  ;;  %v1227_v33 = vmul.f32 %v1226_v28, %v4971_v57  ;;  %v2455_v57 = vmul.f32 %v2453_v52, %v4270_v25  ;;  %v4312_v51 = vld [vmem:[#allocation3 + $0x4] sm:$0xff] }
 0x38e   :  { %5052 = vst [vmem:[#allocation92_spill] sm:$0xff] %v4312_v51 }
 0x38f   :  { %v4284_v60 = vpop.permute.xlu1 %1654  ;;  %v4286_v45 = vpop.permute.xlu0 %1666  ;;  %v1180_v26 = vadd.f32 %v3698_v23, %v1122_v8  ;;  %v1229_v35 = vadd.f32 %v1227_v33, %v1179_v62 }
 0x391   :  { %2404 = vrot.lane.b32.xlu0 %v2399_v59, %s3121_s24  ;;  %2402 = vrot.lane.b32.xlu1 %v2398_v12, %s3121_s24  ;;  %v1261_v46 = vadd.f32 %v3739_v63, %v1229_v35  ;;  %v4309_v59 = vld [vmem:[#allocation3 + $0xc] sm:$0xff]  ;;  %v2511_v12 = vstv %s4275_s18  ;;  %v1230_v23 = vadd.f32 %v1228_v21, %v1180_v26  ;;  %v2567_v35 = vstv %s4293_s22  ;;  %s4393_s18 = sld [smem:[#allocation8 + $0x1d]] }
 0x392   :  { %5051 = vst [vmem:[#allocation77_spill] sm:$0xff] %v4309_v59  ;;  %v2513_v28 = vmul.f32 %v2511_v12, %v4309_v59  ;;  %v2512_v8 = vmul.f32 %v2511_v12, %v4312_v51  ;;  %s4455_s22 = sld [smem:[#allocation8 + $0x35]] }
 0x393   :  { %v4301_v17 = vpop.permute.xlu1 %1668  ;;  %v4303_v61 = vpop.permute.xlu0 %1680  ;;  %v1319_v62 = vadd.f32 %v3791_v22, %v1261_v46  ;;  %v1262_v33 = vadd.f32 %v3752_v13, %v1230_v23  ;;  %v2568_v46 = vmul.f32 %v2567_v35, %v4312_v51  ;;  %v4344_v23 = vld [vmem:[#allocation3 + $0xe] sm:$0xff] }
 0x394   :  { %5050 = vst [vmem:[#allocation73_spill] sm:$0xff] %v4301_v17  ;;  %5054 = vst [vmem:[#allocation85_spill] sm:$0xff] %v4344_v23 }
 0x395   :  { %2460 = vrot.lane.b32.xlu0 %v2455_v57, %s3122_s28  ;;  %2458 = vrot.lane.b32.xlu1 %v2454_v31, %s3122_s28  ;;  %v1375_v52 = vadd.f32 %v3833_v54, %v1319_v62  ;;  %v1320_v22 = vadd.f32 %v3802_v32, %v1262_v33  ;;  %v4337_v57 = vstv %s4298_s26  ;;  %v2569_v54 = vmul.f32 %v2567_v35, %v4309_v59  ;;  %s4495_s26 = sld [smem:[#allocation8 + $0x1f]] }
 0x396   :  { %5053 = vst [vmem:[#allocation80_spill] sm:$0xff] %v4337_v57  ;;  %v2651_v62 = vstv %s4314_s27  ;;  %v4351_v32 = vstv %s72_s5  ;;  %s4506_s27 = sld [smem:[#allocation8 + $0x3d]]  ;;  %s4567_s5 = sld [smem:[#allocation8 + $0x42]] }
 0x397   :  { %v4321_v63 = vpop.permute.xlu1 %1682  ;;  %v4323_v11 = vpop.permute.xlu0 %1694  ;;  %v1399_v26 = vadd.f32 %v3856_v39, %v1375_v52  ;;  %v1376_v21 = vadd.f32 %v3841_v41, %v1320_v22  ;;  %5056 = vst [vmem:[#allocation74_spill] sm:$0xff] %v4351_v32  ;;  %v2653_v52 = vmul.f32 %v2651_v62, %v4344_v23 }
 0x399   :  { %2518 = vrot.lane.b32.xlu0 %v2513_v28, %s3124_s7  ;;  %2516 = vrot.lane.b32.xlu1 %v2512_v8, %s3124_s7  ;;  %v4347_v28 = vld [vmem:[#allocation3 + $0x6] sm:$0xff]  ;;  %v1400_v39 = vadd.f32 %v3858_v37, %v1376_v21 }
 0x39a   :  { %5055 = vst [vmem:[#allocation100_spill] sm:$0xff] %v4347_v28  ;;  %v2652_v35 = vmul.f32 %v2651_v62, %v4347_v28 }
 0x39b   :  { %v4339_v31 = vpop.permute.xlu1 %1696  ;;  %v1414_v13 = vpop.permute.xlu0 %1413 }
 0x39c   :  { %v1419_v12 = vadd.f32 %v1414_v13, %v1399_v26  ;;  %v2707_v13 = vstv %s4330_s4  ;;  %s4550_s4 = sld [smem:[#allocation8 + $0x41]] }
 0x39d   :  { %2574 = vrot.lane.b32.xlu0 %v2569_v54, %s3125_s12  ;;  %2572 = vrot.lane.b32.xlu1 %v2568_v46, %s3125_s12  ;;  %v2709_v21 = vmul.f32 %v2707_v13, %v4344_v23  ;;  %v1847_v23 = vstv %s4391_s17  ;;  %s4645_s17 = sld [smem:[#allocation8 + $0x5a]] }
 0x39e   :  { %v1422_v8 = vmul.f32 %v4337_v57, %v1419_v12  ;;  %v2708_v12 = vmul.f32 %v2707_v13, %v4347_v28  ;;  %v1853_v28 = vstv %s4393_s18  ;;  %s4657_s18 = sld [smem:[#allocation8 + $0x5d]] }
 0x39f   :  { %v1416_v41 = vpop.permute.xlu1 %1415  ;;  %v4357_v33 = vpop.permute.xlu0 %1708 }
 0x3a0   :  { %v1425_v22 = vadd.f32 %v4351_v32, %v1422_v8  ;;  %v1420_v26 = vadd.f32 %v1416_v41, %v1400_v39  ;;  %v1999_v39 = vstv %s4349_s0  ;;  %s2972_s0 = sld [smem:[#allocation8 + $0x45]] }
 0x3a1   :  { %2658 = vrot.lane.b32.xlu0 %v2653_v52, %s3117_s2  ;;  %2656 = vrot.lane.b32.xlu1 %v2652_v35, %s3117_s2  ;;  %s4383_s2 = sld [smem:[#allocation8 + $0x2d]]  ;;  %v2000_v52 = vmul.f32 %v1999_v39, %v4078_v49  ;;  %v1987_v35 = vmul.f32 %v1985_v44, %v4087_v43 }
 0x3a2   :  { %v1423_v37 = vmul.f32 %v4337_v57, %v1420_v26  ;;  %1428 = vst.msk [vmem:[#allocation11] sm:$0xff] %vm1427_vm3, %v1425_v22  ;;  %v2015_v22 = vstv %s4363_s8  ;;  %v1479_v26 = vstv %s4365_s9  ;;  %v2071_v57 = vstv %s4389_s15  ;;  %s2973_s8 = sld [smem:[#allocation8 + $0x46]]  ;;  %s2976_s9 = sld [smem:[#allocation8 + $0x49]] }
 0x3a3   :  { %v4373_v54 = vpop.permute.xlu1 %1710  ;;  %v4375_v46 = vpop.permute.xlu0 %1722  ;;  %v2016_v49 = vmul.f32 %v2015_v22, %v4164_v9  ;;  %v1480_v44 = vmul.f32 %v1479_v26, %v3871_v30  ;;  %v1481_v59 = vmul.f32 %v1479_v26, %v3880_v3  ;;  %s4638_s15 = sld [smem:[#allocation8 + $0x59]] }
 0x3a4   :  { %5057 = vst [vmem:[#allocation88_spill] sm:$0xff] %v4375_v46  ;;  %v1426_v62 = vadd.f32 %v4351_v32, %v1423_v37 }
 0x3a5   :  { %2714 = vrot.lane.b32.xlu0 %v2709_v21, %s3119_s16  ;;  %2712 = vrot.lane.b32.xlu1 %v2708_v12, %s3119_s16  ;;  %v2001_v21 = vmul.f32 %v1999_v39, %v4087_v43  ;;  %v1485_v12 = vstv %s4371_s10  ;;  %v1514_v32 = vadd.f32 %v4095_v16, %v1480_v44  ;;  %v1515_v17 = vadd.f32 %v4109_v5, %v1481_v59  ;;  %s2977_s10 = sld [smem:[#allocation8 + $0x4a]] }
 0x3a6   :  { %1429 = vst.msk [vmem:[#allocation11 + $0x8] sm:$0xff] %vm1427_vm3, %v1426_v62  ;;  %v1486_v43 = vmul.f32 %v1485_v12, %v3871_v30  ;;  %v1487_v16 = vmul.f32 %v1485_v12, %v3880_v3  ;;  %v1854_v5 = vmul.f32 %v1853_v28, %v4059_v34  ;;  %v2115_v59 = vstv %s4419_s29  ;;  %s4675_s29 = sld [smem:[#allocation8 + $0x61]] }
 0x3a7   :  { %v4396_v8 = vpop.permute.xlu1 %1724  ;;  %v4398_v41 = vpop.permute.xlu0 %1736  ;;  %v2057_v62 = vstv %s4383_s2  ;;  %v1572_v26 = vadd.f32 %v4156_v36, %v1514_v32  ;;  %v1848_v32 = vmul.f32 %v1847_v23, %v4059_v34  ;;  %s2981_s2 = sld [smem:[#allocation8 + $0x4e]] }
 0x3a8   :  { %5058 = vst [vmem:[#allocation93_spill] sm:$0xff] %v4396_v8  ;;  %v2058_v25 = vmul.f32 %v2057_v62, %v4164_v9  ;;  %v2059_v8 = vmul.f32 %v2057_v62, %v4167_v1  ;;  %v1528_v12 = vadd.f32 %v4111_v18, %v1486_v43  ;;  %v1849_v62 = vmul.f32 %v1847_v23, %v4064_v29 }
 0x3a9   :  { %2004 = vrot.lane.b32.xlu0 %v2000_v52, %s3120_s21  ;;  %1992 = vrot.lane.b32.xlu1 %v1987_v35, %s3120_s21  ;;  %v1491_v52 = vstv %s4379_s13  ;;  %v1497_v35 = vstv %s4385_s14  ;;  %v1628_v46 = vadd.f32 %v4227_v42, %v1572_v26  ;;  %v1573_v18 = vadd.f32 %v4176_v2, %v1515_v17  ;;  %s2980_s13 = sld [smem:[#allocation8 + $0x4d]]  ;;  %s2984_s14 = sld [smem:[#allocation8 + $0x51]] }
 0x3aa   :  { %v1493_v20 = vmul.f32 %v1491_v52, %v3880_v3  ;;  %v1499_v14 = vmul.f32 %v3026_v38, %v1497_v35  ;;  %v2072_v3 = vmul.f32 %v2071_v57, %v4164_v9  ;;  %v1586_v42 = vadd.f32 %v4178_v7, %v1528_v12 }
 0x3ab   :  { %v4410_v13 = vpop.permute.xlu1 %1738  ;;  %v4412_v37 = vpop.permute.xlu0 %1752  ;;  %v1686_v9 = vadd.f32 %v4303_v61, %v1628_v46  ;;  %v1629_v7 = vadd.f32 %v4245_v10, %v1573_v18 }
 0x3ac   :  { %v1642_v17 = vadd.f32 %v4247_v0, %v1586_v42  ;;  %v5059_v42 = vld [vmem:[#allocation88_spill] sm:$0xff] }
 0x3ad   :  { %2020 = vrot.lane.b32.xlu0 %v2016_v49, %s3121_s24  ;;  %2006 = vrot.lane.b32.xlu1 %v2001_v21, %s3120_s21  ;;  %v2017_v49 = vmul.f32 %v2015_v22, %v4167_v1  ;;  %v3025_v21 = vld [vmem:[#allocation2] sm:$0xff]  ;;  %v1859_v22 = vstv %s4408_s19  ;;  %v1742_v61 = vadd.f32 %v4398_v41, %v1686_v9  ;;  %v1687_v10 = vadd.f32 %v4321_v63, %v1629_v7  ;;  %s4668_s19 = sld [smem:[#allocation8 + $0x5e]] }
 0x3ae   :  { %v1492_v44 = vmul.f32 %v3025_v21, %v1491_v52  ;;  %v1498_v30 = vmul.f32 %v3025_v21, %v1497_v35  ;;  %v1529_v52 = vadd.f32 %v4124_v47, %v1487_v16  ;;  %v2129_v35 = vstv %s4437_s20  ;;  %s2990_s20 = sld [smem:[#allocation8 + $0x57]] }
 0x3af   :  { %v4431_v39 = vpop.permute.xlu1 %1754  ;;  %v4433_v51 = vpop.permute.xlu0 %1766  ;;  %v1700_v0 = vadd.f32 %v4323_v11, %v1642_v17  ;;  %v1743_v63 = vadd.f32 %v4410_v13, %v1687_v10  ;;  %v2130_v21 = vmul.f32 %v2129_v35, %v4202_v24 }
 0x3b0   :  { %v1542_v2 = vadd.f32 %v4126_v15, %v1492_v44  ;;  %v1587_v47 = vadd.f32 %v4191_v50, %v1529_v52  ;;  %v1543_v50 = vadd.f32 %v4140_v6, %v1493_v20  ;;  %v1558_v41 = vadd.f32 %v4142_v58, %v1498_v30 }
 0x3b1   :  { %2062 = vrot.lane.b32.xlu0 %v2058_v25, %s3122_s28  ;;  %2022 = vrot.lane.b32.xlu1 %v2017_v49, %s3121_s24  ;;  %v2073_v25 = vmul.f32 %v2071_v57, %v4167_v1  ;;  %v4468_v1 = vmul.f32 %v1853_v28, %v4064_v29  ;;  %v4473_v57 = vmul.f32 %v1859_v22, %v4059_v34  ;;  %v2171_v44 = vstv %s4455_s22  ;;  %s2947_s22 = sld [smem:[#allocation8 + $0x2c]] }
 0x3b2   :  { %v2116_v28 = vmul.f32 %v2115_v59, %v4202_v24  ;;  %v1600_v15 = vadd.f32 %v4193_v56, %v1542_v2  ;;  %v1643_v49 = vadd.f32 %v4262_v53, %v1587_v47  ;;  %v1758_v11 = vadd.f32 %v4412_v37, %v1700_v0 }
 0x3b3   :  { %v4450_v36 = vpop.permute.xlu1 %1768  ;;  %v4452_v38 = vpop.permute.xlu0 %1780  ;;  %v1601_v6 = vadd.f32 %v4211_v48, %v1543_v50  ;;  %v1614_v58 = vadd.f32 %v4213_v55, %v1558_v41  ;;  %v1559_v30 = vadd.f32 %v4154_v40, %v1499_v14 }
 0x3b4   :  { %v1658_v56 = vadd.f32 %v4264_v19, %v1600_v15  ;;  %v1701_v26 = vadd.f32 %v4339_v31, %v1643_v49  ;;  %v2267_v49 = vstv %s4527_s30  ;;  %s4728_s30 = sld [smem:[#allocation8 + $0x40]] }
 0x3b5   :  { %2064 = vrot.lane.b32.xlu1 %v2059_v8, %s3122_s28  ;;  %2076 = vrot.lane.b32.xlu0 %v2072_v3, %s3122_s28  ;;  %v2117_v8 = vmul.f32 %v2115_v59, %v4199_v4  ;;  %v1659_v48 = vadd.f32 %v4284_v60, %v1601_v6  ;;  %v1672_v55 = vadd.f32 %v4286_v45, %v1614_v58  ;;  %v2311_v58 = vstv %s4550_s4  ;;  %s4734_s4 = sld [smem:[#allocation8 + $0x44]] }
 0x3b6   :  { %v1714_v19 = vadd.f32 %v4357_v33, %v1658_v56  ;;  %v1759_v12 = vadd.f32 %v4431_v39, %v1701_v26  ;;  %v2131_v60 = vmul.f32 %v2129_v35, %v4199_v4  ;;  %v2172_v45 = vmul.f32 %v2171_v44, %v4202_v24 }
 0x3b7   :  { %v4480_v23 = vpop.permute.xlu1 %1782  ;;  %v1795_v46 = vpop.permute.xlu0 %1794  ;;  %v1715_v18 = vadd.f32 %v4373_v54, %v1659_v48  ;;  %v1728_v39 = vadd.f32 %v5059_v42, %v1672_v55  ;;  %v2325_v26 = vstv %s4567_s5  ;;  %v2367_v55 = vstv %s2972_s0  ;;  %s4738_s5 = sld [smem:[#allocation8 + $0x48]]  ;;  %s4743_s0 = sld [smem:[#allocation8 + $0x39]] }
 0x3b8   :  { %v1800_v43 = vadd.f32 %v1795_v46, %v1742_v61  ;;  %v1772_v3 = vadd.f32 %v4433_v51, %v1714_v19  ;;  %v2173_v61 = vmul.f32 %v2171_v44, %v4199_v4  ;;  %v2253_v46 = vstv %s4506_s27  ;;  %s4719_s27 = sld [smem:[#allocation8 + $0x3c]] }
 0x3b9   :  { %2078 = vrot.lane.b32.xlu1 %v2073_v25, %s3122_s28  ;;  %2120 = vrot.lane.b32.xlu0 %v2116_v28, %s3124_s7  ;;  %v1615_v25 = vadd.f32 %v4225_v27, %v1559_v30  ;;  %v1865_v27 = vstv %s4495_s26  ;;  %v1773_v59 = vadd.f32 %v4450_v36, %v1715_v18  ;;  %v1786_v52 = vadd.f32 %v4452_v38, %v1728_v39  ;;  %v5064_v18 = vld [vmem:[#allocation84_spill] sm:$0xff]  ;;  %s4706_s26 = sld [smem:[#allocation8 + $0x34]] }
 0x3ba   :  { %v4500_v16 = vadd.f32 %v1848_v32, %v1800_v43  ;;  %v2185_v32 = vstv %s4485_s23  ;;  %v1861_v28 = vmul.f32 %v1859_v22, %v4064_v29  ;;  %v2425_v39 = vstv %s2976_s9  ;;  %s4700_s23 = sld [smem:[#allocation8 + $0x30]]  ;;  %s4750_s9 = sld [smem:[#allocation8 + $0x3a]] }
 0x3bb   :  { %v1797_v20 = vpop.permute.xlu1 %1796  ;;  %v1809_v53 = vpop.permute.xlu0 %1808  ;;  %v2186_v47 = vmul.f32 %v2185_v32, %v4202_v24  ;;  %v2187_v43 = vmul.f32 %v2185_v32, %v4199_v4 }
 0x3bc   :  { %v1801_v13 = vadd.f32 %v1797_v20, %v1743_v63  ;;  %v1814_v37 = vadd.f32 %v1809_v53, %v1758_v11 }
 0x3bd   :  { %2122 = vrot.lane.b32.xlu1 %v2117_v8, %s3124_s7  ;;  %2134 = vrot.lane.b32.xlu0 %v2130_v21, %s3124_s7  ;;  %v5061_v8 = vld [vmem:[#allocation93_spill] sm:$0xff]  ;;  %v5062_v21 = vld [vmem:[#allocation67_spill] sm:$0xff] }
 0x3be   :  { %v4517_v31 = vadd.f32 %v1849_v62, %v1801_v13  ;;  %v4519_v33 = vadd.f32 %v1854_v5, %v1814_v37  ;;  %v5060_v5 = vld [vmem:[#allocation73_spill] sm:$0xff]  ;;  %v2312_v44 = vmul.f32 %v2311_v58, %v5062_v21  ;;  %v5063_v37 = vld [vmem:[#allocation62_spill] sm:$0xff]  ;;  %v2326_v48 = vmul.f32 %v2325_v26, %v5062_v21 }
 0x3bf   :  { %v1811_v40 = vpop.permute.xlu1 %1810  ;;  %v1823_v14 = vpop.permute.xlu0 %1822  ;;  %v1673_v9 = vadd.f32 %v5060_v5, %v1615_v25  ;;  %v2313_v30 = vmul.f32 %v2311_v58, %v5063_v37  ;;  %v2327_v25 = vmul.f32 %v2325_v26, %v5063_v37  ;;  %v2369_v32 = vmul.f32 %v2367_v55, %v5063_v37  ;;  %v5065_v5 = vld [vmem:[#allocation70_spill] sm:$0xff] }
 0x3c0   :  { %v1815_v51 = vadd.f32 %v1811_v40, %v1759_v12  ;;  %v1828_v62 = vadd.f32 %v1823_v14, %v1772_v3  ;;  %v2368_v40 = vmul.f32 %v2367_v55, %v5062_v21  ;;  %v2383_v14 = vstv %s2973_s8  ;;  %s4747_s8 = sld [smem:[#allocation8 + $0x4c]] }
 0x3c1   :  { %2136 = vrot.lane.b32.xlu1 %v2131_v60, %s3124_s7  ;;  %2176 = vrot.lane.b32.xlu0 %v2172_v45, %s3125_s12  ;;  %v1729_v36 = vadd.f32 %v5061_v8, %v1673_v9  ;;  %v2384_v42 = vmul.f32 %v2383_v14, %v5064_v18  ;;  %v2385_v9 = vmul.f32 %v2383_v14, %v5065_v5  ;;  %v2621_v55 = vstv %s4638_s15 }
 0x3c2   :  { %v4536_v54 = vadd.f32 %v4468_v1, %v1815_v51  ;;  %v4539_v2 = vadd.f32 %v4473_v57, %v1828_v62  ;;  %v4548_v1 = vld [vmem:[#allocation3 + $0x1] sm:$0xff]  ;;  %v1866_v57 = vmul.f32 %v1865_v27, %v4059_v34  ;;  %v4564_v34 = vld [vmem:[#allocation3 + $0x9] sm:$0xff] }
 0x3c3   :  { %v1825_v7 = vpop.permute.xlu1 %1824  ;;  %v1837_v17 = vpop.permute.xlu0 %1836  ;;  %v1787_v24 = vadd.f32 %v4480_v23, %v1729_v36  ;;  %v2254_v50 = vmul.f32 %v2253_v46, %v4548_v1  ;;  %v1867_v23 = vmul.f32 %v1865_v27, %v4064_v29  ;;  %v2255_v11 = vmul.f32 %v2253_v46, %v4564_v34  ;;  %v5066_v36 = vld [vmem:[#allocation92_spill] sm:$0xff] }
 0x3c4   :  { %v1829_v35 = vadd.f32 %v1825_v7, %v1773_v59  ;;  %v1842_v38 = vadd.f32 %v1837_v17, %v1786_v52  ;;  %v2268_v6 = vmul.f32 %v2267_v49, %v4548_v1  ;;  %v2269_v53 = vmul.f32 %v2267_v49, %v4564_v34 }
 0x3c5   :  { %2178 = vrot.lane.b32.xlu1 %v2173_v61, %s3125_s12  ;;  %2190 = vrot.lane.b32.xlu0 %v2186_v47, %s3125_s12  ;;  %v2426_v27 = vmul.f32 %v2425_v39, %v5064_v18  ;;  %v2439_v59 = vstv %s2977_s10  ;;  %v2427_v17 = vmul.f32 %v2425_v39, %v5065_v5  ;;  %v2483_v47 = vstv %s2980_s13  ;;  %s4756_s10 = sld [smem:[#allocation8 + $0x50]] }
 0x3c6   :  { %v4556_v15 = vadd.f32 %v1861_v28, %v1829_v35  ;;  %v4558_v22 = vadd.f32 %v1866_v57, %v1842_v38  ;;  %v2440_v61 = vmul.f32 %v2439_v59, %v5064_v18  ;;  %v2441_v8 = vmul.f32 %v2439_v59, %v5065_v5  ;;  %s4765_s13 = sld [smem:[#allocation8 + $0x58]] }
 0x3c7   :  { %v1839_v10 = vpop.permute.xlu1 %1838  ;;  %v4560_v0 = vpop.permute.xlu0 %1876  ;;  %v2484_v35 = vmul.f32 %v2483_v47, %v5066_v36  ;;  %v2497_v38 = vstv %s2981_s2  ;;  %v2635_v39 = vstv %s4645_s17  ;;  %s2995_s2 = sld [smem:[#allocation8 + $0x5c]] }
 0x3c8   :  { %v1843_v41 = vadd.f32 %v1839_v10, %v1787_v24  ;;  %v5067_v10 = vld [vmem:[#allocation77_spill] sm:$0xff] }
 0x3c9   :  { %2192 = vrot.lane.b32.xlu1 %v2187_v43, %s3125_s12  ;;  %2258 = vrot.lane.b32.xlu0 %v2254_v50, %s3118_s11  ;;  %v2485_v43 = vmul.f32 %v2483_v47, %v5067_v10  ;;  %v2498_v50 = vmul.f32 %v2497_v38, %v5066_v36 }
 0x3ca   :  { %v4572_v56 = vadd.f32 %v1867_v23, %v1843_v41  ;;  %v2539_v41 = vstv %s2984_s14  ;;  %s2999_s14 = sld [smem:[#allocation8 + $0x60]] }
 0x3cb   :  { %v4574_v63 = vpop.permute.xlu1 %1878  ;;  %v4576_v4 = vpop.permute.xlu0 %1890 }
 0x3cd   :  { %2260 = vrot.lane.b32.xlu1 %v2255_v11, %s3118_s11  ;;  %2272 = vrot.lane.b32.xlu0 %v2268_v6, %s3118_s11  ;;  %v2499_v11 = vmul.f32 %v2497_v38, %v5067_v10  ;;  %v2540_v6 = vmul.f32 %v2539_v41, %v5066_v36 }
 0x3cf   :  { %v4583_v29 = vpop.permute.xlu1 %1892  ;;  %v4585_v20 = vpop.permute.xlu0 %1904 }
 0x3d1   :  { %2274 = vrot.lane.b32.xlu1 %v2269_v53, %s3118_s11  ;;  %2316 = vrot.lane.b32.xlu0 %v2312_v44, %s3119_s16  ;;  %v2541_v44 = vmul.f32 %v2539_v41, %v5067_v10  ;;  %v5068_v41 = vld [vmem:[#allocation100_spill] sm:$0xff] }
 0x3d3   :  { %v4592_v19 = vpop.permute.xlu1 %1906  ;;  %v4594_v13 = vpop.permute.xlu0 %1920 }
 0x3d4   :  { %v1926_v37 = vadd.f32 %v4594_v13, %v4558_v22 }
 0x3d5   :  { %2318 = vrot.lane.b32.xlu1 %v2313_v30, %s3119_s16  ;;  %2330 = vrot.lane.b32.xlu0 %v2326_v48, %s3119_s16  ;;  %v4654_v48 = vld [vmem:[#allocation3 + $0x5] sm:$0xff] }
 0x3d7   :  { %v1923_v12 = vpop.permute.xlu1 %1922  ;;  %v4600_v3 = vpop.permute.xlu0 %1934 }
 0x3d8   :  { %v1927_v30 = vadd.f32 %v1923_v12, %v4572_v56  ;;  %v2622_v56 = vmul.f32 %v2621_v55, %v4654_v48 }
 0x3d9   :  { %2332 = vrot.lane.b32.xlu1 %v2327_v25, %s3119_s16  ;;  %2372 = vrot.lane.b32.xlu0 %v2368_v40, %s3120_s21 }
 0x3db   :  { %v4606_v60 = vpop.permute.xlu1 %1936  ;;  %v4608_v45 = vpop.permute.xlu0 %1948 }
 0x3dd   :  { %2374 = vrot.lane.b32.xlu1 %v2369_v32, %s3120_s21  ;;  %2388 = vrot.lane.b32.xlu0 %v2384_v42, %s3121_s24  ;;  %v4665_v42 = vld [vmem:[#allocation3 + $0xd] sm:$0xff] }
 0x3df   :  { %v4614_v51 = vpop.permute.xlu1 %1950  ;;  %v4616_v62 = vpop.permute.xlu0 %1962 }
 0x3e1   :  { %2390 = vrot.lane.b32.xlu1 %v2385_v9, %s3121_s24  ;;  %2430 = vrot.lane.b32.xlu0 %v2426_v27, %s3122_s28  ;;  %s4632_s24 = sld [smem:[#allocation8 + $0x52]] }
 0x3e3   :  { %v4622_v52 = vpop.permute.xlu1 %1964  ;;  %v1977_v7 = vpop.permute.xlu0 %1976 }
 0x3e4   :  { %v1982_v25 = vadd.f32 %v1977_v7, %v1926_v37 }
 0x3e5   :  { %2432 = vrot.lane.b32.xlu1 %v2427_v17, %s3122_s28  ;;  %2444 = vrot.lane.b32.xlu0 %v2440_v61, %s3122_s28  ;;  %v2623_v17 = vmul.f32 %v2621_v55, %v4665_v42  ;;  %v2636_v61 = vmul.f32 %v2635_v39, %v4654_v48  ;;  %v2735_v55 = vstv %s4675_s29 }
 0x3e7   :  { %v1979_v46 = vpop.permute.xlu1 %1978  ;;  %v4628_v28 = vpop.permute.xlu0 %1990  ;;  %v2553_v58 = vstv %s4632_s24 }
 0x3e8   :  { %v2554_v26 = vmul.f32 %v2553_v58, %v5066_v36  ;;  %v1983_v40 = vadd.f32 %v1979_v46, %v1927_v30  ;;  %v2555_v22 = vmul.f32 %v2553_v58, %v5067_v10 }
 0x3e9   :  { %2446 = vrot.lane.b32.xlu1 %v2441_v8, %s3122_s28  ;;  %2488 = vrot.lane.b32.xlu0 %v2484_v35, %s3124_s7  ;;  %v2679_v8 = vstv %s4657_s18 }
 0x3eb   :  { %v2035_v57 = vpop.permute.xlu1 %2034  ;;  %v2037_v24 = vpop.permute.xlu0 %2036 }
 0x3ec   :  { %v2040_v13 = vadd.f32 %v2035_v57, %v1982_v25  ;;  %v2041_v12 = vadd.f32 %v2037_v24, %v1983_v40 }
 0x3ed   :  { %2490 = vrot.lane.b32.xlu1 %v2485_v43, %s3124_s7  ;;  %2502 = vrot.lane.b32.xlu0 %v2498_v50, %s3124_s7  ;;  %v2637_v50 = vmul.f32 %v2635_v39, %v4665_v42 }
 0x3ef   :  { %v2091_v49 = vpop.permute.xlu1 %2090  ;;  %v2093_v23 = vpop.permute.xlu0 %2092 }
 0x3f0   :  { %v2096_v9 = vadd.f32 %v2091_v49, %v2040_v13  ;;  %v2097_v27 = vadd.f32 %v2093_v23, %v2041_v12  ;;  %v2680_v49 = vmul.f32 %v2679_v8, %v5068_v41 }
 0x3f1   :  { %2504 = vrot.lane.b32.xlu1 %v2499_v11, %s3124_s7  ;;  %2544 = vrot.lane.b32.xlu0 %v2540_v6, %s3125_s12  ;;  %s4661_s7 = sld [smem:[#allocation8 + $0x3b]]  ;;  %v2693_v6 = vstv %s4668_s19 }
 0x3f2   :  { %v2694_v30 = vmul.f32 %v2693_v6, %v5068_v41 }
 0x3f3   :  { %v2149_v53 = vpop.permute.xlu1 %2148  ;;  %v2151_v21 = vpop.permute.xlu0 %2150 }
 0x3f4   :  { %v2154_v47 = vadd.f32 %v2149_v53, %v2096_v9  ;;  %v2155_v46 = vadd.f32 %v2151_v21, %v2097_v27 }
 0x3f5   :  { %2546 = vrot.lane.b32.xlu1 %v2541_v44, %s3125_s12  ;;  %2558 = vrot.lane.b32.xlu0 %v2554_v26, %s3125_s12  ;;  %v5069_v26 = vld [vmem:[#allocation85_spill] sm:$0xff] }
 0x3f6   :  { %v2681_v37 = vmul.f32 %v2679_v8, %v5069_v26 }
 0x3f7   :  { %v2205_v14 = vpop.permute.xlu1 %2204  ;;  %v2207_v32 = vpop.permute.xlu0 %2206  ;;  %v2233_v35 = vstv %s4661_s7 }
 0x3f8   :  { %v2210_v38 = vadd.f32 %v2205_v14, %v2154_v47  ;;  %v2211_v57 = vadd.f32 %v2207_v32, %v2155_v46  ;;  %v2234_v23 = vmul.f32 %v2233_v35, %v4548_v1  ;;  %v2235_v11 = vmul.f32 %v2233_v35, %v4564_v34 }
 0x3f9   :  { %2560 = vrot.lane.b32.xlu1 %v2555_v22, %s3125_s12  ;;  %2626 = vrot.lane.b32.xlu0 %v2622_v56, %s3118_s11  ;;  %v2695_v22 = vmul.f32 %v2693_v6, %v5069_v26  ;;  %v2736_v56 = vmul.f32 %v2735_v55, %v5068_v41  ;;  %v2601_v47 = vstv %s2990_s20 }
 0x3fa   :  { %v2236_v58 = vadd.f32 %v2234_v23, %v2210_v38  ;;  %v2237_v53 = vadd.f32 %v2235_v11, %v2211_v57 }
 0x3fb   :  { %v2289_v59 = vpop.permute.xlu1 %2288  ;;  %v2291_v7 = vpop.permute.xlu0 %2290 }
 0x3fc   :  { %v2294_v25 = vadd.f32 %v2289_v59, %v2236_v58  ;;  %v2295_v40 = vadd.f32 %v2291_v7, %v2237_v53 }
 0x3fd   :  { %2628 = vrot.lane.b32.xlu1 %v2623_v17, %s3118_s11  ;;  %2640 = vrot.lane.b32.xlu0 %v2636_v61, %s3118_s11  ;;  %v2737_v61 = vmul.f32 %v2735_v55, %v5069_v26  ;;  %v1896_v55 = vadd.f32 %v4576_v4, %v4519_v33  ;;  %v1897_v33 = vadd.f32 %v4583_v29, %v4536_v54 }
 0x3fe   :  { %v1910_v4 = vadd.f32 %v4585_v20, %v4539_v2  ;;  %v1911_v29 = vadd.f32 %v4592_v19, %v4556_v15  ;;  %v3030_v15 = vld [vmem:[#allocation3 + $0x8] sm:$0xff] }
 0x3ff   :  { %v2345_v24 = vpop.permute.xlu1 %2344  ;;  %v2347_v43 = vpop.permute.xlu0 %2346 }
 0x400   :  { %v2350_v13 = vadd.f32 %v2345_v24, %v2294_v25  ;;  %v2351_v12 = vadd.f32 %v2347_v43, %v2295_v40  ;;  %v2602_v43 = vmul.f32 %v2601_v47, %v4654_v48 }
 0x401   :  { %2642 = vrot.lane.b32.xlu1 %v2637_v50, %s3118_s11  ;;  %2684 = vrot.lane.b32.xlu0 %v2680_v49, %s3119_s16  ;;  %v2603_v50 = vmul.f32 %v2601_v47, %v4665_v42 }
 0x403   :  { %v2403_v21 = vpop.permute.xlu1 %2402  ;;  %v2405_v44 = vpop.permute.xlu0 %2404 }
 0x404   :  { %v2408_v39 = vadd.f32 %v2403_v21, %v2350_v13  ;;  %v2409_v9 = vadd.f32 %v2405_v44, %v2351_v12  ;;  %v3027_v13 = vld [vmem:[#allocation2 + $0x6] sm:$0xff] }
 0x405   :  { %2686 = vrot.lane.b32.xlu1 %v2681_v37, %s3119_s16  ;;  %2698 = vrot.lane.b32.xlu0 %v2694_v30, %s3119_s16  ;;  %v2043_v37 = vstv %s2947_s22  ;;  %v1883_v30 = vadd.f32 %v4574_v63, %v4517_v31  ;;  %v3028_v31 = vld [vmem:[#allocation2 + $0xe] sm:$0xff] }
 0x406   :  { %v2044_v12 = vmul.f32 %v3027_v13, %v2043_v37  ;;  %v2045_v63 = vmul.f32 %v3028_v31, %v2043_v37  ;;  %v2353_v37 = vstv %s4734_s4 }
 0x407   :  { %v2459_v14 = vpop.permute.xlu1 %2458  ;;  %v2461_v32 = vpop.permute.xlu0 %2460 }
 0x408   :  { %v2464_v59 = vadd.f32 %v2459_v14, %v2408_v39  ;;  %v2465_v7 = vadd.f32 %v2461_v32, %v2409_v9  ;;  %v1941_v14 = vadd.f32 %v4606_v60, %v1883_v30  ;;  %v1954_v32 = vadd.f32 %v4608_v45, %v1896_v55 }
 0x409   :  { %2700 = vrot.lane.b32.xlu1 %v2695_v22, %s3119_s16  ;;  %2740 = vrot.lane.b32.xlu0 %v2736_v56, %s3120_s21  ;;  %v2099_v39 = vstv %s4700_s23  ;;  %v1955_v9 = vadd.f32 %v4614_v51, %v1897_v33  ;;  %v1969_v51 = vadd.f32 %v4622_v52, %v1911_v29  ;;  %v2467_v33 = vstv %s4747_s8 }
 0x40a   :  { %v2100_v54 = vmul.f32 %v3027_v13, %v2099_v39 }
 0x40b   :  { %v2517_v27 = vpop.permute.xlu1 %2516  ;;  %v2519_v17 = vpop.permute.xlu0 %2518 }
 0x40c   :  { %v2522_v46 = vadd.f32 %v2517_v27, %v2464_v59  ;;  %v2523_v8 = vadd.f32 %v2519_v17, %v2465_v7  ;;  %v1968_v27 = vadd.f32 %v4616_v62, %v1910_v4  ;;  %v2101_v59 = vmul.f32 %v3028_v31, %v2099_v39 }
 0x40d   :  { %2742 = vrot.lane.b32.xlu1 %v2737_v61, %s3120_s21  ;;  %v2157_v7 = vstv %s4706_s26 }
 0x40e   :  { %v2159_v19 = vmul.f32 %v3030_v15, %v2157_v7 }
 0x40f   :  { %v2573_v35 = vpop.permute.xlu1 %2572  ;;  %v2575_v38 = vpop.permute.xlu0 %2574 }
 0x410   :  { %v2578_v57 = vadd.f32 %v2573_v35, %v2522_v46  ;;  %v2579_v24 = vadd.f32 %v2575_v38, %v2523_v8  ;;  %v3029_v8 = vld [vmem:[#allocation3] sm:$0xff]  ;;  %v2239_v38 = vstv %s4719_s27 }
 0x411   :  { %v2158_v35 = vmul.f32 %v3029_v8, %v2157_v7 }
 0x412   :  { %v2604_v49 = vadd.f32 %v2602_v43, %v2578_v57  ;;  %v2605_v23 = vadd.f32 %v2603_v50, %v2579_v24  ;;  %v2240_v43 = vmul.f32 %v2239_v38, %v4548_v1  ;;  %v2241_v50 = vmul.f32 %v2239_v38, %v4564_v34 }
 0x413   :  { %v2657_v11 = vpop.permute.xlu1 %2656  ;;  %v2659_v6 = vpop.permute.xlu0 %2658 }
 0x414   :  { %v2662_v58 = vadd.f32 %v2657_v11, %v2604_v49  ;;  %v2663_v53 = vadd.f32 %v2659_v6, %v2605_v23  ;;  %v2297_v49 = vstv %s4728_s30 }
 0x417   :  { %v2713_v21 = vpop.permute.xlu1 %2712  ;;  %v2715_v44 = vpop.permute.xlu0 %2714 }
 0x418   :  { %v2718_v25 = vadd.f32 %v2713_v21, %v2662_v58  ;;  %v2719_v40 = vadd.f32 %v2715_v44, %v2663_v53  ;;  %v3031_v58 = vld [vmem:[#allocation3 + $0x2] sm:$0xff]  ;;  %v3032_v21 = vld [vmem:[#allocation3 + $0xa] sm:$0xff] }
 0x419   :  { %v2298_v53 = vmul.f32 %v3031_v58, %v2297_v49  ;;  %v2299_v44 = vmul.f32 %v3032_v21, %v2297_v49 }
 0x41a   :  { %2760 = vrot.lane.b32.xlu0 %v2718_v25, %s3119_s16  ;;  %2762 = vrot.lane.b32.xlu1 %v2719_v40, %s3119_s16  ;;  %v2411_v25 = vstv %s4738_s5 }
 0x41b   :  { %v1993_v22 = vpop.permute.xlu1 %1992  ;;  %v2005_v56 = vpop.permute.xlu0 %2004  ;;  %v2413_v39 = vmul.f32 %v2411_v25, %v5065_v5 }
 0x41c   :  { %v4717_v60 = vadd.f32 %v1993_v22, %v1941_v14  ;;  %v2010_v45 = vadd.f32 %v2005_v56, %v1954_v32  ;;  %v2354_v32 = vmul.f32 %v3031_v58, %v2353_v37  ;;  %v2355_v22 = vmul.f32 %v3032_v21, %v2353_v37 }
 0x41d   :  { %v2221_v56 = vstv %s4743_s0  ;;  %v2665_v58 = vstv %s2995_s2 }
 0x41e   :  { %2048 = vrot.lane.b32.xlu0 %v2044_v12, %s3122_s28  ;;  %2050 = vrot.lane.b32.xlu1 %v2045_v63, %s3122_s28  ;;  %v2412_v63 = vmul.f32 %v2411_v25, %v5064_v18  ;;  %v2667_v21 = vmul.f32 %v2665_v58, %v5069_v26 }
 0x41f   :  { %v2007_v17 = vpop.permute.xlu1 %2006  ;;  %v2021_v61 = vpop.permute.xlu0 %2020 }
 0x420   :  { %v2011_v2 = vadd.f32 %v2007_v17, %v1955_v9  ;;  %v2026_v20 = vadd.f32 %v2021_v61, %v1968_v27  ;;  %v2222_v27 = vmul.f32 %v2221_v56, %v4548_v1  ;;  %v2227_v17 = vstv %s4750_s9 }
 0x422   :  { %2104 = vrot.lane.b32.xlu0 %v2100_v54, %s3123_s6  ;;  %2106 = vrot.lane.b32.xlu1 %v2101_v59, %s3123_s6  ;;  %v3034_v59 = vld [vmem:[#allocation3 + $0xb] sm:$0xff] }
 0x423   :  { %v2023_v62 = vpop.permute.xlu1 %2022  ;;  %v2063_v47 = vpop.permute.xlu0 %2062 }
 0x424   :  { %v2027_v46 = vadd.f32 %v2023_v62, %v1969_v51  ;;  %v2068_v40 = vadd.f32 %v2063_v47, %v2010_v45  ;;  %v2223_v62 = vmul.f32 %v2221_v56, %v4564_v34  ;;  %v2228_v47 = vmul.f32 %v2227_v17, %v4548_v1 }
 0x426   :  { %2162 = vrot.lane.b32.xlu0 %v2158_v35, %s3125_s12  ;;  %2164 = vrot.lane.b32.xlu1 %v2159_v19, %s3125_s12 }
 0x427   :  { %v2065_v52 = vpop.permute.xlu1 %2064  ;;  %v2077_v57 = vpop.permute.xlu0 %2076 }
 0x428   :  { %v2082_v24 = vadd.f32 %v2077_v57, %v2026_v20  ;;  %v2069_v4 = vadd.f32 %v2065_v52, %v2011_v2  ;;  %v3033_v20 = vld [vmem:[#allocation3 + $0x3] sm:$0xff]  ;;  %v2469_v2 = vmul.f32 %v3034_v59, %v2467_v33 }
 0x429   :  { %v2468_v5 = vmul.f32 %v3033_v20, %v2467_v33 }
 0x42a   :  { %2244 = vrot.lane.b32.xlu0 %v2240_v43, %s3118_s11  ;;  %2246 = vrot.lane.b32.xlu1 %v2241_v50, %s3118_s11  ;;  %v2607_v43 = vstv %s4765_s13 }
 0x42b   :  { %v2079_v23 = vpop.permute.xlu1 %2078  ;;  %v2121_v11 = vpop.permute.xlu0 %2120 }
 0x42c   :  { %v2083_v6 = vadd.f32 %v2079_v23, %v2027_v46  ;;  %v2126_v13 = vadd.f32 %v2121_v11, %v2068_v40  ;;  %v2525_v46 = vstv %s4756_s10  ;;  %v2608_v11 = vmul.f32 %v2607_v43, %v4654_v48 }
 0x42d   :  { %v2526_v52 = vmul.f32 %v2525_v46, %v5066_v36  ;;  %v2527_v57 = vmul.f32 %v2525_v46, %v5067_v10 }
 0x42e   :  { %2302 = vrot.lane.b32.xlu0 %v2298_v53, %s3119_s16  ;;  %2304 = vrot.lane.b32.xlu1 %v2299_v44, %s3119_s16  ;;  %v2666_v53 = vmul.f32 %v2665_v58, %v5068_v41  ;;  %v2721_v44 = vstv %s2999_s14 }
 0x42f   :  { %v2123_v30 = vpop.permute.xlu1 %2122  ;;  %v2135_v55 = vpop.permute.xlu0 %2134  ;;  %v2723_v25 = vmul.f32 %v2721_v44, %v5069_v26 }
 0x430   :  { %v2140_v14 = vadd.f32 %v2135_v55, %v2082_v24  ;;  %v2127_v61 = vadd.f32 %v2123_v30, %v2069_v4  ;;  %v2229_v24 = vmul.f32 %v2227_v17, %v4564_v34  ;;  %v2722_v55 = vmul.f32 %v2721_v44, %v5068_v41 }
 0x432   :  { %2358 = vrot.lane.b32.xlu0 %v2354_v32, %s3120_s21  ;;  %2360 = vrot.lane.b32.xlu1 %v2355_v22, %s3120_s21 }
 0x433   :  { %v2137_v12 = vpop.permute.xlu1 %2136  ;;  %v2177_v31 = vpop.permute.xlu0 %2176 }
 0x434   :  { %v2141_v45 = vadd.f32 %v2137_v12, %v2083_v6  ;;  %v2182_v9 = vadd.f32 %v2177_v31, %v2126_v13  ;;  %v2609_v6 = vmul.f32 %v2607_v43, %v4665_v42 }
 0x436   :  { %2416 = vrot.lane.b32.xlu0 %v2412_v63, %s3122_s28  ;;  %2418 = vrot.lane.b32.xlu1 %v2413_v39, %s3122_s28  ;;  %v2224_v54 = vadd.f32 %v2222_v27, %v2182_v9 }
 0x437   :  { %v2179_v29 = vpop.permute.xlu1 %2178  ;;  %v2191_v18 = vpop.permute.xlu0 %2190 }
 0x438   :  { %v2183_v7 = vadd.f32 %v2179_v29, %v2127_v61  ;;  %v2196_v51 = vadd.f32 %v2191_v18, %v2140_v14 }
 0x43a   :  { %2472 = vrot.lane.b32.xlu0 %v2468_v5, %s3123_s6  ;;  %2474 = vrot.lane.b32.xlu1 %v2469_v2, %s3123_s6  ;;  %v2225_v8 = vadd.f32 %v2223_v62, %v2183_v7  ;;  %v2230_v35 = vadd.f32 %v2228_v47, %v2196_v51  ;;  %s4794_s6 = sld [smem:[#allocation8 + $0x56]] }
 0x43b   :  { %v2193_v15 = vpop.permute.xlu1 %2192  ;;  %v2259_v19 = vpop.permute.xlu0 %2258 }
 0x43c   :  { %v2197_v38 = vadd.f32 %v2193_v15, %v2141_v45  ;;  %v2264_v63 = vadd.f32 %v2259_v19, %v2224_v54 }
 0x43e   :  { %2530 = vrot.lane.b32.xlu0 %v2526_v52, %s3125_s12  ;;  %2532 = vrot.lane.b32.xlu1 %v2527_v57, %s3125_s12  ;;  %v2231_v50 = vadd.f32 %v2229_v24, %v2197_v38 }
 0x43f   :  { %v2261_v49 = vpop.permute.xlu1 %2260  ;;  %v2273_v23 = vpop.permute.xlu0 %2272 }
 0x440   :  { %v2265_v26 = vadd.f32 %v2261_v49, %v2225_v8  ;;  %v2278_v4 = vadd.f32 %v2273_v23, %v2230_v35  ;;  %v2595_v35 = vstv %s4794_s6 }
 0x441   :  { %v2597_v44 = vmul.f32 %v2595_v35, %v4665_v42 }
 0x442   :  { %2612 = vrot.lane.b32.xlu0 %v2608_v11, %s3118_s11  ;;  %2614 = vrot.lane.b32.xlu1 %v2609_v6, %s3118_s11  ;;  %s4792_s11 = sld [smem:[#allocation8 + $0x55]]  ;;  %v2596_v11 = vmul.f32 %v2595_v35, %v4654_v48 }
 0x443   :  { %v2275_v36 = vpop.permute.xlu1 %2274  ;;  %v2317_v10 = vpop.permute.xlu0 %2316 }
 0x444   :  { %v2322_v33 = vadd.f32 %v2317_v10, %v2264_v63  ;;  %v2279_v20 = vadd.f32 %v2275_v36, %v2231_v50 }
 0x446   :  { %2670 = vrot.lane.b32.xlu0 %v2666_v53, %s3119_s16  ;;  %2672 = vrot.lane.b32.xlu1 %v2667_v21, %s3119_s16 }
 0x447   :  { %v2319_v37 = vpop.permute.xlu1 %2318  ;;  %v2331_v30 = vpop.permute.xlu0 %2330 }
 0x448   :  { %v2323_v17 = vadd.f32 %v2319_v37, %v2265_v26  ;;  %v2336_v61 = vadd.f32 %v2331_v30, %v2278_v4  ;;  %v2589_v18 = vstv %s4792_s11 }
 0x449   :  { %v2590_v51 = vmul.f32 %v2589_v18, %v4654_v48  ;;  %v2591_v43 = vmul.f32 %v2589_v18, %v4665_v42  ;;  %v1882_v18 = vadd.f32 %v4560_v0, %v4500_v16 }
 0x44a   :  { %2726 = vrot.lane.b32.xlu0 %v2722_v55, %s3120_s21  ;;  %2728 = vrot.lane.b32.xlu1 %v2723_v25, %s3120_s21  ;;  %s2959_s21 = sld [smem:[#allocation8 + $0x38]] }
 0x44b   :  { %v2333_v40 = vpop.permute.xlu1 %2332  ;;  %v2373_v14 = vpop.permute.xlu0 %2372 }
 0x44c   :  { %v2378_v45 = vadd.f32 %v2373_v14, %v2322_v33  ;;  %v2337_v62 = vadd.f32 %v2333_v40, %v2279_v20 }
 0x44f   :  { %v2375_v32 = vpop.permute.xlu1 %2374  ;;  %v2389_v22 = vpop.permute.xlu0 %2388 }
 0x450   :  { %v2379_v5 = vadd.f32 %v2375_v32, %v2323_v17  ;;  %v2394_v59 = vadd.f32 %v2389_v22, %v2336_v61 }
 0x453   :  { %v2391_v56 = vpop.permute.xlu1 %2390  ;;  %v2431_v13 = vpop.permute.xlu0 %2430 }
 0x454   :  { %v2436_v29 = vadd.f32 %v2431_v13, %v2378_v45  ;;  %v2395_v15 = vadd.f32 %v2391_v56, %v2337_v62 }
 0x457   :  { %v2433_v12 = vpop.permute.xlu1 %2432  ;;  %v2445_v31 = vpop.permute.xlu0 %2444 }
 0x458   :  { %v2437_v47 = vadd.f32 %v2433_v12, %v2379_v5  ;;  %v2450_v46 = vadd.f32 %v2445_v31, %v2394_v59  ;;  %v1940_v59 = vadd.f32 %v4600_v3, %v1882_v18 }
 0x45b   :  { %v2447_v39 = vpop.permute.xlu1 %2446  ;;  %v2489_v41 = vpop.permute.xlu0 %2488 }
 0x45c   :  { %v2494_v2 = vadd.f32 %v2489_v41, %v2436_v29  ;;  %v2451_v50 = vadd.f32 %v2447_v39, %v2395_v15 }
 0x45f   :  { %v2491_v9 = vpop.permute.xlu1 %2490  ;;  %v2503_v27 = vpop.permute.xlu0 %2502 }
 0x460   :  { %v2495_v19 = vadd.f32 %v2491_v9, %v2437_v47  ;;  %v2508_v38 = vadd.f32 %v2503_v27, %v2450_v46  ;;  %v2215_v47 = vstv %s2959_s21 }
 0x463   :  { %v2505_v54 = vpop.permute.xlu1 %2504  ;;  %v2545_v7 = vpop.permute.xlu0 %2544 }
 0x464   :  { %v2550_v8 = vadd.f32 %v2545_v7, %v2494_v2  ;;  %v2509_v6 = vadd.f32 %v2505_v54, %v2451_v50  ;;  %v1996_v2 = vadd.f32 %v4628_v28, %v1940_v59 }
 0x466   :  { %v2592_v52 = vadd.f32 %v2590_v51, %v2550_v8 }
 0x467   :  { %v2547_v57 = vpop.permute.xlu1 %2546  ;;  %v2559_v24 = vpop.permute.xlu0 %2558 }
 0x468   :  { %v2551_v49 = vadd.f32 %v2547_v57, %v2495_v19  ;;  %v2564_v23 = vadd.f32 %v2559_v24, %v2508_v38  ;;  %v2217_v19 = vmul.f32 %v2215_v47, %v4564_v34  ;;  %v2216_v38 = vmul.f32 %v2215_v47, %v4548_v1 }
 0x46a   :  { %v2593_v58 = vadd.f32 %v2591_v43, %v2551_v49  ;;  %v2598_v36 = vadd.f32 %v2596_v11, %v2564_v23 }
 0x46b   :  { %v2561_v10 = vpop.permute.xlu1 %2560  ;;  %v2627_v53 = vpop.permute.xlu0 %2626 }
 0x46c   :  { %v2565_v21 = vadd.f32 %v2561_v10, %v2509_v6  ;;  %v2632_v22 = vadd.f32 %v2627_v53, %v2592_v52 }
 0x46e   :  { %v2599_v37 = vadd.f32 %v2597_v44, %v2565_v21 }
 0x46f   :  { %v2629_v30 = vpop.permute.xlu1 %2628  ;;  %v2641_v55 = vpop.permute.xlu0 %2640 }
 0x470   :  { %v2633_v31 = vadd.f32 %v2629_v30, %v2593_v58  ;;  %v2646_v26 = vadd.f32 %v2641_v55, %v2598_v36 }
 0x473   :  { %v2643_v25 = vpop.permute.xlu1 %2642  ;;  %v2685_v40 = vpop.permute.xlu0 %2684 }
 0x474   :  { %v2690_v56 = vadd.f32 %v2685_v40, %v2632_v22  ;;  %v2647_v4 = vadd.f32 %v2643_v25, %v2599_v37 }
 0x477   :  { %v2687_v14 = vpop.permute.xlu1 %2686  ;;  %v2699_v32 = vpop.permute.xlu0 %2698 }
 0x478   :  { %v2691_v39 = vadd.f32 %v2687_v14, %v2633_v31  ;;  %v2704_v45 = vadd.f32 %v2699_v32, %v2646_v26 }
 0x47b   :  { %v2701_v13 = vpop.permute.xlu1 %2700  ;;  %v2741_v12 = vpop.permute.xlu0 %2740 }
 0x47c   :  { %v2746_v63 = vadd.f32 %v2741_v12, %v2690_v56  ;;  %v2705_v9 = vadd.f32 %v2701_v13, %v2647_v4 }
 0x47e   :  { %2750 = vrot.lane.b32.xlu0 %v2746_v63, %s3119_s16 }
 0x47f   :  { %v2743_v41 = vpop.permute.xlu1 %2742 }
 0x480   :  { %v2747_v33 = vadd.f32 %v2743_v41, %v2691_v39 }
 0x482   :  { %2752 = vrot.lane.b32.xlu1 %v2747_v33, %s3119_s16  ;;  %s2987_s16 = sld [smem:[#allocation8 + $0x54]] }
 0x488   :  { %v2583_v37 = vstv %s2987_s16 }
 0x489   :  { %v2585_v22 = vmul.f32 %v2583_v37, %v4665_v42  ;;  %v2584_v56 = vmul.f32 %v2583_v37, %v4654_v48 }
 0x48c   :  { %v2763_v27 = vpop.permute.xlu1 %2762  ;;  %v2761_v17 = vpop.permute.xlu0 %2760 }
 0x48d   :  { %v2767_v61 = vadd.f32 %v2763_v27, %v2705_v9  ;;  %v2766_v29 = vadd.f32 %v2761_v17, %v2704_v45 }
 0x48f   :  { %2772 = vrot.lane.b32.xlu1 %v2767_v61, %s3122_s28  ;;  %2770 = vrot.lane.b32.xlu0 %v2766_v29, %s3122_s28  ;;  %s3126_s28 = smov [#allocation11]  }
 0x490   :  { %v2051_v20 = vpop.permute.xlu1 %2050  ;;  %v2049_v5 = vpop.permute.xlu0 %2048  ;;  %s2790_s12 = sshll.u32 %s3126_s28, 4  ;;  %s2791_s12 = int_to_ptr.vmem [resolvable:$true] %s2790_s12 }
 0x491   :  { %v2055_v51 = vadd.f32 %v2051_v20, %v4717_v60  ;;  %v2054_v62 = vadd.f32 %v2049_v5, %v1996_v2  ;;  %s3081_s24 = scalar_lea.vmem %s2791_s12, 512  ;;  %p3086_p5 = scmp.lt.s32.totalorder %s2791_s12, %s2791_s12 }
 0x492   :  { %p3082_p4 = scmp.ne.s32.totalorder %s2791_s12, %s3081_s24  ;;  %p3087_p6 = scmp.lt.s32.totalorder %s3081_s24, %s3081_s24 }
 0x494   :  { %v2107_v54 = vpop.permute.xlu1 %2106  ;;  %v2105_v7 = vpop.permute.xlu0 %2104  ;;  %p3088_p7 = por %p3087_p6, %p3086_p5 }
 0x495   :  { %v2111_v46 = vadd.f32 %v2107_v54, %v2055_v51  ;;  %v2110_v8 = vadd.f32 %v2105_v7, %v2054_v62  ;;  %v5070_v54 = vld [vmem:[#allocation80_spill] sm:$0xff]  ;;  %v5071_v62 = vld [vmem:[#allocation74_spill] sm:$0xff] }
 0x496   :  { %p3089_p8 = pnand %p3088_p7, %p3082_p4 }
 0x498   :  { %v2165_v35 = vpop.permute.xlu1 %2164  ;;  %v2163_v16 = vpop.permute.xlu0 %2162 }
 0x499   :  { %v2169_v0 = vadd.f32 %v2165_v35, %v2111_v46  ;;  %v2168_v15 = vadd.f32 %v2163_v16, %v2110_v8 }
 0x49b   :  { %v2219_v52 = vadd.f32 %v2217_v19, %v2169_v0  ;;  %v2218_v3 = vadd.f32 %v2216_v38, %v2168_v15 }
 0x49c   :  { %v2247_v57 = vpop.permute.xlu1 %2246  ;;  %v2245_v28 = vpop.permute.xlu0 %2244 }
 0x49d   :  { %v2251_v49 = vadd.f32 %v2247_v57, %v2219_v52  ;;  %v2250_v23 = vadd.f32 %v2245_v28, %v2218_v3 }
 0x4a0   :  { %v2305_v24 = vpop.permute.xlu1 %2304  ;;  %v2303_v43 = vpop.permute.xlu0 %2302 }
 0x4a1   :  { %v2309_v58 = vadd.f32 %v2305_v24, %v2251_v49  ;;  %v2308_v36 = vadd.f32 %v2303_v43, %v2250_v23 }
 0x4a4   :  { %v2361_v50 = vpop.permute.xlu1 %2360  ;;  %v2359_v60 = vpop.permute.xlu0 %2358 }
 0x4a5   :  { %v2365_v10 = vadd.f32 %v2361_v50, %v2309_v58  ;;  %v2364_v53 = vadd.f32 %v2359_v60, %v2308_v36 }
 0x4a8   :  { %v2419_v11 = vpop.permute.xlu1 %2418  ;;  %v2417_v6 = vpop.permute.xlu0 %2416 }
 0x4a9   :  { %v2423_v1 = vadd.f32 %v2419_v11, %v2365_v10  ;;  %v2422_v44 = vadd.f32 %v2417_v6, %v2364_v53 }
 0x4ac   :  { %v2475_v34 = vpop.permute.xlu1 %2474  ;;  %v2473_v21 = vpop.permute.xlu0 %2472 }
 0x4ad   :  { %v2479_v30 = vadd.f32 %v2475_v34, %v2423_v1  ;;  %v2478_v55 = vadd.f32 %v2473_v21, %v2422_v44 }
 0x4b0   :  { %v2533_v25 = vpop.permute.xlu1 %2532  ;;  %v2531_v40 = vpop.permute.xlu0 %2530 }
 0x4b1   :  { %v2537_v14 = vadd.f32 %v2533_v25, %v2479_v30  ;;  %v2536_v32 = vadd.f32 %v2531_v40, %v2478_v55 }
 0x4b3   :  { %v2587_v13 = vadd.f32 %v2585_v22, %v2537_v14  ;;  %v2586_v12 = vadd.f32 %v2584_v56, %v2536_v32 }
 0x4b4   :  { %v2615_v31 = vpop.permute.xlu1 %2614  ;;  %v2613_v63 = vpop.permute.xlu0 %2612 }
 0x4b5   :  { %v2619_v4 = vadd.f32 %v2615_v31, %v2587_v13  ;;  %v2618_v45 = vadd.f32 %v2613_v63, %v2586_v12 }
 0x4b8   :  { %v2673_v39 = vpop.permute.xlu1 %2672  ;;  %v2671_v41 = vpop.permute.xlu0 %2670 }
 0x4b9   :  { %v2677_v9 = vadd.f32 %v2673_v39, %v2619_v4  ;;  %v2676_v27 = vadd.f32 %v2671_v41, %v2618_v45 }
 0x4bc   :  { %v2729_v33 = vpop.permute.xlu1 %2728  ;;  %v2727_v26 = vpop.permute.xlu0 %2726 }
 0x4bd   :  { %v2733_v29 = vadd.f32 %v2729_v33, %v2677_v9  ;;  %v2732_v18 = vadd.f32 %v2727_v26, %v2676_v27 }
 0x4f0   :  { %v2751_v17 = vpop.permute.xlu0 %2750 }
 0x4f1   :  { %v2756_v20 = vadd.f32 %v2751_v17, %v2732_v18 }
 0x4f4   :  { %v2753_v61 = vpop.permute.xlu1 %2752 }
 0x4f5   :  { %v2757_v42 = vadd.f32 %v2753_v61, %v2733_v29 }
 0x501   :  { %v2773_v5 = vpop.permute.xlu1 %2772  ;;  %v2771_v48 = vpop.permute.xlu0 %2770 }
 0x502   :  { %v2777_v59 = vadd.f32 %v2773_v5, %v2757_v42  ;;  %v2776_v2 = vadd.f32 %v2771_v48, %v2756_v20 }
 0x504   :  { %v2779_v7 = vmul.f32 %v2777_v59, %v5070_v54  ;;  %v2778_v51 = vmul.f32 %v2776_v2, %v5070_v54 }
 0x506   :  { %v2781_v47 = vadd.f32 %v2779_v7, %v5071_v62  ;;  %v2780_v46 = vadd.f32 %v2778_v51, %v5071_v62 }
 0x508   :  { %2783 = vst.msk [vmem:[#allocation11 + $0x10] sm:$0xff] %vm1427_vm3, %v2780_v46  ;;  %2784 = vst.msk [vmem:[#allocation11 + $0x18] sm:$0xff] %vm1427_vm3, %v2781_v47 }
 0x509   :  { %3092 = shalt.err (!%p3089_p8)
}
 0x50a   :  { %s3093_s18 = scalar_lea.hbm %s4839_s3, 512 }
 0x50b   :  { %p3094_p9 = scmp.ne.s32.totalorder %s4839_s3, %s3093_s18  ;;  %p3097_p10 = scmp.lt.u32.totalorder %s3093_s18, %s4839_s3 }
 0x50d   :  { %p3099_p11 = pnand %p3097_p10, %p3094_p9 }
 0x50f   :  { %3102 = shalt.err (!%p3099_p11)
}
 0x510   :  { %2796 = dma.vmem_to_hbm [thread:$0]  %s2791_s12, 512, %s4839_s3, [#allocation6], %s3112_s1, %s3112_s1, %s3113_s25  }
 0x511   :  { %3109 = dma.done.wait [#allocation6], 512  }
 0x512   :  { %3110 = vsyncadd [#allocation6], 4294966784 }
 0x513   :  { %2800 = vsyncpa [#allocation5], 1 }
 0x514   :  { %2801 = vsyncpa [#allocation6], 1 }
 0x515   :  { %2802 = vsyncpa [#allocation7], 1 }
 0x516   :  { %2803 = vsyncpa [#allocation10], 1 }

</bundles_post_ra>
